<compile_context>
chip_gen: v5e
topology: v5e:2x2
jax: 0.10.0
libtpu: 0.0.40
codegen_flags: <defaults>
</compile_context>

<pallas_src>
import functools

import jax
import jax.numpy as jnp
import numpy as np
from jax.experimental import pallas as pl
from jax.experimental.pallas import tpu as pltpu


# ---------------------------------------------------------------------------
# Fused kernel:
#   batched input-gate precompute -> encoder recurrence -> decoder recurrence
#   (stash h_t, bf16) -> one batched vocab projection -> lane-dense store.
# Gate layout inside the kernel is (i, f, o, g), each block Hp lanes wide.
# ---------------------------------------------------------------------------
def _seq2seq_kernel(src_ref, tgt_ref,
                    e_wih_ref, e_whh_ref, e_b_ref,
                    d_wih_ref, d_whh_ref, d_b_ref,
                    wout_ref, bout_ref,
                    out_ref,
                    enc_g_ref, dec_g_ref, hslab_ref, *, Hp):
    S, Bp, Ep = src_ref.shape
    Tm1 = tgt_ref.shape[0]            # decoder consumes target steps 0..T-2
    Vp = out_ref.shape[2]
    bf16, f32 = jnp.bfloat16, jnp.float32

    # Hoisted recurrent weights (single VMEM load each).
    e_whh = e_whh_ref[...]
    d_whh = d_whh_ref[...]

    # ---- input-to-hidden projections, hoisted out of the recurrence --------
    src_flat = src_ref[...].reshape(S * Bp, Ep)
    enc_g_ref[...] = (jnp.dot(src_flat, e_wih_ref[...],
                              preferred_element_type=f32)
                      + e_b_ref[...]).reshape(S, Bp, 4 * Hp)
    tgt_flat = tgt_ref[...].reshape(Tm1 * Bp, Ep)
    dec_g_ref[...] = (jnp.dot(tgt_flat, d_wih_ref[...],
                              preferred_element_type=f32)
                      + d_b_ref[...]).reshape(Tm1, Bp, 4 * Hp)

    def cell(pre_gates, h_bf16, c, whh):
        gates = pre_gates + jnp.dot(h_bf16, whh, preferred_element_type=f32)
        sig = jax.nn.sigmoid(gates[:, :3 * Hp])       # (i, f, o) in one call
        g = jnp.tanh(gates[:, 3 * Hp:])
        i = sig[:, 0 * Hp:1 * Hp]
        f = sig[:, 1 * Hp:2 * Hp]
        o = sig[:, 2 * Hp:3 * Hp]
        c_new = f * c + i * g
        h_new = o * jnp.tanh(c_new)
        return h_new.astype(bf16), c_new

    h0 = jnp.zeros((Bp, Hp), bf16)
    c0 = jnp.zeros((Bp, Hp), f32)

    # ---- encoder recurrence -------------------------------------------------
    def enc_body(s, carry):
        h, c = carry
        return cell(enc_g_ref[s], h, c, e_whh)

    enc_unroll = True if S <= 16 else 4
    h, c = jax.lax.fori_loop(0, S, enc_body, (h0, c0), unroll=enc_unroll)

    # ---- decoder recurrence (teacher-forced), stash h_t into bf16 slab -----
    def dec_body(t, carry):
        hh, cc = carry
        hh, cc = cell(dec_g_ref[t], hh, cc, d_whh)
        hslab_ref[t] = hh                      # bf16 store, row t -> output t+1
        return hh, cc

    dec_unroll = True if Tm1 <= 16 else 4
    jax.lax.fori_loop(0, Tm1, dec_body, (h, c), unroll=dec_unroll)

    # ---- batched vocab projection over decoder timesteps 1..T-1 ------------
    hs = hslab_ref[...].reshape(Tm1 * Bp, Hp)                 # already bf16
    logits = (jnp.dot(hs, wout_ref[...], preferred_element_type=f32)
              + bout_ref[...]).reshape(Tm1, Bp, Vp)
    out_ref[0] = jnp.zeros((Bp, Vp), f32)      # torch loop never writes t = 0
    out_ref[pl.ds(1, Tm1)] = logits


# ---------------------------------------------------------------------------
# Padding helpers (glue): gate blocks at 128-lane-aligned offsets, reordered
# from PyTorch's (i, f, g, o) to the kernel's (i, f, o, g).
# ---------------------------------------------------------------------------
_GATE_SRC = (0, 1, 3, 2)     # dst block k takes PyTorch gate _GATE_SRC[k]


def _round_up(x, m):
    return (x + m - 1) // m * m


def _pad_gate_matrix(w, Kp, H, Hp):
    """w: [K, 4H] in (i,f,g,o) order -> [Kp, 4*Hp] in (i,f,o,g) lane-aligned."""
    K = w.shape[0]
    out = jnp.zeros((Kp, 4 * Hp), w.dtype)
    for dst, src in enumerate(_GATE_SRC):
        out = out.at[:K, dst * Hp:dst * Hp + H].set(w[:, src * H:(src + 1) * H])
    return out


def _pad_gate_bias(b, H, Hp):
    out = jnp.zeros((1, 4 * Hp), b.dtype)
    for dst, src in enumerate(_GATE_SRC):
        out = out.at[:, dst * Hp:dst * Hp + H].set(b[:, src * H:(src + 1) * H])
    return out


# ---------------------------------------------------------------------------
# Seq2Seq forward (Pallas) + parameters + pure-JAX reference
# ---------------------------------------------------------------------------
def init_params(key, src_vocab, tgt_vocab, emb, hidden):
    ks = jax.random.split(key, 10)
    scale = 0.1
    return {
        "enc_emb":    scale * jax.random.normal(ks[0], (src_vocab, emb), jnp.float32),
        "enc_wih_t":  scale * jax.random.normal(ks[1], (emb, 4 * hidden), jnp.float32),
        "enc_whh_t":  scale * jax.random.normal(ks[2], (hidden, 4 * hidden), jnp.float32),
        "enc_b":      scale * jax.random.normal(ks[3], (1, 4 * hidden), jnp.float32),
        "dec_emb":    scale * jax.random.normal(ks[4], (tgt_vocab, emb), jnp.float32),
        "dec_wih_t":  scale * jax.random.normal(ks[5], (emb, 4 * hidden), jnp.float32),
        "dec_whh_t":  scale * jax.random.normal(ks[6], (hidden, 4 * hidden), jnp.float32),
        "dec_b":      scale * jax.random.normal(ks[7], (1, 4 * hidden), jnp.float32),
        "dec_wout_t": scale * jax.random.normal(ks[8], (hidden, tgt_vocab), jnp.float32),
        "dec_bout":   scale * jax.random.normal(ks[9], (1, tgt_vocab), jnp.float32),
    }


def seq2seq_forward(params, source, target):
    B, S = source.shape
    T = target.shape[1]
    assert T >= 2, "decoder loop needs at least two target tokens"
    E = params["enc_wih_t"].shape[0]
    H = params["enc_whh_t"].shape[0]
    V = params["dec_wout_t"].shape[1]

    LANE, SUB = 128, 8
    Ep, Hp, Vp = _round_up(E, LANE), _round_up(H, LANE), _round_up(V, LANE)
    Bp = _round_up(B, SUB)
    Tm1 = T - 1

    f32, bf16 = jnp.float32, jnp.bfloat16

    # glue: embedding lookup, zero-pad (batch -> 8 sublanes, feat -> 128 lanes),
    # time-major layout [steps, Bp, Ep], bf16 cast for MXU inputs.
    def embed(table, ids):
        e = jnp.take(table, ids, axis=0)                       # [B, steps, E]
        e = jnp.pad(e, ((0, Bp - B), (0, 0), (0, Ep - E)))
        return jnp.transpose(e, (1, 0, 2)).astype(bf16)        # [steps, Bp, Ep]

    src_e = embed(params["enc_emb"], source)                   # [S,   Bp, Ep]
    tgt_e = embed(params["dec_emb"], target[:, :Tm1])          # [T-1, Bp, Ep]

    e_wih = _pad_gate_matrix(params["enc_wih_t"], Ep, H, Hp).astype(bf16)
    e_whh = _pad_gate_matrix(params["enc_whh_t"], Hp, H, Hp).astype(bf16)
    e_b   = _pad_gate_bias(params["enc_b"], H, Hp)
    d_wih = _pad_gate_matrix(params["dec_wih_t"], Ep, H, Hp).astype(bf16)
    d_whh = _pad_gate_matrix(params["dec_whh_t"], Hp, H, Hp).astype(bf16)
    d_b   = _pad_gate_bias(params["dec_b"], H, Hp)
    wout  = jnp.zeros((Hp, Vp), f32).at[:H, :V].set(params["dec_wout_t"]).astype(bf16)
    bout  = jnp.zeros((1, Vp), f32).at[:, :V].set(params["dec_bout"])

    # Resident-VMEM budget -> explicit scoped limit (v5e default is only 16 MiB).
    resident_bytes = (
        (S + Tm1) * Bp * Ep * 2                     # src/tgt embeddings (bf16)
        + 2 * (Ep * 4 * Hp + Hp * 4 * Hp) * 2       # enc/dec Wih, Whh   (bf16)
        + 2 * 4 * Hp * 4                            # enc/dec biases     (f32)
        + Hp * Vp * 2 + Vp * 4                      # wout (bf16), bout  (f32)
        + T * Bp * Vp * 4                           # output             (f32)
        + (S + Tm1) * Bp * 4 * Hp * 4               # gate slabs         (f32)
        + Tm1 * Bp * Hp * 2                         # hidden slab        (bf16)
    )
    vmem_limit = int(min(128 * 1024 * 1024,
                         max(32 * 1024 * 1024, 2 * resident_bytes)))

    kernel = functools.partial(_seq2seq_kernel, Hp=Hp)
    vmem_spec = pl.BlockSpec(memory_space=pltpu.MemorySpace.VMEM)

    out_pad = pl.pallas_call(
        kernel,
        out_shape=jax.ShapeDtypeStruct((T, Bp, Vp), f32),
        in_specs=[vmem_spec] * 10,
        out_specs=vmem_spec,
        scratch_shapes=[
            pltpu.VMEM((S, Bp, 4 * Hp), f32),     # encoder pre-gates
            pltpu.VMEM((Tm1, Bp, 4 * Hp), f32),   # decoder pre-gates
            pltpu.VMEM((Tm1, Bp, Hp), bf16),      # decoder hidden slab
        ],
        compiler_params=pltpu.CompilerParams(vmem_limit_bytes=vmem_limit),
    )(src_e, tgt_e, e_wih, e_whh, e_b, d_wih, d_whh, d_b, wout, bout)

    # glue: back to batch-first, drop batch / vocab padding.
    return jnp.transpose(out_pad, (1, 0, 2))[:B, :, :V]


def seq2seq_reference(params, source, target):
    H = params["enc_whh_t"].shape[0]

    def cell(x, h, c, wih_t, whh_t, b):
        gates = x @ wih_t + h @ whh_t + b
        i = jax.nn.sigmoid(gates[:, :H])
        f = jax.nn.sigmoid(gates[:, H:2 * H])
        g = jnp.tanh(gates[:, 2 * H:3 * H])
        o = jax.nn.sigmoid(gates[:, 3 * H:])
        c2 = f * c + i * g
        return o * jnp.tanh(c2), c2

    src_emb = params["enc_emb"][source]
    B, S, _ = src_emb.shape
    h = jnp.zeros((B, H), jnp.float32)
    c = jnp.zeros((B, H), jnp.float32)
    for s in range(S):
        h, c = cell(src_emb[:, s], h, c, params["enc_wih_t"],
                    params["enc_whh_t"], params["enc_b"])
    T = target.shape[1]
    V = params["dec_bout"].shape[-1]
    outputs = jnp.zeros((B, T, V), jnp.float32)
    tgt_emb = params["dec_emb"][target]
    for t in range(1, T):
        h, c = cell(tgt_emb[:, t - 1], h, c, params["dec_wih_t"],
                    params["dec_whh_t"], params["dec_b"])
        logits = h @ params["dec_wout_t"] + params["dec_bout"]
        outputs = outputs.at[:, t, :].set(logits)
    return outputs


if __name__ == "__main__":
    B, S_SRC, S_TGT = 2, 8, 8
    EMB, HIDDEN = 16, 32
    SRC_VOCAB, TGT_VOCAB = 20, 24

    key = jax.random.PRNGKey(0)
    k_par, k_src, k_tgt = jax.random.split(key, 3)
    params = init_params(k_par, SRC_VOCAB, TGT_VOCAB, EMB, HIDDEN)
    source = jax.random.randint(k_src, (B, S_SRC), 0, SRC_VOCAB, dtype=jnp.int32)
    target = jax.random.randint(k_tgt, (B, S_TGT), 0, TGT_VOCAB, dtype=jnp.int32)

    out = seq2seq_forward(params, source, target)
    out = jax.block_until_ready(out)

    ref = seq2seq_reference(params, source, target)
    # tolerance accounts for bf16 MXU operands / bf16 h carry (f32 accumulation)
    np.testing.assert_allclose(np.asarray(out), np.asarray(ref),
                               rtol=3e-2, atol=1e-2)
    assert out.shape == (B, S_TGT, TGT_VOCAB)
    assert np.allclose(np.asarray(out)[:, 0, :], 0.0)   # row 0 stays zero, like torch
    print("KERNEL_OK")
</pallas_src>

<mosaic_0001>
module attributes {stable_mosaic.version = 11 : i64} {
  func.func @_seq2seq_kernel(%arg0: memref<8x8x128xbf16, #tpu.memory_space<vmem>>, %arg1: memref<7x8x128xbf16, #tpu.memory_space<vmem>>, %arg2: memref<128x512xbf16, #tpu.memory_space<vmem>>, %arg3: memref<128x512xbf16, #tpu.memory_space<vmem>>, %arg4: memref<1x512xf32, #tpu.memory_space<vmem>>, %arg5: memref<128x512xbf16, #tpu.memory_space<vmem>>, %arg6: memref<128x512xbf16, #tpu.memory_space<vmem>>, %arg7: memref<1x512xf32, #tpu.memory_space<vmem>>, %arg8: memref<128x128xbf16, #tpu.memory_space<vmem>>, %arg9: memref<1x128xf32, #tpu.memory_space<vmem>>, %arg10: memref<8x8x128xf32, #tpu.memory_space<vmem>>, %arg11: memref<8x8x512xf32, #tpu.memory_space<vmem>>, %arg12: memref<7x8x512xf32, #tpu.memory_space<vmem>>, %arg13: memref<7x8x128xbf16, #tpu.memory_space<vmem>>) attributes {dimension_semantics = [], scalar_prefetch = 0 : i64, scratch_operands = 3 : i64, tpu.core_type = #tpu.core_type<tc>} {
    %c0 = arith.constant 0 : index
    %c0_0 = arith.constant 0 : index
    %0 = vector.load %arg3[%c0, %c0_0] : memref<128x512xbf16, #tpu.memory_space<vmem>>, vector<128x512xbf16>
    %c0_1 = arith.constant 0 : index
    %c0_2 = arith.constant 0 : index
    %1 = vector.load %arg6[%c0_1, %c0_2] : memref<128x512xbf16, #tpu.memory_space<vmem>>, vector<128x512xbf16>
    %c0_3 = arith.constant 0 : index
    %c0_4 = arith.constant 0 : index
    %c0_5 = arith.constant 0 : index
    %2 = vector.load %arg0[%c0_3, %c0_4, %c0_5] : memref<8x8x128xbf16, #tpu.memory_space<vmem>>, vector<8x8x128xbf16>
    %3 = vector.shape_cast %2 : vector<8x8x128xbf16> to vector<64x128xbf16>
    %c0_6 = arith.constant 0 : index
    %c0_7 = arith.constant 0 : index
    %4 = vector.load %arg2[%c0_6, %c0_7] : memref<128x512xbf16, #tpu.memory_space<vmem>>, vector<128x512xbf16>
    %cst = arith.constant dense<0.000000e+00> : vector<64x512xf32>
    %5 = tpu.matmul %3, %4, %cst {dimension_numbers = #tpu.dot_dimension_numbers<[1], [0], [0], [1], [0, 0, 1, 1], [], []>} : vector<64x128xbf16>, vector<128x512xbf16>, vector<64x512xf32> -> vector<64x512xf32>
    %c0_8 = arith.constant 0 : index
    %c0_9 = arith.constant 0 : index
    %6 = vector.load %arg4[%c0_8, %c0_9] : memref<1x512xf32, #tpu.memory_space<vmem>>, vector<1x512xf32>
    %7 = vector.broadcast %6 : vector<1x512xf32> to vector<64x512xf32>
    %8 = arith.addf %5, %7 : vector<64x512xf32>
    %9 = vector.shape_cast %8 : vector<64x512xf32> to vector<8x8x512xf32>
    %c0_10 = arith.constant 0 : index
    %c0_11 = arith.constant 0 : index
    %c0_12 = arith.constant 0 : index
    %10 = vector.load %arg11[%c0_10, %c0_11, %c0_12] : memref<8x8x512xf32, #tpu.memory_space<vmem>>, vector<8x8x512xf32>
    tpu.vector_store %arg11[%c0_10, %c0_11, %c0_12], %9 {strides = array<i32>} : memref<8x8x512xf32, #tpu.memory_space<vmem>>, vector<8x8x512xf32>,
    %c0_13 = arith.constant 0 : index
    %c0_14 = arith.constant 0 : index
    %c0_15 = arith.constant 0 : index
    %11 = vector.load %arg1[%c0_13, %c0_14, %c0_15] : memref<7x8x128xbf16, #tpu.memory_space<vmem>>, vector<7x8x128xbf16>
    %12 = vector.shape_cast %11 : vector<7x8x128xbf16> to vector<56x128xbf16>
    %c0_16 = arith.constant 0 : index
    %c0_17 = arith.constant 0 : index
    %13 = vector.load %arg5[%c0_16, %c0_17] : memref<128x512xbf16, #tpu.memory_space<vmem>>, vector<128x512xbf16>
    %cst_18 = arith.constant dense<0.000000e+00> : vector<56x512xf32>
    %14 = tpu.matmul %12, %13, %cst_18 {dimension_numbers = #tpu.dot_dimension_numbers<[1], [0], [0], [1], [0, 0, 1, 1], [], []>} : vector<56x128xbf16>, vector<128x512xbf16>, vector<56x512xf32> -> vector<56x512xf32>
    %c0_19 = arith.constant 0 : index
    %c0_20 = arith.constant 0 : index
    %15 = vector.load %arg7[%c0_19, %c0_20] : memref<1x512xf32, #tpu.memory_space<vmem>>, vector<1x512xf32>
    %16 = vector.broadcast %15 : vector<1x512xf32> to vector<56x512xf32>
    %17 = arith.addf %14, %16 : vector<56x512xf32>
    %18 = vector.shape_cast %17 : vector<56x512xf32> to vector<7x8x512xf32>
    %c0_21 = arith.constant 0 : index
    %c0_22 = arith.constant 0 : index
    %c0_23 = arith.constant 0 : index
    %19 = vector.load %arg12[%c0_21, %c0_22, %c0_23] : memref<7x8x512xf32, #tpu.memory_space<vmem>>, vector<7x8x512xf32>
    tpu.vector_store %arg12[%c0_21, %c0_22, %c0_23], %18 {strides = array<i32>} : memref<7x8x512xf32, #tpu.memory_space<vmem>>, vector<7x8x512xf32>,
    %cst_24 = arith.constant 0.000000e+00 : bf16
    %20 = vector.broadcast %cst_24 : bf16 to vector<8x128xbf16>
    %cst_25 = arith.constant 0.000000e+00 : f32
    %21 = vector.broadcast %cst_25 : f32 to vector<8x128xf32>
    %c0_i32 = arith.constant 0 : i32
    %22 = arith.index_cast %c0_i32 : i32 to index
    %c0_26 = arith.constant 0 : index
    %c0_27 = arith.constant 0 : index
    %23 = vector.load %arg11[%22, %c0_26, %c0_27] : memref<8x8x512xf32, #tpu.memory_space<vmem>>, vector<1x8x512xf32>
    %24 = vector.shape_cast %23 : vector<1x8x512xf32> to vector<8x512xf32>
    %cst_28 = arith.constant dense<0.000000e+00> : vector<8x512xf32>
    %25 = tpu.matmul %20, %0, %cst_28 {dimension_numbers = #tpu.dot_dimension_numbers<[1], [0], [0], [1], [0, 0, 1, 1], [], []>} : vector<8x128xbf16>, vector<128x512xbf16>, vector<8x512xf32> -> vector<8x512xf32>
    %26 = arith.addf %24, %25 : vector<8x512xf32>
    %27 = vector.extract_strided_slice %26 {offsets = [0, 0], sizes = [8, 384], strides = [1, 1]} : vector<8x512xf32> to vector<8x384xf32>
    %28 = arith.negf %27 : vector<8x384xf32>
    %29 = math.exp %28 : vector<8x384xf32>
    %cst_29 = arith.constant 1.000000e+00 : f32
    %30 = vector.broadcast %cst_29 : f32 to vector<8x384xf32>
    %31 = arith.addf %30, %29 : vector<8x384xf32>
    %32 = arith.divf %30, %31 : vector<8x384xf32>
    %33 = vector.extract_strided_slice %26 {offsets = [0, 384], sizes = [8, 128], strides = [1, 1]} : vector<8x512xf32> to vector<8x128xf32>
    %34 = math.tanh %33 : vector<8x128xf32>
    %35 = vector.extract_strided_slice %32 {offsets = [0, 0], sizes = [8, 128], strides = [1, 1]} : vector<8x384xf32> to vector<8x128xf32>
    %36 = vector.extract_strided_slice %32 {offsets = [0, 128], sizes = [8, 128], strides = [1, 1]} : vector<8x384xf32> to vector<8x128xf32>
    %37 = vector.extract_strided_slice %32 {offsets = [0, 256], sizes = [8, 128], strides = [1, 1]} : vector<8x384xf32> to vector<8x128xf32>
    %38 = arith.mulf %36, %21 : vector<8x128xf32>
    %39 = arith.mulf %35, %34 : vector<8x128xf32>
    %40 = arith.addf %38, %39 : vector<8x128xf32>
    %41 = math.tanh %40 : vector<8x128xf32>
    %42 = arith.mulf %37, %41 : vector<8x128xf32>
    %43 = arith.truncf %42 : vector<8x128xf32> to vector<8x128xbf16>
    %c1_i32 = arith.constant 1 : i32
    %44 = arith.index_cast %c1_i32 : i32 to index
    %c0_30 = arith.constant 0 : index
    %c0_31 = arith.constant 0 : index
    %45 = vector.load %arg11[%44, %c0_30, %c0_31] : memref<8x8x512xf32, #tpu.memory_space<vmem>>, vector<1x8x512xf32>
    %46 = vector.shape_cast %45 : vector<1x8x512xf32> to vector<8x512xf32>
    %cst_32 = arith.constant dense<0.000000e+00> : vector<8x512xf32>
    %47 = tpu.matmul %43, %0, %cst_32 {dimension_numbers = #tpu.dot_dimension_numbers<[1], [0], [0], [1], [0, 0, 1, 1], [], []>} : vector<8x128xbf16>, vector<128x512xbf16>, vector<8x512xf32> -> vector<8x512xf32>
    %48 = arith.addf %46, %47 : vector<8x512xf32>
    %49 = vector.extract_strided_slice %48 {offsets = [0, 0], sizes = [8, 384], strides = [1, 1]} : vector<8x512xf32> to vector<8x384xf32>
    %50 = arith.negf %49 : vector<8x384xf32>
    %51 = math.exp %50 : vector<8x384xf32>
    %cst_33 = arith.constant 1.000000e+00 : f32
    %52 = vector.broadcast %cst_33 : f32 to vector<8x384xf32>
    %53 = arith.addf %52, %51 : vector<8x384xf32>
    %54 = arith.divf %52, %53 : vector<8x384xf32>
    %55 = vector.extract_strided_slice %48 {offsets = [0, 384], sizes = [8, 128], strides = [1, 1]} : vector<8x512xf32> to vector<8x128xf32>
    %56 = math.tanh %55 : vector<8x128xf32>
    %57 = vector.extract_strided_slice %54 {offsets = [0, 0], sizes = [8, 128], strides = [1, 1]} : vector<8x384xf32> to vector<8x128xf32>
    %58 = vector.extract_strided_slice %54 {offsets = [0, 128], sizes = [8, 128], strides = [1, 1]} : vector<8x384xf32> to vector<8x128xf32>
    %59 = vector.extract_strided_slice %54 {offsets = [0, 256], sizes = [8, 128], strides = [1, 1]} : vector<8x384xf32> to vector<8x128xf32>
    %60 = arith.mulf %58, %40 : vector<8x128xf32>
    %61 = arith.mulf %57, %56 : vector<8x128xf32>
    %62 = arith.addf %60, %61 : vector<8x128xf32>
    %63 = math.tanh %62 : vector<8x128xf32>
    %64 = arith.mulf %59, %63 : vector<8x128xf32>
    %65 = arith.truncf %64 : vector<8x128xf32> to vector<8x128xbf16>
    %c2_i32 = arith.constant 2 : i32
    %66 = arith.index_cast %c2_i32 : i32 to index
    %c0_34 = arith.constant 0 : index
    %c0_35 = arith.constant 0 : index
    %67 = vector.load %arg11[%66, %c0_34, %c0_35] : memref<8x8x512xf32, #tpu.memory_space<vmem>>, vector<1x8x512xf32>
    %68 = vector.shape_cast %67 : vector<1x8x512xf32> to vector<8x512xf32>
    %cst_36 = arith.constant dense<0.000000e+00> : vector<8x512xf32>
    %69 = tpu.matmul %65, %0, %cst_36 {dimension_numbers = #tpu.dot_dimension_numbers<[1], [0], [0], [1], [0, 0, 1, 1], [], []>} : vector<8x128xbf16>, vector<128x512xbf16>, vector<8x512xf32> -> vector<8x512xf32>
    %70 = arith.addf %68, %69 : vector<8x512xf32>
    %71 = vector.extract_strided_slice %70 {offsets = [0, 0], sizes = [8, 384], strides = [1, 1]} : vector<8x512xf32> to vector<8x384xf32>
    %72 = arith.negf %71 : vector<8x384xf32>
    %73 = math.exp %72 : vector<8x384xf32>
    %cst_37 = arith.constant 1.000000e+00 : f32
    %74 = vector.broadcast %cst_37 : f32 to vector<8x384xf32>
    %75 = arith.addf %74, %73 : vector<8x384xf32>
    %76 = arith.divf %74, %75 : vector<8x384xf32>
    %77 = vector.extract_strided_slice %70 {offsets = [0, 384], sizes = [8, 128], strides = [1, 1]} : vector<8x512xf32> to vector<8x128xf32>
    %78 = math.tanh %77 : vector<8x128xf32>
    %79 = vector.extract_strided_slice %76 {offsets = [0, 0], sizes = [8, 128], strides = [1, 1]} : vector<8x384xf32> to vector<8x128xf32>
    %80 = vector.extract_strided_slice %76 {offsets = [0, 128], sizes = [8, 128], strides = [1, 1]} : vector<8x384xf32> to vector<8x128xf32>
    %81 = vector.extract_strided_slice %76 {offsets = [0, 256], sizes = [8, 128], strides = [1, 1]} : vector<8x384xf32> to vector<8x128xf32>
    %82 = arith.mulf %80, %62 : vector<8x128xf32>
    %83 = arith.mulf %79, %78 : vector<8x128xf32>
    %84 = arith.addf %82, %83 : vector<8x128xf32>
    %85 = math.tanh %84 : vector<8x128xf32>
    %86 = arith.mulf %81, %85 : vector<8x128xf32>
    %87 = arith.truncf %86 : vector<8x128xf32> to vector<8x128xbf16>
    %c3_i32 = arith.constant 3 : i32
    %88 = arith.index_cast %c3_i32 : i32 to index
    %c0_38 = arith.constant 0 : index
    %c0_39 = arith.constant 0 : index
    %89 = vector.load %arg11[%88, %c0_38, %c0_39] : memref<8x8x512xf32, #tpu.memory_space<vmem>>, vector<1x8x512xf32>
    %90 = vector.shape_cast %89 : vector<1x8x512xf32> to vector<8x512xf32>
    %cst_40 = arith.constant dense<0.000000e+00> : vector<8x512xf32>
    %91 = tpu.matmul %87, %0, %cst_40 {dimension_numbers = #tpu.dot_dimension_numbers<[1], [0], [0], [1], [0, 0, 1, 1], [], []>} : vector<8x128xbf16>, vector<128x512xbf16>, vector<8x512xf32> -> vector<8x512xf32>
    %92 = arith.addf %90, %91 : vector<8x512xf32>
    %93 = vector.extract_strided_slice %92 {offsets = [0, 0], sizes = [8, 384], strides = [1, 1]} : vector<8x512xf32> to vector<8x384xf32>
    %94 = arith.negf %93 : vector<8x384xf32>
    %95 = math.exp %94 : vector<8x384xf32>
    %cst_41 = arith.constant 1.000000e+00 : f32
    %96 = vector.broadcast %cst_41 : f32 to vector<8x384xf32>
    %97 = arith.addf %96, %95 : vector<8x384xf32>
    %98 = arith.divf %96, %97 : vector<8x384xf32>
    %99 = vector.extract_strided_slice %92 {offsets = [0, 384], sizes = [8, 128], strides = [1, 1]} : vector<8x512xf32> to vector<8x128xf32>
    %100 = math.tanh %99 : vector<8x128xf32>
    %101 = vector.extract_strided_slice %98 {offsets = [0, 0], sizes = [8, 128], strides = [1, 1]} : vector<8x384xf32> to vector<8x128xf32>
    %102 = vector.extract_strided_slice %98 {offsets = [0, 128], sizes = [8, 128], strides = [1, 1]} : vector<8x384xf32> to vector<8x128xf32>
    %103 = vector.extract_strided_slice %98 {offsets = [0, 256], sizes = [8, 128], strides = [1, 1]} : vector<8x384xf32> to vector<8x128xf32>
    %104 = arith.mulf %102, %84 : vector<8x128xf32>
    %105 = arith.mulf %101, %100 : vector<8x128xf32>
    %106 = arith.addf %104, %105 : vector<8x128xf32>
    %107 = math.tanh %106 : vector<8x128xf32>
    %108 = arith.mulf %103, %107 : vector<8x128xf32>
    %109 = arith.truncf %108 : vector<8x128xf32> to vector<8x128xbf16>
    %c4_i32 = arith.constant 4 : i32
    %110 = arith.index_cast %c4_i32 : i32 to index
    %c0_42 = arith.constant 0 : index
    %c0_43 = arith.constant 0 : index
    %111 = vector.load %arg11[%110, %c0_42, %c0_43] : memref<8x8x512xf32, #tpu.memory_space<vmem>>, vector<1x8x512xf32>
    %112 = vector.shape_cast %111 : vector<1x8x512xf32> to vector<8x512xf32>
    %cst_44 = arith.constant dense<0.000000e+00> : vector<8x512xf32>
    %113 = tpu.matmul %109, %0, %cst_44 {dimension_numbers = #tpu.dot_dimension_numbers<[1], [0], [0], [1], [0, 0, 1, 1], [], []>} : vector<8x128xbf16>, vector<128x512xbf16>, vector<8x512xf32> -> vector<8x512xf32>
    %114 = arith.addf %112, %113 : vector<8x512xf32>
    %115 = vector.extract_strided_slice %114 {offsets = [0, 0], sizes = [8, 384], strides = [1, 1]} : vector<8x512xf32> to vector<8x384xf32>
    %116 = arith.negf %115 : vector<8x384xf32>
    %117 = math.exp %116 : vector<8x384xf32>
    %cst_45 = arith.constant 1.000000e+00 : f32
    %118 = vector.broadcast %cst_45 : f32 to vector<8x384xf32>
    %119 = arith.addf %118, %117 : vector<8x384xf32>
    %120 = arith.divf %118, %119 : vector<8x384xf32>
    %121 = vector.extract_strided_slice %114 {offsets = [0, 384], sizes = [8, 128], strides = [1, 1]} : vector<8x512xf32> to vector<8x128xf32>
    %122 = math.tanh %121 : vector<8x128xf32>
    %123 = vector.extract_strided_slice %120 {offsets = [0, 0], sizes = [8, 128], strides = [1, 1]} : vector<8x384xf32> to vector<8x128xf32>
    %124 = vector.extract_strided_slice %120 {offsets = [0, 128], sizes = [8, 128], strides = [1, 1]} : vector<8x384xf32> to vector<8x128xf32>
    %125 = vector.extract_strided_slice %120 {offsets = [0, 256], sizes = [8, 128], strides = [1, 1]} : vector<8x384xf32> to vector<8x128xf32>
    %126 = arith.mulf %124, %106 : vector<8x128xf32>
    %127 = arith.mulf %123, %122 : vector<8x128xf32>
    %128 = arith.addf %126, %127 : vector<8x128xf32>
    %129 = math.tanh %128 : vector<8x128xf32>
    %130 = arith.mulf %125, %129 : vector<8x128xf32>
    %131 = arith.truncf %130 : vector<8x128xf32> to vector<8x128xbf16>
    %c5_i32 = arith.constant 5 : i32
    %132 = arith.index_cast %c5_i32 : i32 to index
    %c0_46 = arith.constant 0 : index
    %c0_47 = arith.constant 0 : index
    %133 = vector.load %arg11[%132, %c0_46, %c0_47] : memref<8x8x512xf32, #tpu.memory_space<vmem>>, vector<1x8x512xf32>
    %134 = vector.shape_cast %133 : vector<1x8x512xf32> to vector<8x512xf32>
    %cst_48 = arith.constant dense<0.000000e+00> : vector<8x512xf32>
    %135 = tpu.matmul %131, %0, %cst_48 {dimension_numbers = #tpu.dot_dimension_numbers<[1], [0], [0], [1], [0, 0, 1, 1], [], []>} : vector<8x128xbf16>, vector<128x512xbf16>, vector<8x512xf32> -> vector<8x512xf32>
    %136 = arith.addf %134, %135 : vector<8x512xf32>
    %137 = vector.extract_strided_slice %136 {offsets = [0, 0], sizes = [8, 384], strides = [1, 1]} : vector<8x512xf32> to vector<8x384xf32>
    %138 = arith.negf %137 : vector<8x384xf32>
    %139 = math.exp %138 : vector<8x384xf32>
    %cst_49 = arith.constant 1.000000e+00 : f32
    %140 = vector.broadcast %cst_49 : f32 to vector<8x384xf32>
    %141 = arith.addf %140, %139 : vector<8x384xf32>
    %142 = arith.divf %140, %141 : vector<8x384xf32>
    %143 = vector.extract_strided_slice %136 {offsets = [0, 384], sizes = [8, 128], strides = [1, 1]} : vector<8x512xf32> to vector<8x128xf32>
    %144 = math.tanh %143 : vector<8x128xf32>
    %145 = vector.extract_strided_slice %142 {offsets = [0, 0], sizes = [8, 128], strides = [1, 1]} : vector<8x384xf32> to vector<8x128xf32>
    %146 = vector.extract_strided_slice %142 {offsets = [0, 128], sizes = [8, 128], strides = [1, 1]} : vector<8x384xf32> to vector<8x128xf32>
    %147 = vector.extract_strided_slice %142 {offsets = [0, 256], sizes = [8, 128], strides = [1, 1]} : vector<8x384xf32> to vector<8x128xf32>
    %148 = arith.mulf %146, %128 : vector<8x128xf32>
    %149 = arith.mulf %145, %144 : vector<8x128xf32>
    %150 = arith.addf %148, %149 : vector<8x128xf32>
    %151 = math.tanh %150 : vector<8x128xf32>
    %152 = arith.mulf %147, %151 : vector<8x128xf32>
    %153 = arith.truncf %152 : vector<8x128xf32> to vector<8x128xbf16>
    %c6_i32 = arith.constant 6 : i32
    %154 = arith.index_cast %c6_i32 : i32 to index
    %c0_50 = arith.constant 0 : index
    %c0_51 = arith.constant 0 : index
    %155 = vector.load %arg11[%154, %c0_50, %c0_51] : memref<8x8x512xf32, #tpu.memory_space<vmem>>, vector<1x8x512xf32>
    %156 = vector.shape_cast %155 : vector<1x8x512xf32> to vector<8x512xf32>
    %cst_52 = arith.constant dense<0.000000e+00> : vector<8x512xf32>
    %157 = tpu.matmul %153, %0, %cst_52 {dimension_numbers = #tpu.dot_dimension_numbers<[1], [0], [0], [1], [0, 0, 1, 1], [], []>} : vector<8x128xbf16>, vector<128x512xbf16>, vector<8x512xf32> -> vector<8x512xf32>
    %158 = arith.addf %156, %157 : vector<8x512xf32>
    %159 = vector.extract_strided_slice %158 {offsets = [0, 0], sizes = [8, 384], strides = [1, 1]} : vector<8x512xf32> to vector<8x384xf32>
    %160 = arith.negf %159 : vector<8x384xf32>
    %161 = math.exp %160 : vector<8x384xf32>
    %cst_53 = arith.constant 1.000000e+00 : f32
    %162 = vector.broadcast %cst_53 : f32 to vector<8x384xf32>
    %163 = arith.addf %162, %161 : vector<8x384xf32>
    %164 = arith.divf %162, %163 : vector<8x384xf32>
    %165 = vector.extract_strided_slice %158 {offsets = [0, 384], sizes = [8, 128], strides = [1, 1]} : vector<8x512xf32> to vector<8x128xf32>
    %166 = math.tanh %165 : vector<8x128xf32>
    %167 = vector.extract_strided_slice %164 {offsets = [0, 0], sizes = [8, 128], strides = [1, 1]} : vector<8x384xf32> to vector<8x128xf32>
    %168 = vector.extract_strided_slice %164 {offsets = [0, 128], sizes = [8, 128], strides = [1, 1]} : vector<8x384xf32> to vector<8x128xf32>
    %169 = vector.extract_strided_slice %164 {offsets = [0, 256], sizes = [8, 128], strides = [1, 1]} : vector<8x384xf32> to vector<8x128xf32>
    %170 = arith.mulf %168, %150 : vector<8x128xf32>
    %171 = arith.mulf %167, %166 : vector<8x128xf32>
    %172 = arith.addf %170, %171 : vector<8x128xf32>
    %173 = math.tanh %172 : vector<8x128xf32>
    %174 = arith.mulf %169, %173 : vector<8x128xf32>
    %175 = arith.truncf %174 : vector<8x128xf32> to vector<8x128xbf16>
    %c7_i32 = arith.constant 7 : i32
    %176 = arith.index_cast %c7_i32 : i32 to index
    %c0_54 = arith.constant 0 : index
    %c0_55 = arith.constant 0 : index
    %177 = vector.load %arg11[%176, %c0_54, %c0_55] : memref<8x8x512xf32, #tpu.memory_space<vmem>>, vector<1x8x512xf32>
    %178 = vector.shape_cast %177 : vector<1x8x512xf32> to vector<8x512xf32>
    %cst_56 = arith.constant dense<0.000000e+00> : vector<8x512xf32>
    %179 = tpu.matmul %175, %0, %cst_56 {dimension_numbers = #tpu.dot_dimension_numbers<[1], [0], [0], [1], [0, 0, 1, 1], [], []>} : vector<8x128xbf16>, vector<128x512xbf16>, vector<8x512xf32> -> vector<8x512xf32>
    %180 = arith.addf %178, %179 : vector<8x512xf32>
    %181 = vector.extract_strided_slice %180 {offsets = [0, 0], sizes = [8, 384], strides = [1, 1]} : vector<8x512xf32> to vector<8x384xf32>
    %182 = arith.negf %181 : vector<8x384xf32>
    %183 = math.exp %182 : vector<8x384xf32>
    %cst_57 = arith.constant 1.000000e+00 : f32
    %184 = vector.broadcast %cst_57 : f32 to vector<8x384xf32>
    %185 = arith.addf %184, %183 : vector<8x384xf32>
    %186 = arith.divf %184, %185 : vector<8x384xf32>
    %187 = vector.extract_strided_slice %180 {offsets = [0, 384], sizes = [8, 128], strides = [1, 1]} : vector<8x512xf32> to vector<8x128xf32>
    %188 = math.tanh %187 : vector<8x128xf32>
    %189 = vector.extract_strided_slice %186 {offsets = [0, 0], sizes = [8, 128], strides = [1, 1]} : vector<8x384xf32> to vector<8x128xf32>
    %190 = vector.extract_strided_slice %186 {offsets = [0, 128], sizes = [8, 128], strides = [1, 1]} : vector<8x384xf32> to vector<8x128xf32>
    %191 = vector.extract_strided_slice %186 {offsets = [0, 256], sizes = [8, 128], strides = [1, 1]} : vector<8x384xf32> to vector<8x128xf32>
    %192 = arith.mulf %190, %172 : vector<8x128xf32>
    %193 = arith.mulf %189, %188 : vector<8x128xf32>
    %194 = arith.addf %192, %193 : vector<8x128xf32>
    %195 = math.tanh %194 : vector<8x128xf32>
    %196 = arith.mulf %191, %195 : vector<8x128xf32>
    %197 = arith.truncf %196 : vector<8x128xf32> to vector<8x128xbf16>
    %c8_i32 = arith.constant 8 : i32
    %c0_i32_58 = arith.constant 0 : i32
    %198 = arith.index_cast %c0_i32_58 : i32 to index
    %c0_59 = arith.constant 0 : index
    %c0_60 = arith.constant 0 : index
    %199 = vector.load %arg12[%198, %c0_59, %c0_60] : memref<7x8x512xf32, #tpu.memory_space<vmem>>, vector<1x8x512xf32>
    %200 = vector.shape_cast %199 : vector<1x8x512xf32> to vector<8x512xf32>
    %cst_61 = arith.constant dense<0.000000e+00> : vector<8x512xf32>
    %201 = tpu.matmul %197, %1, %cst_61 {dimension_numbers = #tpu.dot_dimension_numbers<[1], [0], [0], [1], [0, 0, 1, 1], [], []>} : vector<8x128xbf16>, vector<128x512xbf16>, vector<8x512xf32> -> vector<8x512xf32>
    %202 = arith.addf %200, %201 : vector<8x512xf32>
    %203 = vector.extract_strided_slice %202 {offsets = [0, 0], sizes = [8, 384], strides = [1, 1]} : vector<8x512xf32> to vector<8x384xf32>
    %204 = arith.negf %203 : vector<8x384xf32>
    %205 = math.exp %204 : vector<8x384xf32>
    %cst_62 = arith.constant 1.000000e+00 : f32
    %206 = vector.broadcast %cst_62 : f32 to vector<8x384xf32>
    %207 = arith.addf %206, %205 : vector<8x384xf32>
    %208 = arith.divf %206, %207 : vector<8x384xf32>
    %209 = vector.extract_strided_slice %202 {offsets = [0, 384], sizes = [8, 128], strides = [1, 1]} : vector<8x512xf32> to vector<8x128xf32>
    %210 = math.tanh %209 : vector<8x128xf32>
    %211 = vector.extract_strided_slice %208 {offsets = [0, 0], sizes = [8, 128], strides = [1, 1]} : vector<8x384xf32> to vector<8x128xf32>
    %212 = vector.extract_strided_slice %208 {offsets = [0, 128], sizes = [8, 128], strides = [1, 1]} : vector<8x384xf32> to vector<8x128xf32>
    %213 = vector.extract_strided_slice %208 {offsets = [0, 256], sizes = [8, 128], strides = [1, 1]} : vector<8x384xf32> to vector<8x128xf32>
    %214 = arith.mulf %212, %194 : vector<8x128xf32>
    %215 = arith.mulf %211, %210 : vector<8x128xf32>
    %216 = arith.addf %214, %215 : vector<8x128xf32>
    %217 = math.tanh %216 : vector<8x128xf32>
    %218 = arith.mulf %213, %217 : vector<8x128xf32>
    %219 = arith.truncf %218 : vector<8x128xf32> to vector<8x128xbf16>
    %220 = arith.index_cast %c0_i32_58 : i32 to index
    %c0_63 = arith.constant 0 : index
    %c0_64 = arith.constant 0 : index
    %221 = vector.load %arg13[%220, %c0_63, %c0_64] : memref<7x8x128xbf16, #tpu.memory_space<vmem>>, vector<1x8x128xbf16>
    %222 = vector.shape_cast %221 : vector<1x8x128xbf16> to vector<8x128xbf16>
    %223 = vector.shape_cast %219 : vector<8x128xbf16> to vector<1x8x128xbf16>
    tpu.vector_store %arg13[%220, %c0_63, %c0_64], %223 {strides = array<i32>} : memref<7x8x128xbf16, #tpu.memory_space<vmem>>, vector<1x8x128xbf16>,
    %c1_i32_65 = arith.constant 1 : i32
    %224 = arith.index_cast %c1_i32_65 : i32 to index
    %c0_66 = arith.constant 0 : index
    %c0_67 = arith.constant 0 : index
    %225 = vector.load %arg12[%224, %c0_66, %c0_67] : memref<7x8x512xf32, #tpu.memory_space<vmem>>, vector<1x8x512xf32>
    %226 = vector.shape_cast %225 : vector<1x8x512xf32> to vector<8x512xf32>
    %cst_68 = arith.constant dense<0.000000e+00> : vector<8x512xf32>
    %227 = tpu.matmul %219, %1, %cst_68 {dimension_numbers = #tpu.dot_dimension_numbers<[1], [0], [0], [1], [0, 0, 1, 1], [], []>} : vector<8x128xbf16>, vector<128x512xbf16>, vector<8x512xf32> -> vector<8x512xf32>
    %228 = arith.addf %226, %227 : vector<8x512xf32>
    %229 = vector.extract_strided_slice %228 {offsets = [0, 0], sizes = [8, 384], strides = [1, 1]} : vector<8x512xf32> to vector<8x384xf32>
    %230 = arith.negf %229 : vector<8x384xf32>
    %231 = math.exp %230 : vector<8x384xf32>
    %cst_69 = arith.constant 1.000000e+00 : f32
    %232 = vector.broadcast %cst_69 : f32 to vector<8x384xf32>
    %233 = arith.addf %232, %231 : vector<8x384xf32>
    %234 = arith.divf %232, %233 : vector<8x384xf32>
    %235 = vector.extract_strided_slice %228 {offsets = [0, 384], sizes = [8, 128], strides = [1, 1]} : vector<8x512xf32> to vector<8x128xf32>
    %236 = math.tanh %235 : vector<8x128xf32>
    %237 = vector.extract_strided_slice %234 {offsets = [0, 0], sizes = [8, 128], strides = [1, 1]} : vector<8x384xf32> to vector<8x128xf32>
    %238 = vector.extract_strided_slice %234 {offsets = [0, 128], sizes = [8, 128], strides = [1, 1]} : vector<8x384xf32> to vector<8x128xf32>
    %239 = vector.extract_strided_slice %234 {offsets = [0, 256], sizes = [8, 128], strides = [1, 1]} : vector<8x384xf32> to vector<8x128xf32>
    %240 = arith.mulf %238, %216 : vector<8x128xf32>
    %241 = arith.mulf %237, %236 : vector<8x128xf32>
    %242 = arith.addf %240, %241 : vector<8x128xf32>
    %243 = math.tanh %242 : vector<8x128xf32>
    %244 = arith.mulf %239, %243 : vector<8x128xf32>
    %245 = arith.truncf %244 : vector<8x128xf32> to vector<8x128xbf16>
    %246 = arith.index_cast %c1_i32_65 : i32 to index
    %c0_70 = arith.constant 0 : index
    %c0_71 = arith.constant 0 : index
    %247 = vector.load %arg13[%246, %c0_70, %c0_71] : memref<7x8x128xbf16, #tpu.memory_space<vmem>>, vector<1x8x128xbf16>
    %248 = vector.shape_cast %247 : vector<1x8x128xbf16> to vector<8x128xbf16>
    %249 = vector.shape_cast %245 : vector<8x128xbf16> to vector<1x8x128xbf16>
    tpu.vector_store %arg13[%246, %c0_70, %c0_71], %249 {strides = array<i32>} : memref<7x8x128xbf16, #tpu.memory_space<vmem>>, vector<1x8x128xbf16>,
    %c2_i32_72 = arith.constant 2 : i32
    %250 = arith.index_cast %c2_i32_72 : i32 to index
    %c0_73 = arith.constant 0 : index
    %c0_74 = arith.constant 0 : index
    %251 = vector.load %arg12[%250, %c0_73, %c0_74] : memref<7x8x512xf32, #tpu.memory_space<vmem>>, vector<1x8x512xf32>
    %252 = vector.shape_cast %251 : vector<1x8x512xf32> to vector<8x512xf32>
    %cst_75 = arith.constant dense<0.000000e+00> : vector<8x512xf32>
    %253 = tpu.matmul %245, %1, %cst_75 {dimension_numbers = #tpu.dot_dimension_numbers<[1], [0], [0], [1], [0, 0, 1, 1], [], []>} : vector<8x128xbf16>, vector<128x512xbf16>, vector<8x512xf32> -> vector<8x512xf32>
    %254 = arith.addf %252, %253 : vector<8x512xf32>
    %255 = vector.extract_strided_slice %254 {offsets = [0, 0], sizes = [8, 384], strides = [1, 1]} : vector<8x512xf32> to vector<8x384xf32>
    %256 = arith.negf %255 : vector<8x384xf32>
    %257 = math.exp %256 : vector<8x384xf32>
    %cst_76 = arith.constant 1.000000e+00 : f32
    %258 = vector.broadcast %cst_76 : f32 to vector<8x384xf32>
    %259 = arith.addf %258, %257 : vector<8x384xf32>
    %260 = arith.divf %258, %259 : vector<8x384xf32>
    %261 = vector.extract_strided_slice %254 {offsets = [0, 384], sizes = [8, 128], strides = [1, 1]} : vector<8x512xf32> to vector<8x128xf32>
    %262 = math.tanh %261 : vector<8x128xf32>
    %263 = vector.extract_strided_slice %260 {offsets = [0, 0], sizes = [8, 128], strides = [1, 1]} : vector<8x384xf32> to vector<8x128xf32>
    %264 = vector.extract_strided_slice %260 {offsets = [0, 128], sizes = [8, 128], strides = [1, 1]} : vector<8x384xf32> to vector<8x128xf32>
    %265 = vector.extract_strided_slice %260 {offsets = [0, 256], sizes = [8, 128], strides = [1, 1]} : vector<8x384xf32> to vector<8x128xf32>
    %266 = arith.mulf %264, %242 : vector<8x128xf32>
    %267 = arith.mulf %263, %262 : vector<8x128xf32>
    %268 = arith.addf %266, %267 : vector<8x128xf32>
    %269 = math.tanh %268 : vector<8x128xf32>
    %270 = arith.mulf %265, %269 : vector<8x128xf32>
    %271 = arith.truncf %270 : vector<8x128xf32> to vector<8x128xbf16>
    %272 = arith.index_cast %c2_i32_72 : i32 to index
    %c0_77 = arith.constant 0 : index
    %c0_78 = arith.constant 0 : index
    %273 = vector.load %arg13[%272, %c0_77, %c0_78] : memref<7x8x128xbf16, #tpu.memory_space<vmem>>, vector<1x8x128xbf16>
    %274 = vector.shape_cast %273 : vector<1x8x128xbf16> to vector<8x128xbf16>
    %275 = vector.shape_cast %271 : vector<8x128xbf16> to vector<1x8x128xbf16>
    tpu.vector_store %arg13[%272, %c0_77, %c0_78], %275 {strides = array<i32>} : memref<7x8x128xbf16, #tpu.memory_space<vmem>>, vector<1x8x128xbf16>,
    %c3_i32_79 = arith.constant 3 : i32
    %276 = arith.index_cast %c3_i32_79 : i32 to index
    %c0_80 = arith.constant 0 : index
    %c0_81 = arith.constant 0 : index
    %277 = vector.load %arg12[%276, %c0_80, %c0_81] : memref<7x8x512xf32, #tpu.memory_space<vmem>>, vector<1x8x512xf32>
    %278 = vector.shape_cast %277 : vector<1x8x512xf32> to vector<8x512xf32>
    %cst_82 = arith.constant dense<0.000000e+00> : vector<8x512xf32>
    %279 = tpu.matmul %271, %1, %cst_82 {dimension_numbers = #tpu.dot_dimension_numbers<[1], [0], [0], [1], [0, 0, 1, 1], [], []>} : vector<8x128xbf16>, vector<128x512xbf16>, vector<8x512xf32> -> vector<8x512xf32>
    %280 = arith.addf %278, %279 : vector<8x512xf32>
    %281 = vector.extract_strided_slice %280 {offsets = [0, 0], sizes = [8, 384], strides = [1, 1]} : vector<8x512xf32> to vector<8x384xf32>
    %282 = arith.negf %281 : vector<8x384xf32>
    %283 = math.exp %282 : vector<8x384xf32>
    %cst_83 = arith.constant 1.000000e+00 : f32
    %284 = vector.broadcast %cst_83 : f32 to vector<8x384xf32>
    %285 = arith.addf %284, %283 : vector<8x384xf32>
    %286 = arith.divf %284, %285 : vector<8x384xf32>
    %287 = vector.extract_strided_slice %280 {offsets = [0, 384], sizes = [8, 128], strides = [1, 1]} : vector<8x512xf32> to vector<8x128xf32>
    %288 = math.tanh %287 : vector<8x128xf32>
    %289 = vector.extract_strided_slice %286 {offsets = [0, 0], sizes = [8, 128], strides = [1, 1]} : vector<8x384xf32> to vector<8x128xf32>
    %290 = vector.extract_strided_slice %286 {offsets = [0, 128], sizes = [8, 128], strides = [1, 1]} : vector<8x384xf32> to vector<8x128xf32>
    %291 = vector.extract_strided_slice %286 {offsets = [0, 256], sizes = [8, 128], strides = [1, 1]} : vector<8x384xf32> to vector<8x128xf32>
    %292 = arith.mulf %290, %268 : vector<8x128xf32>
    %293 = arith.mulf %289, %288 : vector<8x128xf32>
    %294 = arith.addf %292, %293 : vector<8x128xf32>
    %295 = math.tanh %294 : vector<8x128xf32>
    %296 = arith.mulf %291, %295 : vector<8x128xf32>
    %297 = arith.truncf %296 : vector<8x128xf32> to vector<8x128xbf16>
    %298 = arith.index_cast %c3_i32_79 : i32 to index
    %c0_84 = arith.constant 0 : index
    %c0_85 = arith.constant 0 : index
    %299 = vector.load %arg13[%298, %c0_84, %c0_85] : memref<7x8x128xbf16, #tpu.memory_space<vmem>>, vector<1x8x128xbf16>
    %300 = vector.shape_cast %299 : vector<1x8x128xbf16> to vector<8x128xbf16>
    %301 = vector.shape_cast %297 : vector<8x128xbf16> to vector<1x8x128xbf16>
    tpu.vector_store %arg13[%298, %c0_84, %c0_85], %301 {strides = array<i32>} : memref<7x8x128xbf16, #tpu.memory_space<vmem>>, vector<1x8x128xbf16>,
    %c4_i32_86 = arith.constant 4 : i32
    %302 = arith.index_cast %c4_i32_86 : i32 to index
    %c0_87 = arith.constant 0 : index
    %c0_88 = arith.constant 0 : index
    %303 = vector.load %arg12[%302, %c0_87, %c0_88] : memref<7x8x512xf32, #tpu.memory_space<vmem>>, vector<1x8x512xf32>
    %304 = vector.shape_cast %303 : vector<1x8x512xf32> to vector<8x512xf32>
    %cst_89 = arith.constant dense<0.000000e+00> : vector<8x512xf32>
    %305 = tpu.matmul %297, %1, %cst_89 {dimension_numbers = #tpu.dot_dimension_numbers<[1], [0], [0], [1], [0, 0, 1, 1], [], []>} : vector<8x128xbf16>, vector<128x512xbf16>, vector<8x512xf32> -> vector<8x512xf32>
    %306 = arith.addf %304, %305 : vector<8x512xf32>
    %307 = vector.extract_strided_slice %306 {offsets = [0, 0], sizes = [8, 384], strides = [1, 1]} : vector<8x512xf32> to vector<8x384xf32>
    %308 = arith.negf %307 : vector<8x384xf32>
    %309 = math.exp %308 : vector<8x384xf32>
    %cst_90 = arith.constant 1.000000e+00 : f32
    %310 = vector.broadcast %cst_90 : f32 to vector<8x384xf32>
    %311 = arith.addf %310, %309 : vector<8x384xf32>
    %312 = arith.divf %310, %311 : vector<8x384xf32>
    %313 = vector.extract_strided_slice %306 {offsets = [0, 384], sizes = [8, 128], strides = [1, 1]} : vector<8x512xf32> to vector<8x128xf32>
    %314 = math.tanh %313 : vector<8x128xf32>
    %315 = vector.extract_strided_slice %312 {offsets = [0, 0], sizes = [8, 128], strides = [1, 1]} : vector<8x384xf32> to vector<8x128xf32>
    %316 = vector.extract_strided_slice %312 {offsets = [0, 128], sizes = [8, 128], strides = [1, 1]} : vector<8x384xf32> to vector<8x128xf32>
    %317 = vector.extract_strided_slice %312 {offsets = [0, 256], sizes = [8, 128], strides = [1, 1]} : vector<8x384xf32> to vector<8x128xf32>
    %318 = arith.mulf %316, %294 : vector<8x128xf32>
    %319 = arith.mulf %315, %314 : vector<8x128xf32>
    %320 = arith.addf %318, %319 : vector<8x128xf32>
    %321 = math.tanh %320 : vector<8x128xf32>
    %322 = arith.mulf %317, %321 : vector<8x128xf32>
    %323 = arith.truncf %322 : vector<8x128xf32> to vector<8x128xbf16>
    %324 = arith.index_cast %c4_i32_86 : i32 to index
    %c0_91 = arith.constant 0 : index
    %c0_92 = arith.constant 0 : index
    %325 = vector.load %arg13[%324, %c0_91, %c0_92] : memref<7x8x128xbf16, #tpu.memory_space<vmem>>, vector<1x8x128xbf16>
    %326 = vector.shape_cast %325 : vector<1x8x128xbf16> to vector<8x128xbf16>
    %327 = vector.shape_cast %323 : vector<8x128xbf16> to vector<1x8x128xbf16>
    tpu.vector_store %arg13[%324, %c0_91, %c0_92], %327 {strides = array<i32>} : memref<7x8x128xbf16, #tpu.memory_space<vmem>>, vector<1x8x128xbf16>,
    %c5_i32_93 = arith.constant 5 : i32
    %328 = arith.index_cast %c5_i32_93 : i32 to index
    %c0_94 = arith.constant 0 : index
    %c0_95 = arith.constant 0 : index
    %329 = vector.load %arg12[%328, %c0_94, %c0_95] : memref<7x8x512xf32, #tpu.memory_space<vmem>>, vector<1x8x512xf32>
    %330 = vector.shape_cast %329 : vector<1x8x512xf32> to vector<8x512xf32>
    %cst_96 = arith.constant dense<0.000000e+00> : vector<8x512xf32>
    %331 = tpu.matmul %323, %1, %cst_96 {dimension_numbers = #tpu.dot_dimension_numbers<[1], [0], [0], [1], [0, 0, 1, 1], [], []>} : vector<8x128xbf16>, vector<128x512xbf16>, vector<8x512xf32> -> vector<8x512xf32>
    %332 = arith.addf %330, %331 : vector<8x512xf32>
    %333 = vector.extract_strided_slice %332 {offsets = [0, 0], sizes = [8, 384], strides = [1, 1]} : vector<8x512xf32> to vector<8x384xf32>
    %334 = arith.negf %333 : vector<8x384xf32>
    %335 = math.exp %334 : vector<8x384xf32>
    %cst_97 = arith.constant 1.000000e+00 : f32
    %336 = vector.broadcast %cst_97 : f32 to vector<8x384xf32>
    %337 = arith.addf %336, %335 : vector<8x384xf32>
    %338 = arith.divf %336, %337 : vector<8x384xf32>
    %339 = vector.extract_strided_slice %332 {offsets = [0, 384], sizes = [8, 128], strides = [1, 1]} : vector<8x512xf32> to vector<8x128xf32>
    %340 = math.tanh %339 : vector<8x128xf32>
    %341 = vector.extract_strided_slice %338 {offsets = [0, 0], sizes = [8, 128], strides = [1, 1]} : vector<8x384xf32> to vector<8x128xf32>
    %342 = vector.extract_strided_slice %338 {offsets = [0, 128], sizes = [8, 128], strides = [1, 1]} : vector<8x384xf32> to vector<8x128xf32>
    %343 = vector.extract_strided_slice %338 {offsets = [0, 256], sizes = [8, 128], strides = [1, 1]} : vector<8x384xf32> to vector<8x128xf32>
    %344 = arith.mulf %342, %320 : vector<8x128xf32>
    %345 = arith.mulf %341, %340 : vector<8x128xf32>
    %346 = arith.addf %344, %345 : vector<8x128xf32>
    %347 = math.tanh %346 : vector<8x128xf32>
    %348 = arith.mulf %343, %347 : vector<8x128xf32>
    %349 = arith.truncf %348 : vector<8x128xf32> to vector<8x128xbf16>
    %350 = arith.index_cast %c5_i32_93 : i32 to index
    %c0_98 = arith.constant 0 : index
    %c0_99 = arith.constant 0 : index
    %351 = vector.load %arg13[%350, %c0_98, %c0_99] : memref<7x8x128xbf16, #tpu.memory_space<vmem>>, vector<1x8x128xbf16>
    %352 = vector.shape_cast %351 : vector<1x8x128xbf16> to vector<8x128xbf16>
    %353 = vector.shape_cast %349 : vector<8x128xbf16> to vector<1x8x128xbf16>
    tpu.vector_store %arg13[%350, %c0_98, %c0_99], %353 {strides = array<i32>} : memref<7x8x128xbf16, #tpu.memory_space<vmem>>, vector<1x8x128xbf16>,
    %c6_i32_100 = arith.constant 6 : i32
    %354 = arith.index_cast %c6_i32_100 : i32 to index
    %c0_101 = arith.constant 0 : index
    %c0_102 = arith.constant 0 : index
    %355 = vector.load %arg12[%354, %c0_101, %c0_102] : memref<7x8x512xf32, #tpu.memory_space<vmem>>, vector<1x8x512xf32>
    %356 = vector.shape_cast %355 : vector<1x8x512xf32> to vector<8x512xf32>
    %cst_103 = arith.constant dense<0.000000e+00> : vector<8x512xf32>
    %357 = tpu.matmul %349, %1, %cst_103 {dimension_numbers = #tpu.dot_dimension_numbers<[1], [0], [0], [1], [0, 0, 1, 1], [], []>} : vector<8x128xbf16>, vector<128x512xbf16>, vector<8x512xf32> -> vector<8x512xf32>
    %358 = arith.addf %356, %357 : vector<8x512xf32>
    %359 = vector.extract_strided_slice %358 {offsets = [0, 0], sizes = [8, 384], strides = [1, 1]} : vector<8x512xf32> to vector<8x384xf32>
    %360 = arith.negf %359 : vector<8x384xf32>
    %361 = math.exp %360 : vector<8x384xf32>
    %cst_104 = arith.constant 1.000000e+00 : f32
    %362 = vector.broadcast %cst_104 : f32 to vector<8x384xf32>
    %363 = arith.addf %362, %361 : vector<8x384xf32>
    %364 = arith.divf %362, %363 : vector<8x384xf32>
    %365 = vector.extract_strided_slice %358 {offsets = [0, 384], sizes = [8, 128], strides = [1, 1]} : vector<8x512xf32> to vector<8x128xf32>
    %366 = math.tanh %365 : vector<8x128xf32>
    %367 = vector.extract_strided_slice %364 {offsets = [0, 0], sizes = [8, 128], strides = [1, 1]} : vector<8x384xf32> to vector<8x128xf32>
    %368 = vector.extract_strided_slice %364 {offsets = [0, 128], sizes = [8, 128], strides = [1, 1]} : vector<8x384xf32> to vector<8x128xf32>
    %369 = vector.extract_strided_slice %364 {offsets = [0, 256], sizes = [8, 128], strides = [1, 1]} : vector<8x384xf32> to vector<8x128xf32>
    %370 = arith.mulf %368, %346 : vector<8x128xf32>
    %371 = arith.mulf %367, %366 : vector<8x128xf32>
    %372 = arith.addf %370, %371 : vector<8x128xf32>
    %373 = math.tanh %372 : vector<8x128xf32>
    %374 = arith.mulf %369, %373 : vector<8x128xf32>
    %375 = arith.truncf %374 : vector<8x128xf32> to vector<8x128xbf16>
    %376 = arith.index_cast %c6_i32_100 : i32 to index
    %c0_105 = arith.constant 0 : index
    %c0_106 = arith.constant 0 : index
    %377 = vector.load %arg13[%376, %c0_105, %c0_106] : memref<7x8x128xbf16, #tpu.memory_space<vmem>>, vector<1x8x128xbf16>
    %378 = vector.shape_cast %377 : vector<1x8x128xbf16> to vector<8x128xbf16>
    %379 = vector.shape_cast %375 : vector<8x128xbf16> to vector<1x8x128xbf16>
    tpu.vector_store %arg13[%376, %c0_105, %c0_106], %379 {strides = array<i32>} : memref<7x8x128xbf16, #tpu.memory_space<vmem>>, vector<1x8x128xbf16>,
    %c7_i32_107 = arith.constant 7 : i32
    %c0_108 = arith.constant 0 : index
    %c0_109 = arith.constant 0 : index
    %c0_110 = arith.constant 0 : index
    %380 = vector.load %arg13[%c0_108, %c0_109, %c0_110] : memref<7x8x128xbf16, #tpu.memory_space<vmem>>, vector<7x8x128xbf16>
    %381 = vector.shape_cast %380 : vector<7x8x128xbf16> to vector<56x128xbf16>
    %c0_111 = arith.constant 0 : index
    %c0_112 = arith.constant 0 : index
    %382 = vector.load %arg8[%c0_111, %c0_112] : memref<128x128xbf16, #tpu.memory_space<vmem>>, vector<128x128xbf16>
    %cst_113 = arith.constant dense<0.000000e+00> : vector<56x128xf32>
    %383 = tpu.matmul %381, %382, %cst_113 {dimension_numbers = #tpu.dot_dimension_numbers<[1], [0], [0], [1], [0, 0, 1, 1], [], []>} : vector<56x128xbf16>, vector<128x128xbf16>, vector<56x128xf32> -> vector<56x128xf32>
    %c0_114 = arith.constant 0 : index
    %c0_115 = arith.constant 0 : index
    %384 = vector.load %arg9[%c0_114, %c0_115] : memref<1x128xf32, #tpu.memory_space<vmem>>, vector<1x128xf32>
    %385 = vector.broadcast %384 : vector<1x128xf32> to vector<56x128xf32>
    %386 = arith.addf %383, %385 : vector<56x128xf32>
    %387 = vector.shape_cast %386 : vector<56x128xf32> to vector<7x8x128xf32>
    %cst_116 = arith.constant 0.000000e+00 : f32
    %388 = vector.broadcast %cst_116 : f32 to vector<8x128xf32>
    %c0_117 = arith.constant 0 : index
    %c0_118 = arith.constant 0 : index
    %c0_119 = arith.constant 0 : index
    %389 = vector.load %arg10[%c0_117, %c0_118, %c0_119] : memref<8x8x128xf32, #tpu.memory_space<vmem>>, vector<1x8x128xf32>
    %390 = vector.shape_cast %389 : vector<1x8x128xf32> to vector<8x128xf32>
    %391 = vector.shape_cast %388 : vector<8x128xf32> to vector<1x8x128xf32>
    tpu.vector_store %arg10[%c0_117, %c0_118, %c0_119], %391 {strides = array<i32>} : memref<8x8x128xf32, #tpu.memory_space<vmem>>, vector<1x8x128xf32>,
    %c1 = arith.constant 1 : index
    %c0_120 = arith.constant 0 : index
    %c0_121 = arith.constant 0 : index
    %392 = vector.load %arg10[%c1, %c0_120, %c0_121] : memref<8x8x128xf32, #tpu.memory_space<vmem>>, vector<7x8x128xf32>
    tpu.vector_store %arg10[%c1, %c0_120, %c0_121], %387 {strides = array<i32>} : memref<8x8x128xf32, #tpu.memory_space<vmem>>, vector<7x8x128xf32>,
    return
  }
}

</mosaic_0001>

<bundles_post_ra>
// kernel: tpu_custom_call.1
= control target key start
LH: loop header
LB: loop body
LE: loop exit
PB: predicated region body
PF: predicated region fallthrough
CT: control target
= control target key end

     0   :  { %15 = vsyncpa [#allocation6], 0  ;;  %s5735_s0 = inlined_call_operand.hbm [shape: bf16[8,8,128], index: 0, kind: input, shape index: {}]   ;;  %s5736_s1 = inlined_call_operand.hbm [shape: bf16[7,8,128], index: 1, kind: input, shape index: {}]   ;;  %s5737_s2 = inlined_call_operand.hbm [shape: bf16[128,512], index: 2, kind: input, shape index: {}]   ;;  %s5738_s3 = inlined_call_operand.hbm [shape: bf16[128,512], index: 3, kind: input, shape index: {}]   ;;  %s5739_s4 = inlined_call_operand.hbm [shape: f32[1,512], index: 4, kind: input, shape index: {}]   ;;  %s5740_s5 = inlined_call_operand.hbm [shape: bf16[128,512], index: 5, kind: input, shape index: {}]   ;;  %s5741_s6 = inlined_call_operand.hbm [shape: bf16[128,512], index: 6, kind: input, shape index: {}]   ;;  %s5742_s7 = inlined_call_operand.vmem [shape: f32[1,512], index: 7, kind: input, shape index: {}]   ;;  %s5743_s8 = inlined_call_operand.hbm [shape: bf16[128,128], index: 8, kind: input, shape index: {}]   ;;  %s5744_s9 = inlined_call_operand.vmem [shape: f32[1,128], index: 9, kind: input, shape index: {}]   ;;  %s5745_s10 = inlined_call_operand.hbm [shape: f32[8,8,128], index: 10, kind: output, shape index: {}]  }
   0x1   :  { %16 = vsyncpa [#allocation9], 0 }
   0x2   :  { %17 = vsyncpa [#allocation12], 0 }
   0x3   :  { %18 = vsyncpa [#allocation15], 0 }
   0x4   :  { %19 = vsyncpa [#allocation18], 0 }
   0x5   :  { %20 = vsyncpa [#allocation7], 0  ;;  %s38_s15 = sshll.u32 %s5736_s1, 4  ;;  %s4609_s16 = smov [#allocation8]   ;;  %s39_s15 = int_to_ptr.hbm [resolvable:$true] %s38_s15 }
   0x6   :  { %s40_s17 = sshll.u32 %s4609_s16, 4  ;;  %s4610_s18 = smov 64   ;;  %s41_s17 = int_to_ptr.vmem [resolvable:$true] %s40_s17 }
   0x7   :  { %s4611_s19 = smov 4   ;;  %s64_s22 = sshll.u32 %s5738_s3, 4  ;;  %s65_s22 = int_to_ptr.hbm [resolvable:$true] %s64_s22 }
   0x8   :  { %46 = dma.hbm_to_vmem [thread:$0]  %s39_s15, 448, %s41_s17, [#allocation9], %s4610_s18, %s4610_s18, %s4611_s19  }
   0x9   :  { %s4612_s23 = smov [#allocation11]   ;;  %s88_s1 = sshll.u32 %s5740_s5, 4  ;;  %s89_s1 = int_to_ptr.hbm [resolvable:$true] %s88_s1 }
   0xa   :  { %s66_s24 = sshll.u32 %s4612_s23, 4  ;;  %s4613_s27 = smov 256   ;;  %s67_s24 = int_to_ptr.vmem [resolvable:$true] %s66_s24 }
   0xb   :  { %s4614_s28 = smov 16   ;;  %s25_s11 = sshll.u32 %s5735_s0, 4  ;;  %s26_s11 = int_to_ptr.hbm [resolvable:$true] %s25_s11 }
   0xc   :  { %72 = dma.hbm_to_vmem [thread:$0]  %s65_s22, 4096, %s67_s24, [#allocation12], %s4613_s27, %s4613_s27, %s4614_s28  }
   0xd   :  { %s4615_s3 = smov [#allocation14]   ;;  %s4616_s5 = smov [#allocation5]  }
   0xe   :  { %s90_s12 = sshll.u32 %s4615_s3, 4  ;;  %s27_s13 = sshll.u32 %s4616_s5, 4  ;;  %s91_s12 = int_to_ptr.vmem [resolvable:$true] %s90_s12  ;;  %s28_s13 = int_to_ptr.vmem [resolvable:$true] %s27_s13 }
   0xf   :  { %96 = dma.hbm_to_vmem [thread:$0]  %s89_s1, 4096, %s91_s12, [#allocation15], %s4613_s27, %s4613_s27, %s4614_s28  }
  0x10   :  { %s51_s16 = sshll.u32 %s5737_s2, 4  ;;  %s78_s20 = sshll.u32 %s5739_s4, 4  ;;  %s52_s16 = int_to_ptr.hbm [resolvable:$true] %s51_s16  ;;  %s79_s20 = int_to_ptr.hbm [resolvable:$true] %s78_s20 }
  0x11   :  { %33 = dma.hbm_to_vmem [thread:$0]  %s26_s11, 512, %s28_s13, [#allocation6], %s4610_s18, %s4610_s18, %s4611_s19  }
  0x12   :  { %s4617_s21 = smov [#allocation10]   ;;  %s4618_s23 = smov [#allocation13]  }
  0x13   :  { %s53_s22 = sshll.u32 %s4617_s21, 4  ;;  %s80_s2 = sshll.u32 %s4618_s23, 4  ;;  %s54_s22 = int_to_ptr.vmem [resolvable:$true] %s53_s22  ;;  %s81_s2 = int_to_ptr.vmem [resolvable:$true] %s80_s2 }
  0x14   :  { %59 = dma.hbm_to_vmem [thread:$0]  %s52_s16, 4096, %s54_s22, [#allocation9], %s4613_s27, %s4613_s27, %s4614_s28  }
  0x15   :  { %s101_s26 = sshll.u32 %s5741_s6, 4  ;;  %s116_s4 = sshll.u32 %s5743_s8, 4  ;;  %s102_s26 = int_to_ptr.hbm [resolvable:$true] %s101_s26  ;;  %s117_s4 = int_to_ptr.hbm [resolvable:$true] %s116_s4 }
  0x16   :  { %83 = dma.hbm_to_vmem [thread:$0]  %s79_s20, 64, %s81_s2, [#allocation12]  }
  0x17   :  { %s4619_s30 = smov [#allocation16]   ;;  %s4620_s3 = smov [#allocation17]  }
  0x18   :  { %s103_s11 = sshll.u32 %s4619_s30, 4  ;;  %s118_s12 = sshll.u32 %s4620_s3, 4  ;;  %s104_s11 = int_to_ptr.vmem [resolvable:$true] %s103_s11  ;;  %s119_s12 = int_to_ptr.vmem [resolvable:$true] %s118_s12 }
  0x19   :  { %109 = dma.hbm_to_vmem [thread:$0]  %s102_s26, 4096, %s104_s11, [#allocation15], %s4613_s27, %s4613_s27, %s4614_s28  }
  0x1a   :  { %124 = dma.hbm_to_vmem [thread:$0]  %s117_s4, 1024, %s119_s12, [#allocation18], %s4610_s18, %s4610_s18, %s4611_s19  }
  0x1b   :  { %4597 = dma.done.wait [#allocation6], 512  }
  0x1c   :  { %4598 = vsyncadd [#allocation6], 4294966784 }
  0x1d   :  { %4599 = dma.done.wait [#allocation9], 4544  }
  0x1e   :  { %4600 = vsyncadd [#allocation9], 4294962752 }
  0x1f   :  { %4601 = dma.done.wait [#allocation12], 4160  }
  0x20   :  { %4602 = vsyncadd [#allocation12], 4294963136 }
  0x21   :  { %4603 = dma.done.wait [#allocation15], 8192  }
  0x22   :  { %4604 = vsyncadd [#allocation15], 4294959104 }
  0x23   :  { %4605 = dma.done.wait [#allocation18], 1024  }
  0x24   :  { %4606 = vsyncadd [#allocation18], 4294966272  ;;  %v3470_v0 = vld [vmem:[#allocation10 + $0xe0] sm:$0xf]  ;;  %v4067_v1 = vld [vmem:[#allocation10 + $0xec] sm:$0xf0] }
  0x25   :  { %v4066_v2 = vld [vmem:[#allocation10 + $0xec] sm:$0xf]  ;;  %v3471_v3 = vor.u32 %v4067_v1, %v3470_v0  ;;  %v3480_v4 = vld [vmem:[#allocation10 + $0xf8] sm:$0xf0]  ;;  %v3610_v5 = vld [vmem:[#allocation14 + $0xe0] sm:$0xf] }
  0x26   :  { %v4102_v6 = vld [vmem:[#allocation14 + $0xec] sm:$0xf0]  ;;  %v3483_v7 = vor.u32 %v4066_v2, %v3480_v4  ;;  %v3454_v9 = vld [vmem:[#allocation10 + $0xc0] sm:$0xf]  ;;  %v4063_v10 = vld [vmem:[#allocation10 + $0xcc] sm:$0xf0] }
  0x27   :  { %v3611_v8 = vor.u32 %v4102_v6, %v3610_v5  ;;  %v4062_v11 = vld [vmem:[#allocation10 + $0xcc] sm:$0xf]  ;;  %458 = vmatpush.bf16.msra.mxu1 %v3471_v3  ;;  %4115 = vmatpush.bf16.msra.mxu2 %v3471_v3  ;;  %v3455_v12 = vor.u32 %v4063_v10, %v3454_v9  ;;  %v3464_v13 = vld [vmem:[#allocation10 + $0xd8] sm:$0xf0]  ;;  %v3594_v14 = vld [vmem:[#allocation14 + $0xc0] sm:$0xf] }
  0x28   :  { %v4098_v15 = vld [vmem:[#allocation14 + $0xcc] sm:$0xf0]  ;;  %545 = vmatpush.bf16.msra.mxu3 %v3483_v7  ;;  %v3467_v16 = vor.u32 %v4062_v11, %v3464_v13  ;;  %v3438_v18 = vld [vmem:[#allocation10 + $0xa0] sm:$0xf]  ;;  %v4059_v19 = vld [vmem:[#allocation10 + $0xac] sm:$0xf0] }
  0x29   :  { %837 = vmatpush.bf16.msra.mxu0 %v3611_v8  ;;  %v3595_v17 = vor.u32 %v4098_v15, %v3594_v14  ;;  %v4058_v20 = vld [vmem:[#allocation10 + $0xac] sm:$0xf]  ;;  %v3448_v21 = vld [vmem:[#allocation10 + $0xb8] sm:$0xf0]  ;;  %v3578_v22 = vld [vmem:[#allocation14 + $0xa0] sm:$0xf]  ;;  %v3439_v24 = vor.u32 %v4059_v19, %v3438_v18 }
  0x2a   :  { %v4094_v23 = vld [vmem:[#allocation14 + $0xac] sm:$0xf0]  ;;  %v3451_v25 = vor.u32 %v4058_v20, %v3448_v21  ;;  %v3422_v27 = vld [vmem:[#allocation10 + $0x80] sm:$0xf]  ;;  %v4055_v28 = vld [vmem:[#allocation10 + $0x8c] sm:$0xf0] }
  0x2b   :  { %459 = vmatpush.bf16.msra.mxu1 %v3455_v12  ;;  %4116 = vmatpush.bf16.msra.mxu2 %v3455_v12  ;;  %v3579_v26 = vor.u32 %v4094_v23, %v3578_v22  ;;  %v4054_v29 = vld [vmem:[#allocation10 + $0x8c] sm:$0xf]  ;;  %v3432_v30 = vld [vmem:[#allocation10 + $0x98] sm:$0xf0]  ;;  %v3562_v31 = vld [vmem:[#allocation14 + $0x80] sm:$0xf]  ;;  %v3423_v33 = vor.u32 %v4055_v28, %v3422_v27 }
  0x2c   :  { %546 = vmatpush.bf16.msra.mxu3 %v3467_v16  ;;  %v4090_v32 = vld [vmem:[#allocation14 + $0x8c] sm:$0xf0]  ;;  %v3435_v34 = vor.u32 %v4054_v29, %v3432_v30  ;;  %v3406_v36 = vld [vmem:[#allocation10 + $0x60] sm:$0xf]  ;;  %v4051_v37 = vld [vmem:[#allocation10 + $0x6c] sm:$0xf0] }
  0x2d   :  { %838 = vmatpush.bf16.msra.mxu0 %v3595_v17  ;;  %v3563_v35 = vor.u32 %v4090_v32, %v3562_v31  ;;  %v4050_v38 = vld [vmem:[#allocation10 + $0x6c] sm:$0xf]  ;;  %v3416_v39 = vld [vmem:[#allocation10 + $0x78] sm:$0xf0]  ;;  %v3546_v40 = vld [vmem:[#allocation14 + $0x60] sm:$0xf]  ;;  %v3407_v42 = vor.u32 %v4051_v37, %v3406_v36 }
  0x2e   :  { %v4086_v41 = vld [vmem:[#allocation14 + $0x6c] sm:$0xf0]  ;;  %v3419_v43 = vor.u32 %v4050_v38, %v3416_v39  ;;  %v3390_v45 = vld [vmem:[#allocation10 + $0x40] sm:$0xf]  ;;  %v4047_v46 = vld [vmem:[#allocation10 + $0x4c] sm:$0xf0] }
  0x2f   :  { %460 = vmatpush.bf16.msra.mxu1 %v3439_v24  ;;  %4117 = vmatpush.bf16.msra.mxu2 %v3439_v24  ;;  %v3547_v44 = vor.u32 %v4086_v41, %v3546_v40  ;;  %v4046_v47 = vld [vmem:[#allocation10 + $0x4c] sm:$0xf]  ;;  %v3400_v48 = vld [vmem:[#allocation10 + $0x58] sm:$0xf0]  ;;  %v3530_v49 = vld [vmem:[#allocation14 + $0x40] sm:$0xf]  ;;  %v3391_v51 = vor.u32 %v4047_v46, %v3390_v45 }
  0x30   :  { %547 = vmatpush.bf16.msra.mxu3 %v3451_v25  ;;  %v4082_v50 = vld [vmem:[#allocation14 + $0x4c] sm:$0xf0]  ;;  %v3403_v52 = vor.u32 %v4046_v47, %v3400_v48  ;;  %v3374_v54 = vld [vmem:[#allocation10 + $0x20] sm:$0xf]  ;;  %v4043_v55 = vld [vmem:[#allocation10 + $0x2c] sm:$0xf0] }
  0x31   :  { %839 = vmatpush.bf16.msra.mxu0 %v3579_v26  ;;  %v3531_v53 = vor.u32 %v4082_v50, %v3530_v49  ;;  %v4042_v56 = vld [vmem:[#allocation10 + $0x2c] sm:$0xf]  ;;  %v3384_v57 = vld [vmem:[#allocation10 + $0x38] sm:$0xf0]  ;;  %v3514_v58 = vld [vmem:[#allocation14 + $0x20] sm:$0xf]  ;;  %v3375_v60 = vor.u32 %v4043_v55, %v3374_v54 }
  0x32   :  { %v4078_v59 = vld [vmem:[#allocation14 + $0x2c] sm:$0xf0]  ;;  %v3358_v61 = vld [vmem:[#allocation10] sm:$0xf]  ;;  %v3387_v62 = vor.u32 %v4042_v56, %v3384_v57  ;;  %v4039_v0 = vld [vmem:[#allocation10 + $0xc] sm:$0xf0] }
  0x33   :  { %461 = vmatpush.bf16.msra.mxu1 %v3423_v33  ;;  %4118 = vmatpush.bf16.msra.mxu2 %v3423_v33  ;;  %v3515_v63 = vor.u32 %v4078_v59, %v3514_v58  ;;  %v4038_v1 = vld [vmem:[#allocation10 + $0xc] sm:$0xf]  ;;  %v3368_v2 = vld [vmem:[#allocation10 + $0x18] sm:$0xf0]  ;;  %v3498_v3 = vld [vmem:[#allocation14] sm:$0xf]  ;;  %v3359_v9 = vor.u32 %v4039_v0, %v3358_v61 }
  0x34   :  { %548 = vmatpush.bf16.msra.mxu3 %v3435_v34  ;;  %v4074_v4 = vld [vmem:[#allocation14 + $0xc] sm:$0xf0]  ;;  %v4065_v5 = vld [vmem:[#allocation10 + $0xe4] sm:$0xf]  ;;  %v3478_v7 = vld [vmem:[#allocation10 + $0xe8] sm:$0xf]  ;;  %v3371_v10 = vor.u32 %v4038_v1, %v3368_v2 }
  0x35   :  { %840 = vmatpush.bf16.msra.mxu0 %v3563_v35  ;;  %v3472_v6 = vld [vmem:[#allocation10 + $0xf0] sm:$0xf0]  ;;  %v4068_v8 = vld [vmem:[#allocation10 + $0xf4] sm:$0xf0]  ;;  %v3499_v11 = vor.u32 %v4074_v4, %v3498_v3  ;;  %v4726_v12 = vld [vmem:[#allocation5] sm:$0xff]  ;;  %s3323_s5 = sshll.u32 %s5745_s10, 4  ;;  %s3324_s5 = int_to_ptr.hbm [resolvable:$true] %s3323_s5 }
  0x36   :  { %v4728_v13 = vld [vmem:[#allocation5 + $0x10] sm:$0xff]  ;;  %v3475_v14 = vor.u32 %v4065_v5, %v3472_v6  ;;  %v3479_v15 = vor.u32 %v4068_v8, %v3478_v7  ;;  %v4061_v16 = vld [vmem:[#allocation10 + $0xc4] sm:$0xf]  ;;  %v3462_v18 = vld [vmem:[#allocation10 + $0xc8] sm:$0xf]  ;;  %s4624_s13 = smov 128  }
  0x37   :  { %462 = vmatpush.bf16.msra.mxu1 %v3407_v42  ;;  %4119 = vmatpush.bf16.msra.mxu2 %v3407_v42  ;;  %v3456_v17 = vld [vmem:[#allocation10 + $0xd0] sm:$0xf0]  ;;  %v4064_v19 = vld [vmem:[#allocation10 + $0xd4] sm:$0xf0]  ;;  %v4730_v20 = vld [vmem:[#allocation8] sm:$0xff]  ;;  %s4625_s14 = smov 8  }
  0x38   :  { %549 = vmatpush.bf16.msra.mxu3 %v3419_v43  ;;  %v4057_v21 = vld [vmem:[#allocation10 + $0xa4] sm:$0xf]  ;;  %v3440_v22 = vld [vmem:[#allocation10 + $0xb0] sm:$0xf0]  ;;  %v3459_v23 = vor.u32 %v4061_v16, %v3456_v17  ;;  %v3463_v24 = vor.u32 %v4064_v19, %v3462_v18  ;;  %v3446_v25 = vld [vmem:[#allocation10 + $0xa8] sm:$0xf] }
  0x39   :  { %841 = vmatpush.bf16.msra.mxu0 %v3547_v44  ;;  %v4101_v26 = vld [vmem:[#allocation14 + $0xec] sm:$0xf]  ;;  %v3620_v27 = vld [vmem:[#allocation14 + $0xf8] sm:$0xf0]  ;;  %v4060_v28 = vld [vmem:[#allocation10 + $0xb4] sm:$0xf0]  ;;  %v3443_v37 = vor.u32 %v4057_v21, %v3440_v22 }
  0x3a   :  { %v3623_v29 = vor.u32 %v4101_v26, %v3620_v27  ;;  %v3738_v30 = vld [vmem:[#allocation11 + $0xe0] sm:$0xf]  ;;  %v3999_v31 = vld [vmem:[#allocation11 + $0xec] sm:$0xf0]  ;;  %v4053_v33 = vld [vmem:[#allocation10 + $0x84] sm:$0xf]  ;;  %v3447_v38 = vor.u32 %v4060_v28, %v3446_v25 }
  0x3b   :  { %463 = vmatpush.bf16.msra.mxu1 %v3391_v51  ;;  %4120 = vmatpush.bf16.msra.mxu2 %v3391_v51  ;;  %v4736_v32 = vor.u32 %v3999_v31, %v3738_v30  ;;  %v3424_v34 = vld [vmem:[#allocation10 + $0x90] sm:$0xf0]  ;;  %v4097_v35 = vld [vmem:[#allocation14 + $0xcc] sm:$0xf]  ;;  %v3604_v36 = vld [vmem:[#allocation14 + $0xd8] sm:$0xf0] }
  0x3c   :  { %550 = vmatpush.bf16.msra.mxu3 %v3403_v52  ;;  %v3430_v39 = vld [vmem:[#allocation10 + $0x88] sm:$0xf]  ;;  %v3607_v40 = vor.u32 %v4097_v35, %v3604_v36  ;;  %v3722_v41 = vld [vmem:[#allocation11 + $0xc0] sm:$0xf]  ;;  %v3995_v42 = vld [vmem:[#allocation11 + $0xcc] sm:$0xf0]  ;;  %v3427_v50 = vor.u32 %v4053_v33, %v3424_v34 }
  0x3d   :  { %842 = vmatpush.bf16.msra.mxu0 %v3531_v53  ;;  %v4056_v43 = vld [vmem:[#allocation10 + $0x94] sm:$0xf0]  ;;  %v4739_v44 = vor.u32 %v3995_v42, %v3722_v41  ;;  %v4093_v45 = vld [vmem:[#allocation14 + $0xac] sm:$0xf]  ;;  %v3588_v46 = vld [vmem:[#allocation14 + $0xb8] sm:$0xf0] }
  0x3e   :  { %v3706_v47 = vld [vmem:[#allocation11 + $0xa0] sm:$0xf]  ;;  %v3991_v48 = vld [vmem:[#allocation11 + $0xac] sm:$0xf0]  ;;  %v3591_v49 = vor.u32 %v4093_v45, %v3588_v46  ;;  %v3431_v51 = vor.u32 %v4056_v43, %v3430_v39  ;;  %v4049_v52 = vld [vmem:[#allocation10 + $0x64] sm:$0xf] }
  0x3f   :  { %464 = vmatpush.bf16.msra.mxu1 %v3375_v60  ;;  %4121 = vmatpush.bf16.msra.mxu2 %v3375_v60  ;;  %v4089_v53 = vld [vmem:[#allocation14 + $0x8c] sm:$0xf]  ;;  %v3572_v54 = vld [vmem:[#allocation14 + $0x98] sm:$0xf0]  ;;  %v3408_v55 = vld [vmem:[#allocation10 + $0x70] sm:$0xf0]  ;;  %v4742_v58 = vor.u32 %v3991_v48, %v3706_v47 }
  0x40   :  { %551 = vmatpush.bf16.msra.mxu3 %v3387_v62  ;;  %v3414_v56 = vld [vmem:[#allocation10 + $0x68] sm:$0xf]  ;;  %v4052_v57 = vld [vmem:[#allocation10 + $0x74] sm:$0xf0]  ;;  %v4744_v59 = vld [vmem:[#allocation5 + $0x8] sm:$0xff]  ;;  %v3575_v61 = vor.u32 %v4089_v53, %v3572_v54  ;;  %v3411_v62 = vor.u32 %v4049_v52, %v3408_v55 }
  0x41   :  { %843 = vmatpush.bf16.msra.mxu0 %v3515_v63  ;;  %v4746_v60 = vld [vmem:[#allocation5 + $0x18] sm:$0xff]  ;;  %v3415_v63 = vor.u32 %v4052_v57, %v3414_v56  ;;  %v4045_v0 = vld [vmem:[#allocation10 + $0x44] sm:$0xf]  ;;  %v3987_v2 = vld [vmem:[#allocation11 + $0x8c] sm:$0xf0] }
  0x42   :  { %v3690_v1 = vld [vmem:[#allocation11 + $0x80] sm:$0xf]  ;;  %v3392_v3 = vld [vmem:[#allocation10 + $0x50] sm:$0xf0]  ;;  %v3398_v4 = vld [vmem:[#allocation10 + $0x48] sm:$0xf] }
  0x43   :  { %465 = vmatpush.bf16.msra.mxu1 %v3359_v9  ;;  %4122 = vmatpush.bf16.msra.mxu2 %v3359_v9  ;;  %v4048_v5 = vld [vmem:[#allocation10 + $0x54] sm:$0xf0]  ;;  %v4749_v6 = vld [vmem:[#allocation8 + $0x8] sm:$0xff]  ;;  %v4041_v7 = vld [vmem:[#allocation10 + $0x24] sm:$0xf]  ;;  %v4751_v9 = vor.u32 %v3987_v2, %v3690_v1 }
  0x44   :  { %552 = vmatpush.bf16.msra.mxu3 %v3371_v10  ;;  %v3376_v8 = vld [vmem:[#allocation10 + $0x30] sm:$0xf0]  ;;  %v3395_v10 = vor.u32 %v4045_v0, %v3392_v3  ;;  %v3674_v16 = vld [vmem:[#allocation11 + $0x60] sm:$0xf]  ;;  %v3382_v17 = vld [vmem:[#allocation10 + $0x28] sm:$0xf] }
  0x45   :  { %844 = vmatpush.bf16.msra.mxu0 %v3499_v11  ;;  %v3399_v11 = vor.u32 %v4048_v5, %v3398_v4  ;;  %v4044_v18 = vld [vmem:[#allocation10 + $0x34] sm:$0xf0]  ;;  %v3983_v21 = vld [vmem:[#allocation11 + $0x6c] sm:$0xf0]  ;;  %v4037_v22 = vld [vmem:[#allocation10 + $0x4] sm:$0xf]  ;;  %v3379_v28 = vor.u32 %v4041_v7, %v3376_v8 }
  0x46   :  { %466 = vmatmul.bf16.vlgmr.msra.gmra.mxu1 %v4726_v12  ;;  %476 = vmatmul.bf16.vlgmr.msra.gmra.mxu2 %v4728_v13  ;;  %v4758_v25 = vor.u32 %v3983_v21, %v3674_v16  ;;  %v4081_v26 = vld [vmem:[#allocation14 + $0x4c] sm:$0xf]  ;;  %v3540_v27 = vld [vmem:[#allocation14 + $0x58] sm:$0xf0]  ;;  %v4040_v30 = vld [vmem:[#allocation10 + $0x14] sm:$0xf0] }
  0x47   :  { %487 = vmatpush.bf16.msrb.mxu1 %v3475_v14  ;;  %516 = vmatpush.bf16.msrb.mxu2 %v3479_v15  ;;  %v4085_v14 = vld [vmem:[#allocation14 + $0x6c] sm:$0xf]  ;;  %v3556_v15 = vld [vmem:[#allocation14 + $0x78] sm:$0xf0]  ;;  %v3543_v31 = vor.u32 %v4081_v26, %v3540_v27  ;;  %v4100_v35 = vld [vmem:[#allocation14 + $0xe4] sm:$0xf] }
  0x48   :  { %553 = vmatmul.bf16.vlgmr.msra.gmra.mxu3 %v4726_v12  ;;  %845 = vmatmul.bf16.vlgmr.msra.gmra.mxu0 %v4730_v20  ;;  %v3559_v19 = vor.u32 %v4085_v14, %v3556_v15  ;;  %v3658_v33 = vld [vmem:[#allocation11 + $0x40] sm:$0xf]  ;;  %v3979_v34 = vld [vmem:[#allocation11 + $0x4c] sm:$0xf0]  ;;  %v3618_v39 = vld [vmem:[#allocation14 + $0xe8] sm:$0xf] }
  0x49   :  { %921 = vmatpush.bf16.msrb.mxu3 %v3623_v29  ;;  %1141 = vmatpush.bf16.msrb.mxu0 %v4736_v32  ;;  %v3383_v29 = vor.u32 %v4044_v18, %v3382_v17  ;;  %v4077_v36 = vld [vmem:[#allocation14 + $0x2c] sm:$0xf]  ;;  %v4761_v41 = vor.u32 %v3979_v34, %v3658_v33  ;;  %v3642_v43 = vld [vmem:[#allocation11 + $0x20] sm:$0xf]  ;;  %v4096_v52 = vld [vmem:[#allocation14 + $0xc4] sm:$0xf] }
  0x4a   :  { %v3975_v47 = vld [vmem:[#allocation11 + $0x2c] sm:$0xf0]  ;;  %v3596_v55 = vld [vmem:[#allocation14 + $0xd0] sm:$0xf0]  ;;  %v3602_v56 = vld [vmem:[#allocation14 + $0xc8] sm:$0xf] }
  0x4b   :  { %488 = vmatpush.bf16.msrb.mxu1 %v3459_v23  ;;  %517 = vmatpush.bf16.msrb.mxu2 %v3463_v24  ;;  %v3360_v23 = vld [vmem:[#allocation10 + $0x10] sm:$0xf0]  ;;  %v3366_v24 = vld [vmem:[#allocation10 + $0x8] sm:$0xf]  ;;  %v4073_v48 = vld [vmem:[#allocation14 + $0xc] sm:$0xf]  ;;  %v4764_v53 = vor.u32 %v3975_v47, %v3642_v43  ;;  %v3599_v0 = vor.u32 %v4096_v52, %v3596_v55 }
  0x4c   :  { %v3363_v45 = vor.u32 %v4037_v22, %v3360_v23  ;;  %v3367_v46 = vor.u32 %v4040_v30, %v3366_v24  ;;  %v4099_v57 = vld [vmem:[#allocation14 + $0xd4] sm:$0xf0]  ;;  %v4092_v2 = vld [vmem:[#allocation14 + $0xa4] sm:$0xf]  ;;  %v3580_v3 = vld [vmem:[#allocation14 + $0xb0] sm:$0xf0] }
  0x4d   :  { %922 = vmatpush.bf16.msrb.mxu3 %v3607_v40  ;;  %1142 = vmatpush.bf16.msrb.mxu0 %v4739_v44  ;;  %v4103_v40 = vld [vmem:[#allocation14 + $0xf4] sm:$0xf0]  ;;  %v3603_v1 = vor.u32 %v4099_v57, %v3602_v56  ;;  %v3586_v4 = vld [vmem:[#allocation14 + $0xa8] sm:$0xf]  ;;  %v3583_v8 = vor.u32 %v4092_v2, %v3580_v3  ;;  %v3564_v14 = vld [vmem:[#allocation14 + $0x90] sm:$0xf0] }
  0x4e   :  { %v4095_v5 = vld [vmem:[#allocation14 + $0xb4] sm:$0xf0]  ;;  %v3570_v15 = vld [vmem:[#allocation14 + $0x88] sm:$0xf]  ;;  %v3548_v21 = vld [vmem:[#allocation14 + $0x70] sm:$0xf0] }
  0x4f   :  { %489 = vmatpush.bf16.msrb.mxu1 %v3443_v37  ;;  %518 = vmatpush.bf16.msrb.mxu2 %v3447_v38  ;;  %v3524_v37 = vld [vmem:[#allocation14 + $0x38] sm:$0xf0]  ;;  %v3612_v38 = vld [vmem:[#allocation14 + $0xf0] sm:$0xf0]  ;;  %v4091_v16 = vld [vmem:[#allocation14 + $0x94] sm:$0xf0] }
  0x50   :  { %v3527_v42 = vor.u32 %v4077_v36, %v3524_v37  ;;  %v612_v17 = vld [vmem:[#allocation8 + $0x18] sm:$0xf]  ;;  %v3571_v18 = vor.u32 %v4091_v16, %v3570_v15  ;;  %v3554_v22 = vld [vmem:[#allocation14 + $0x68] sm:$0xf]  ;;  %v4076_v36 = vld [vmem:[#allocation14 + $0x24] sm:$0xf] }
  0x51   :  { %923 = vmatpush.bf16.msrb.mxu3 %v3591_v49  ;;  %1143 = vmatpush.bf16.msrb.mxu0 %v4742_v58  ;;  %v3508_v49 = vld [vmem:[#allocation14 + $0x18] sm:$0xf0]  ;;  %v4087_v23 = vld [vmem:[#allocation14 + $0x74] sm:$0xf0]  ;;  %v668_v24 = vunpack.c.l.b16 %v612_v17  ;;  %v3538_v30 = vld [vmem:[#allocation14 + $0x48] sm:$0xf] }
  0x52   :  { %v3511_v54 = vor.u32 %v4073_v48, %v3508_v49  ;;  %v3555_v27 = vor.u32 %v4087_v23, %v3554_v22  ;;  %v3516_v37 = vld [vmem:[#allocation14 + $0x30] sm:$0xf0]  ;;  %v4072_v43 = vld [vmem:[#allocation14 + $0x4] sm:$0xf]  ;;  %v4075_v47 = vld [vmem:[#allocation14 + $0x14] sm:$0xf0] }
  0x53   :  { %490 = vmatpush.bf16.msrb.mxu1 %v3427_v50  ;;  %519 = vmatpush.bf16.msrb.mxu2 %v3431_v51  ;;  %v3615_v50 = vor.u32 %v4100_v35, %v3612_v38  ;;  %v3619_v51 = vor.u32 %v4103_v40, %v3618_v39  ;;  %v4779_v33 = vpack.c.b16 %v668_v24, %v668_v24  ;;  %v3522_v38 = vld [vmem:[#allocation14 + $0x28] sm:$0xf]  ;;  %v4079_v39 = vld [vmem:[#allocation14 + $0x34] sm:$0xf0]  ;;  %v4621_v52 = vmov 0  }
  0x54   :  { %v3519_v40 = vor.u32 %v4076_v36, %v3516_v37  ;;  %v3998_v49 = vld [vmem:[#allocation11 + $0xec] sm:$0xf]  ;;  %v3740_v55 = vld [vmem:[#allocation11 + $0xf0] sm:$0xf0]  ;;  %v3746_v56 = vld [vmem:[#allocation11 + $0xe8] sm:$0xf] }
  0x55   :  { %924 = vmatpush.bf16.msrb.mxu3 %v3575_v61  ;;  %1144 = vmatpush.bf16.msrb.mxu0 %v4751_v9  ;;  %v3626_v61 = vld [vmem:[#allocation11] sm:$0xf]  ;;  %v3993_v2 = vld [vmem:[#allocation11 + $0xc4] sm:$0xf]  ;;  %v3724_v3 = vld [vmem:[#allocation11 + $0xd0] sm:$0xf0] }
  0x56   :  { %471 = vmatmul.bf16.gmra.mxu1 %v4744_v59  ;;  %481 = vmatmul.bf16.gmra.mxu2 %v4746_v60  ;;  %v3986_v16 = vld [vmem:[#allocation11 + $0x8c] sm:$0xf]  ;;  %v3700_v17 = vld [vmem:[#allocation11 + $0x98] sm:$0xf0]  ;;  %v3989_v22 = vld [vmem:[#allocation11 + $0xa4] sm:$0xf] }
  0x57   :  { %491 = vmatpush.bf16.msrb.mxu1 %v3411_v62  ;;  %520 = vmatpush.bf16.msrb.mxu2 %v3415_v63  ;;  %v3971_v62 = vld [vmem:[#allocation11 + $0xc] sm:$0xf0]  ;;  %v4766_v63 = vld [vmem:[#allocation8 + $0x10] sm:$0xff]  ;;  %v3714_v24 = vld [vmem:[#allocation11 + $0xa8] sm:$0xf] }
  0x58   :  { %558 = vmatmul.bf16.gmra.mxu3 %v4744_v59  ;;  %850 = vmatmul.bf16.gmra.mxu0 %v4749_v6  ;;  %v4769_v7 = vor.u32 %v3971_v62, %v3626_v61  ;;  %v4000_v61 = vld [vmem:[#allocation11 + $0xf4] sm:$0xf0]  ;;  %v3994_v62 = vld [vmem:[#allocation11 + $0xcc] sm:$0xf]  ;;  %v3708_v23 = vld [vmem:[#allocation11 + $0xb0] sm:$0xf0] }
  0x59   :  { %925 = vmatpush.bf16.msrb.mxu3 %v3559_v19  ;;  %1145 = vmatpush.bf16.msrb.mxu0 %v4758_v25  ;;  %v4084_v19 = vld [vmem:[#allocation14 + $0x64] sm:$0xf]  ;;  %v3652_v37 = vld [vmem:[#allocation11 + $0x38] sm:$0xf0] }
  0x5a   :  { %v3551_v26 = vor.u32 %v4084_v19, %v3548_v21  ;;  %v3684_v19 = vld [vmem:[#allocation11 + $0x78] sm:$0xf0] }
  0x5b   :  { %492 = vmatpush.bf16.msrb.mxu1 %v3395_v10  ;;  %521 = vmatpush.bf16.msrb.mxu2 %v3399_v11  ;;  %v3587_v10 = vor.u32 %v4095_v5, %v3586_v4  ;;  %v4088_v11 = vld [vmem:[#allocation14 + $0x84] sm:$0xf]  ;;  %v3990_v4 = vld [vmem:[#allocation11 + $0xac] sm:$0xf]  ;;  %v4804_v5 = vor.u32 %v3993_v2, %v3724_v3  ;;  %v3973_v2 = vld [vmem:[#allocation11 + $0x24] sm:$0xf] }
  0x5c   :  { %v3644_v3 = vld [vmem:[#allocation11 + $0x30] sm:$0xf0] }
  0x5d   :  { %926 = vmatpush.bf16.msrb.mxu3 %v3543_v31  ;;  %1146 = vmatpush.bf16.msrb.mxu0 %v4761_v41  ;;  %v4083_v31 = vld [vmem:[#allocation14 + $0x54] sm:$0xf0] }
  0x5e   :  { %v3539_v35 = vor.u32 %v4083_v31, %v3538_v30 }
  0x5f   :  { %493 = vmatpush.bf16.msrb.mxu1 %v3379_v28  ;;  %522 = vmatpush.bf16.msrb.mxu2 %v3383_v29  ;;  %v4080_v28 = vld [vmem:[#allocation14 + $0x44] sm:$0xf]  ;;  %v3532_v29 = vld [vmem:[#allocation14 + $0x50] sm:$0xf0] }
  0x60   :  { %v3535_v34 = vor.u32 %v4080_v28, %v3532_v29  ;;  %v3978_v28 = vld [vmem:[#allocation11 + $0x4c] sm:$0xf]  ;;  %v3668_v29 = vld [vmem:[#allocation11 + $0x58] sm:$0xf0] }
  0x61   :  { %927 = vmatpush.bf16.msrb.mxu3 %v3527_v42  ;;  %1147 = vmatpush.bf16.msrb.mxu0 %v4764_v53  ;;  %v3523_v42 = vor.u32 %v4079_v39, %v3522_v38  ;;  %v4832_v31 = vor.u32 %v3978_v28, %v3668_v29  ;;  %v3970_v39 = vld [vmem:[#allocation11 + $0xc] sm:$0xf] }
  0x63   :  { %494 = vmatpush.bf16.msrb.mxu1 %v3363_v45  ;;  %523 = vmatpush.bf16.msrb.mxu2 %v3367_v46  ;;  %v3500_v45 = vld [vmem:[#allocation14 + $0x10] sm:$0xf0]  ;;  %v3506_v46 = vld [vmem:[#allocation14 + $0x8] sm:$0xf] }
  0x64   :  { %v3507_v48 = vor.u32 %v4075_v47, %v3506_v46  ;;  %v3981_v47 = vld [vmem:[#allocation11 + $0x64] sm:$0xf] }
  0x65   :  { %928 = vmatpush.bf16.msrb.mxu3 %v3511_v54  ;;  %1148 = vmatpush.bf16.msrb.mxu0 %v4769_v7  ;;  %v3997_v54 = vld [vmem:[#allocation11 + $0xe4] sm:$0xf] }
  0x66   :  { %495 = vmatmul.bf16.vlgmr.msrb.gmra.mxu1 %v4726_v12  ;;  %524 = vmatmul.bf16.vlgmr.msrb.gmra.mxu2 %v4726_v12  ;;  %v3567_v12 = vor.u32 %v4088_v11, %v3564_v14  ;;  %v4795_v57 = vor.u32 %v3997_v54, %v3740_v55  ;;  %v3996_v11 = vld [vmem:[#allocation11 + $0xd4] sm:$0xf0]  ;;  %v3977_v54 = vld [vmem:[#allocation11 + $0x44] sm:$0xf]  ;;  %v3660_v55 = vld [vmem:[#allocation11 + $0x50] sm:$0xf0] }
  0x67   :  { %865 = vmatpush.bf16.msra.mxu1 %v3615_v50  ;;  %893 = vmatpush.bf16.msra.mxu2 %v3619_v51  ;;  %v3748_v50 = vld [vmem:[#allocation11 + $0xf8] sm:$0xf0] }
  0x68   :  { %563 = vmatmul.bf16.gmra.mxu3 %v4728_v13  ;;  %855 = vmatmul.bf16.gmra.mxu0 %v4766_v63  ;;  %v4791_v51 = vor.u32 %v3998_v49, %v3748_v50  ;;  %v3682_v49 = vld [vmem:[#allocation11 + $0x68] sm:$0xf]  ;;  %v3984_v50 = vld [vmem:[#allocation11 + $0x74] sm:$0xf0] }
  0x69   :  { %1266 = vmatpush.bf16.msra.mxu0 %v4736_v32 }
  0x6a   :  { %1180 = vmatpush.bf16.msra.mxu3 %v4791_v51 }
  0x6b   :  { %866 = vmatpush.bf16.msra.mxu1 %v3599_v0  ;;  %894 = vmatpush.bf16.msra.mxu2 %v3603_v1  ;;  %v3732_v0 = vld [vmem:[#allocation11 + $0xd8] sm:$0xf0]  ;;  %v4798_v1 = vor.u32 %v4000_v61, %v3746_v56  ;;  %v4864_v56 = vor.u32 %v3977_v54, %v3660_v55  ;;  %v3666_v61 = vld [vmem:[#allocation11 + $0x48] sm:$0xf] }
  0x6d   :  { %1267 = vmatpush.bf16.msra.mxu0 %v4739_v44 }
  0x6f   :  { %867 = vmatpush.bf16.msra.mxu1 %v3583_v8  ;;  %895 = vmatpush.bf16.msra.mxu2 %v3587_v10  ;;  %v3716_v8 = vld [vmem:[#allocation11 + $0xb8] sm:$0xf0]  ;;  %v3730_v10 = vld [vmem:[#allocation11 + $0xc8] sm:$0xf] }
  0x70   :  { %v4808_v14 = vor.u32 %v3996_v11, %v3730_v10  ;;  %v4811_v15 = vor.u32 %v3990_v4, %v3716_v8  ;;  %v4875_v4 = vor.u32 %v3973_v2, %v3644_v3  ;;  %v3650_v8 = vld [vmem:[#allocation11 + $0x28] sm:$0xf]  ;;  %v3976_v10 = vld [vmem:[#allocation11 + $0x34] sm:$0xf0]  ;;  %v3969_v11 = vld [vmem:[#allocation11 + $0x4] sm:$0xf] }
  0x71   :  { %1268 = vmatpush.bf16.msra.mxu0 %v4742_v58 }
  0x73   :  { %868 = vmatpush.bf16.msra.mxu1 %v3567_v12  ;;  %896 = vmatpush.bf16.msra.mxu2 %v3571_v18  ;;  %v4817_v12 = vor.u32 %v3986_v16, %v3700_v17  ;;  %v3982_v18 = vld [vmem:[#allocation11 + $0x6c] sm:$0xf]  ;;  %v3628_v16 = vld [vmem:[#allocation11 + $0x10] sm:$0xf0] }
  0x74   :  { %v4823_v21 = vor.u32 %v3982_v18, %v3684_v19  ;;  %v4883_v17 = vor.u32 %v3969_v11, %v3628_v16  ;;  %v3634_v18 = vld [vmem:[#allocation11 + $0x8] sm:$0xf]  ;;  %v3972_v19 = vld [vmem:[#allocation11 + $0x14] sm:$0xf0] }
  0x75   :  { %1269 = vmatpush.bf16.msra.mxu0 %v4751_v9 }
  0x76   :  { %500 = vmatmul.bf16.gmra.mxu1 %v4744_v59  ;;  %529 = vmatmul.bf16.gmra.mxu2 %v4744_v59  ;;  %v3503_v59 = vor.u32 %v4072_v43, %v3500_v45  ;;  %v3698_v43 = vld [vmem:[#allocation11 + $0x88] sm:$0xf]  ;;  %v3988_v45 = vld [vmem:[#allocation11 + $0x94] sm:$0xf0] }
  0x77   :  { %869 = vmatpush.bf16.msra.mxu1 %v3551_v26  ;;  %897 = vmatpush.bf16.msra.mxu2 %v3555_v27  ;;  %v4827_v26 = vor.u32 %v3989_v22, %v3708_v23  ;;  %v3992_v27 = vld [vmem:[#allocation11 + $0xb4] sm:$0xf0]  ;;  %v4852_v46 = vor.u32 %v3988_v45, %v3698_v43  ;;  %v4888_v22 = vor.u32 %v3972_v19, %v3634_v18 }
  0x78   :  { %568 = vmatmul.bf16.gmra.mxu3 %v4746_v60  ;;  %860 = vmatmul.bf16.gmra.mxu0 %v4779_v33  ;;  %v4830_v30 = vor.u32 %v3992_v27, %v3714_v24  ;;  %v4896_v27 = vld [vmem:[#allocation13] sm:$0xf] }
  0x79   :  { %1270 = vmatpush.bf16.msra.mxu0 %v4758_v25  ;;  %v4904_v28 = vperm.slane %v4896_v27, 0 }
  0x7b   :  { %870 = vmatpush.bf16.msra.mxu1 %v3535_v34  ;;  %898 = vmatpush.bf16.msra.mxu2 %v3539_v35  ;;  %v3692_v34 = vld [vmem:[#allocation11 + $0x90] sm:$0xf0]  ;;  %v3974_v35 = vld [vmem:[#allocation11 + $0x2c] sm:$0xf] }
  0x7c   :  { %v4840_v38 = vor.u32 %v3974_v35, %v3652_v37  ;;  %v4924_v37 = vld [vmem:[%s5742_s7] sm:$0xf] }
  0x7d   :  { %1271 = vmatpush.bf16.msra.mxu0 %v4761_v41  ;;  %v4933_v43 = vperm.slane %v4924_v37, 0 }
  0x7f   :  { %871 = vmatpush.bf16.msra.mxu1 %v3519_v40  ;;  %899 = vmatpush.bf16.msra.mxu2 %v3523_v42  ;;  %v3636_v40 = vld [vmem:[#allocation11 + $0x18] sm:$0xf0]  ;;  %5758 = vst [vmem:[#allocation30_spill] sm:$0xff] %v4933_v43 }
  0x80   :  { %v4845_v42 = vor.u32 %v3970_v39, %v3636_v40 }
  0x81   :  { %1272 = vmatpush.bf16.msra.mxu0 %v4764_v53 }
  0x83   :  { %872 = vmatpush.bf16.msra.mxu1 %v3503_v59  ;;  %900 = vmatpush.bf16.msra.mxu2 %v3507_v48  ;;  %v3676_v59 = vld [vmem:[#allocation11 + $0x70] sm:$0xf0] }
  0x84   :  { %v4855_v48 = vor.u32 %v3981_v47, %v3676_v59 }
  0x85   :  { %1273 = vmatpush.bf16.msra.mxu0 %v4769_v7 }
  0x86   :  { %505 = vmatmul.bf16.gmra.mxu1 %v4728_v13  ;;  %534 = vmatmul.bf16.gmra.mxu2 %v4728_v13  ;;  %v4800_v13 = vor.u32 %v3994_v62, %v3732_v0  ;;  %v3980_v62 = vld [vmem:[#allocation11 + $0x54] sm:$0xf0] }
  0x87   :  { %1154 = vmatpush.bf16.msrb.mxu1 %v4795_v57  ;;  %1167 = vmatpush.bf16.msrb.mxu2 %v4798_v1  ;;  %v4872_v0 = vor.u32 %v3980_v62, %v3666_v61 }
  0x88   :  { %929 = vmatmul.bf16.vlgmr.msrb.gmra.mxu3 %v4730_v20  ;;  %1149 = vmatmul.bf16.vlgmr.msrb.gmra.mxu0 %v4621_v52 }
  0x89   :  { %1391 = vmatpush.bf16.msrb.mxu0 %v4736_v32  ;;  %1181 = vmatpush.bf16.msra.mxu3 %v4800_v13 }
  0x8b   :  { %1155 = vmatpush.bf16.msrb.mxu1 %v4804_v5  ;;  %1168 = vmatpush.bf16.msrb.mxu2 %v4808_v14 }
  0x8d   :  { %1392 = vmatpush.bf16.msrb.mxu0 %v4739_v44  ;;  %1182 = vmatpush.bf16.msra.mxu3 %v4811_v15 }
  0x8f   :  { %1156 = vmatpush.bf16.msrb.mxu1 %v4827_v26  ;;  %1169 = vmatpush.bf16.msrb.mxu2 %v4830_v30 }
  0x91   :  { %1393 = vmatpush.bf16.msrb.mxu0 %v4742_v58  ;;  %1183 = vmatpush.bf16.msra.mxu3 %v4817_v12 }
  0x93   :  { %1170 = vmatpush.bf16.msrb.mxu2 %v4852_v46 }
  0x95   :  { %1394 = vmatpush.bf16.msrb.mxu0 %v4751_v9  ;;  %1184 = vmatpush.bf16.msra.mxu3 %v4823_v21 }
  0x96   :  { %510 = vmatmul.bf16.gmra.mxu1 %v4746_v60  ;;  %539 = vmatmul.bf16.gmra.mxu2 %v4746_v60  ;;  %v3985_v60 = vld [vmem:[#allocation11 + $0x84] sm:$0xf] }
  0x97   :  { %v4835_v36 = vor.u32 %v3985_v60, %v3692_v34 }
  0x98   :  { %934 = vmatmul.bf16.gmra.mxu3 %v4749_v6 }
  0x99   :  { %1395 = vmatpush.bf16.msrb.mxu0 %v4758_v25  ;;  %1185 = vmatpush.bf16.msra.mxu3 %v4832_v31 }
  0x9a   :  { %1157 = vmatpush.bf16.msrb.mxu1 %v4835_v36 }
  0x9d   :  { %1396 = vmatpush.bf16.msrb.mxu0 %v4761_v41  ;;  %1186 = vmatpush.bf16.msra.mxu3 %v4840_v38 }
  0x9e   :  { %1158 = vmatpush.bf16.msrb.mxu1 %v4855_v48 }
  0xa1   :  { %1397 = vmatpush.bf16.msrb.mxu0 %v4764_v53  ;;  %1187 = vmatpush.bf16.msra.mxu3 %v4845_v42 }
  0xa2   :  { %1159 = vmatpush.bf16.msrb.mxu1 %v4864_v56 }
  0xa5   :  { %1305 = vmatpush.bf16.msrb.mxu3 %v4791_v51  ;;  %1398 = vmatpush.bf16.msrb.mxu0 %v4769_v7 }
  0xa6   :  { %873 = vmatmul.bf16.vlgmr.msra.gmra.mxu1 %v4730_v20  ;;  %901 = vmatmul.bf16.vlgmr.msra.gmra.mxu2 %v4730_v20  ;;  %v4862_v20 = vor.u32 %v3984_v50, %v3682_v49  ;;  %v4949_v50 = vperm.slane %v4896_v27, 3 }
  0xa7   :  { %1160 = vmatpush.bf16.msrb.mxu1 %v4875_v4 }
  0xa8   :  { %939 = vmatmul.bf16.gmra.mxu3 %v4766_v63  ;;  %1171 = vmatpush.bf16.msrb.mxu2 %v4862_v20 }
  0xa9   :  { %1306 = vmatpush.bf16.msrb.mxu3 %v4800_v13 }
  0xab   :  { %1161 = vmatpush.bf16.msrb.mxu1 %v4883_v17 }
  0xac   :  { %1172 = vmatpush.bf16.msrb.mxu2 %v4872_v0 }
  0xad   :  { %1307 = vmatpush.bf16.msrb.mxu3 %v4811_v15 }
  0xaf   :  { %1279 = vmatpush.bf16.msra.mxu1 %v4795_v57 }
  0xb1   :  { %1308 = vmatpush.bf16.msrb.mxu3 %v4817_v12 }
  0xb3   :  { %1280 = vmatpush.bf16.msra.mxu1 %v4804_v5 }
  0xb5   :  { %1309 = vmatpush.bf16.msrb.mxu3 %v4823_v21 }
  0xb6   :  { %878 = vmatmul.bf16.gmra.mxu1 %v4749_v6  ;;  %906 = vmatmul.bf16.gmra.mxu2 %v4749_v6  ;;  %v4881_v6 = vor.u32 %v3976_v10, %v3650_v8 }
  0xb7   :  { %1281 = vmatpush.bf16.msra.mxu1 %v4827_v26 }
  0xb8   :  { %944 = vmatmul.bf16.gmra.mxu3 %v4779_v33  ;;  %1173 = vmatpush.bf16.msrb.mxu2 %v4881_v6 }
  0xb9   :  { %1310 = vmatpush.bf16.msrb.mxu3 %v4832_v31 }
  0xbb   :  { %1282 = vmatpush.bf16.msra.mxu1 %v4835_v36 }
  0xbc   :  { %1174 = vmatpush.bf16.msrb.mxu2 %v4888_v22 }
  0xbd   :  { %1311 = vmatpush.bf16.msrb.mxu3 %v4840_v38 }
  0xbf   :  { %1283 = vmatpush.bf16.msra.mxu1 %v4855_v48 }
  0xc0   :  { %1292 = vmatpush.bf16.msra.mxu2 %v4798_v1 }
  0xc1   :  { %1312 = vmatpush.bf16.msrb.mxu3 %v4845_v42 }
  0xc3   :  { %v4891_v23 = vpop.f32.mrf.mxu1  ;;  %1284 = vmatpush.bf16.msra.mxu1 %v4864_v56 }
  0xc4   :  { %1293 = vmatpush.bf16.msra.mxu2 %v4808_v14 }
  0xc5   :  { %v4893_v24 = vpop.f32.mrf.mxu0 }
  0xc6   :  { %5754 = vst [vmem:[#allocation26_spill] sm:$0xff] %v4893_v24  ;;  %883 = vmatmul.bf16.gmra.mxu1 %v4766_v63  ;;  %911 = vmatmul.bf16.gmra.mxu2 %v4766_v63 }
  0xc7   :  { %1285 = vmatpush.bf16.msra.mxu1 %v4875_v4 }
  0xc8   :  { %1188 = vmatmul.bf16.vlgmr.msra.gmra.mxu3 %v4621_v52  ;;  %1294 = vmatpush.bf16.msra.mxu2 %v4830_v30 }
  0xc9   :  { %1430 = vmatpush.bf16.msra.mxu3 %v4791_v51  ;;  %v477_v29 = vpop.f32.mrf.mxu2 }
  0xca   :  { %v4909_v60 = vadd.f32 %v477_v29, %v4904_v28 }
  0xcb   :  { %v4911_v34 = vpop.f32.mrf.mxu3  ;;  %v4913_v35 = vpop.f32.mrf.mxu1  ;;  %1286 = vmatpush.bf16.msra.mxu1 %v4883_v17 }
  0xcc   :  { %5755 = vst [vmem:[#allocation27_spill] sm:$0xff] %v4909_v60  ;;  %1295 = vmatpush.bf16.msra.mxu2 %v4852_v46 }
  0xcd   :  { %v4916_v63 = vpop.f32.mrf.mxu0  ;;  %1431 = vmatpush.bf16.msra.mxu3 %v4800_v13 }
  0xce   :  { %5756 = vst [vmem:[#allocation28_spill] sm:$0xff] %v4916_v63 }
  0xd0   :  { %1296 = vmatpush.bf16.msra.mxu2 %v4862_v20 }
  0xd1   :  { %1432 = vmatpush.bf16.msra.mxu3 %v4811_v15  ;;  %v4927_v39 = vpop.f32.mrf.mxu2 }
  0xd2   :  { %5757 = vst [vmem:[#allocation29_spill] sm:$0xff] %v4927_v39 }
  0xd3   :  { %v4930_v40 = vpop.f32.mrf.mxu3  ;;  %v472_v45 = vpop.f32.mrf.mxu1 }
  0xd4   :  { %v4937_v47 = vadd.f32 %v472_v45, %v4904_v28  ;;  %1297 = vmatpush.bf16.msra.mxu2 %v4872_v0 }
  0xd5   :  { %v851_v59 = vpop.f32.mrf.mxu0  ;;  %1433 = vmatpush.bf16.msra.mxu3 %v4817_v12 }
  0xd6   :  { %v4941_v49 = vadd.f32 %v851_v59, %v4933_v43  ;;  %888 = vmatmul.bf16.gmra.mxu1 %v4779_v33  ;;  %916 = vmatmul.bf16.gmra.mxu2 %v4779_v33 }
  0xd8   :  { %5759 = vst [vmem:[#allocation31_spill] sm:$0xff] %v4941_v49  ;;  %1298 = vmatpush.bf16.msra.mxu2 %v4881_v6 }
  0xd9   :  { %1434 = vmatpush.bf16.msra.mxu3 %v4823_v21  ;;  %v482_v54 = vpop.f32.mrf.mxu2 }
  0xda   :  { %v4953_v55 = vadd.f32 %v482_v54, %v4904_v28  ;;  %v4998_v54 = vperm.slane %v4896_v27, 1 }
  0xdb   :  { %v559_v61 = vpop.f32.mrf.mxu3  ;;  %v4958_v2 = vpop.f32.mrf.mxu1 }
  0xdc   :  { %5760 = vst [vmem:[#allocation32_spill] sm:$0xff] %v4953_v55  ;;  %v4956_v62 = vadd.f32 %v559_v61, %v4949_v50  ;;  %1299 = vmatpush.bf16.msra.mxu2 %v4888_v22 }
  0xdd   :  { %5762 = vst [vmem:[#allocation34_spill] sm:$0xff] %v4958_v2  ;;  %v4961_v33 = vpop.f32.mrf.mxu0  ;;  %1435 = vmatpush.bf16.msra.mxu3 %v4832_v31 }
  0xde   :  { %5761 = vst [vmem:[#allocation33_spill] sm:$0xff] %v4956_v62 }
  0xdf   :  { %5763 = vst [vmem:[#allocation35_spill] sm:$0xff] %v4961_v33  ;;  %v5013_v33 = vperm.slane %v4896_v27, 2 }
  0xe1   :  { %1436 = vmatpush.bf16.msra.mxu3 %v4840_v38  ;;  %v4967_v3 = vpop.f32.mrf.mxu2 }
  0xe2   :  { %5764 = vst [vmem:[#allocation36_spill] sm:$0xff] %v4967_v3 }
  0xe3   :  { %v4970_v8 = vpop.f32.mrf.mxu3  ;;  %v4972_v10 = vpop.f32.mrf.mxu1 }
  0xe4   :  { %5765 = vst [vmem:[#allocation37_spill] sm:$0xff] %v4970_v8 }
  0xe5   :  { %v856_v11 = vpop.f32.mrf.mxu0  ;;  %1437 = vmatpush.bf16.msra.mxu3 %v4845_v42 }
  0xe6   :  { %v4976_v16 = vadd.f32 %v856_v11, %v4933_v43  ;;  %1162 = vmatmul.bf16.vlgmr.msrb.gmra.mxu1 %v4621_v52  ;;  %1175 = vmatmul.bf16.vlgmr.msrb.gmra.mxu2 %v4621_v52 }
  0xe7   :  { %1404 = vmatpush.bf16.msrb.mxu1 %v4795_v57  ;;  %1417 = vmatpush.bf16.msrb.mxu2 %v4798_v1 }
  0xe8   :  { %5766 = vst [vmem:[#allocation38_spill] sm:$0xff] %v4976_v16 }
  0xe9   :  { %v4982_v18 = vpop.f32.mrf.mxu2 }
  0xeb   :  { %v564_v19 = vpop.f32.mrf.mxu3  ;;  %v4987_v45 = vpop.f32.mrf.mxu1  ;;  %1405 = vmatpush.bf16.msrb.mxu1 %v4804_v5  ;;  %1418 = vmatpush.bf16.msrb.mxu2 %v4808_v14 }
  0xec   :  { %v4985_v29 = vadd.f32 %v564_v19, %v4949_v50 }
  0xed   :  { %v4991_v59 = vpop.f32.mrf.mxu0 }
  0xee   :  { %5767 = vst [vmem:[#allocation39_spill] sm:$0xff] %v4985_v29 }
  0xef   :  { %5768 = vst [vmem:[#allocation40_spill] sm:$0xff] %v4991_v59  ;;  %1406 = vmatpush.bf16.msrb.mxu1 %v4827_v26  ;;  %1419 = vmatpush.bf16.msrb.mxu2 %v4830_v30 }
  0xf1   :  { %v4995_v52 = vpop.f32.mrf.mxu2 }
  0xf3   :  { %v5000_v61 = vpop.f32.mrf.mxu3  ;;  %v501_v11 = vpop.f32.mrf.mxu1  ;;  %1407 = vmatpush.bf16.msrb.mxu1 %v4835_v36  ;;  %1420 = vmatpush.bf16.msrb.mxu2 %v4852_v46 }
  0xf4   :  { %5769 = vst [vmem:[#allocation41_spill] sm:$0xff] %v5000_v61  ;;  %v5005_v19 = vadd.f32 %v501_v11, %v4998_v54 }
  0xf5   :  { %v861_v59 = vpop.f32.mrf.mxu0 }
  0xf6   :  { %v5008_v16 = vadd.f32 %v861_v59, %v4933_v43 }
  0xf7   :  { %1408 = vmatpush.bf16.msrb.mxu1 %v4855_v48  ;;  %1421 = vmatpush.bf16.msrb.mxu2 %v4862_v20 }
  0xf8   :  { %5770 = vst [vmem:[#allocation42_spill] sm:$0xff] %v5008_v16 }
  0xf9   :  { %v530_v49 = vpop.f32.mrf.mxu2 }
  0xfa   :  { %v5016_v63 = vadd.f32 %v530_v49, %v5013_v33  ;;  %v468_v49 = vadd.f32 %v4891_v23, %v4904_v28 }
  0xfb   :  { %v569_v24 = vpop.f32.mrf.mxu3  ;;  %v5021_v11 = vpop.f32.mrf.mxu1  ;;  %1409 = vmatpush.bf16.msrb.mxu1 %v4864_v56  ;;  %1422 = vmatpush.bf16.msrb.mxu2 %v4872_v0 }
  0xfc   :  { %5771 = vst [vmem:[#allocation43_spill] sm:$0xff] %v5016_v63  ;;  %v5019_v3 = vadd.f32 %v569_v24, %v4949_v50 }
  0xfd   :  { %5773 = vst [vmem:[#allocation45_spill] sm:$0xff] %v5021_v11  ;;  %v863_v59 = vpop.f32.mrf.mxu0 }
  0xfe   :  { %5772 = vst [vmem:[#allocation44_spill] sm:$0xff] %v5019_v3 }
  0xff   :  { %1410 = vmatpush.bf16.msrb.mxu1 %v4875_v4  ;;  %1423 = vmatpush.bf16.msrb.mxu2 %v4881_v6 }
 0x101   :  { %v5027_v27 = vpop.f32.mrf.mxu2 }
 0x102   :  { %5774 = vst [vmem:[#allocation46_spill] sm:$0xff] %v5027_v27 }
 0x103   :  { %v5029_v16 = vpop.f32.mrf.mxu3  ;;  %v506_v24 = vpop.f32.mrf.mxu1  ;;  %1411 = vmatpush.bf16.msrb.mxu1 %v4883_v17  ;;  %1424 = vmatpush.bf16.msrb.mxu2 %v4888_v22 }
 0x104   :  { %5775 = vst [vmem:[#allocation47_spill] sm:$0xff] %v5029_v16  ;;  %v5036_v43 = vadd.f32 %v506_v24, %v4998_v54  ;;  %v5053_v24 = vperm.slane %v4924_v37, 3 }
 0x105   :  { %v1150_v59 = vpop.f32.mrf.mxu0 }
 0x106   :  { %5776 = vst [vmem:[#allocation48_spill] sm:$0xff] %v5036_v43  ;;  %v1193_v3 = vadd.f32 %v1150_v59, %v468_v49 }
 0x107   :  { %5783 = vst [vmem:[#allocation55_spill] sm:$0xff] %v5053_v24 }
 0x109   :  { %v535_v55 = vpop.f32.mrf.mxu2 }
 0x10a   :  { %v5039_v61 = vadd.f32 %v535_v55, %v5013_v33 }
 0x10b   :  { %v5041_v39 = vpop.f32.mrf.mxu3  ;;  %v5043_v16 = vpop.f32.mrf.mxu1 }
 0x10c   :  { %5777 = vst [vmem:[#allocation49_spill] sm:$0xff] %v5039_v61 }
 0x10d   :  { %5778 = vst [vmem:[#allocation50_spill] sm:$0xff] %v5041_v39  ;;  %v1152_v29 = vpop.f32.mrf.mxu0 }
 0x10e   :  { %5779 = vst [vmem:[#allocation51_spill] sm:$0xff] %v5043_v16 }
 0x111   :  { %v5045_v23 = vpop.f32.mrf.mxu2 }
 0x112   :  { %5780 = vst [vmem:[#allocation52_spill] sm:$0xff] %v5045_v23 }
 0x113   :  { %v5047_v60 = vpop.f32.mrf.mxu3  ;;  %v511_v8 = vpop.f32.mrf.mxu1 }
 0x114   :  { %5781 = vst [vmem:[#allocation53_spill] sm:$0xff] %v5047_v60  ;;  %v5050_v27 = vadd.f32 %v511_v8, %v4998_v54  ;;  %v3752_v8 = vmul.f32 -1.442695, %v1193_v3 }
 0x116   :  { %5782 = vst [vmem:[#allocation54_spill] sm:$0xff] %v5050_v27  ;;  %4141 = vpow2.f32 %v3752_v8  ;;  %v5087_v8 = vperm.slane %v4924_v37, 2 }
 0x118   :  { %5797 = vst [vmem:[#allocation69_spill] sm:$0xff] %v5087_v8 }
 0x119   :  { %v540_v49 = vpop.f32.mrf.mxu2 }
 0x11a   :  { %v5056_v55 = vadd.f32 %v540_v49, %v5013_v33 }
 0x11b   :  { %v935_v59 = vpop.f32.mrf.mxu3  ;;  %v5061_v29 = vpop.f32.mrf.mxu1 }
 0x11c   :  { %5784 = vst [vmem:[#allocation56_spill] sm:$0xff] %v5056_v55  ;;  %v5059_v39 = vadd.f32 %v935_v59, %v5053_v24  ;;  %v4142_v59 = vpop.eup %4141 }
 0x11d   :  { %5786 = vst [vmem:[#allocation58_spill] sm:$0xff] %v5061_v29  ;;  %v5079_v29 = vperm.slane %v4924_v37, 1 }
 0x11e   :  { %5785 = vst [vmem:[#allocation57_spill] sm:$0xff] %v5059_v39 }
 0x11f   :  { %5794 = vst [vmem:[#allocation66_spill] sm:$0xff] %v5079_v29 }
 0x121   :  { %v5063_v23 = vpop.f32.mrf.mxu2 }
 0x122   :  { %5787 = vst [vmem:[#allocation59_spill] sm:$0xff] %v5063_v23 }
 0x123   :  { %v5065_v60 = vpop.f32.mrf.mxu3  ;;  %v5067_v16 = vpop.f32.mrf.mxu1 }
 0x124   :  { %5788 = vst [vmem:[#allocation60_spill] sm:$0xff] %v5065_v60  ;;  %v1206_v60 = vadd.f32 1.0, %v4142_v59 }
 0x125   :  { %5789 = vst [vmem:[#allocation61_spill] sm:$0xff] %v5067_v16 }
 0x126   :  { %4143 = vrcp.f32 %v1206_v60  ;;  %vm1214_vm1 = vweird.f32 %v1206_v60 }
 0x129   :  { %v5069_v27 = vpop.f32.mrf.mxu2 }
 0x12a   :  { %5790 = vst [vmem:[#allocation62_spill] sm:$0xff] %v5069_v27 }
 0x12b   :  { %v940_v61 = vpop.f32.mrf.mxu3  ;;  %v5074_v55 = vpop.f32.mrf.mxu1 }
 0x12c   :  { %v5072_v49 = vadd.f32 %v940_v61, %v5053_v24  ;;  %5792 = vst [vmem:[#allocation64_spill] sm:$0xff] %v5074_v55 }
 0x12e   :  { %5791 = vst [vmem:[#allocation63_spill] sm:$0xff] %v5072_v49 }
 0x131   :  { %v5076_v39 = vpop.f32.mrf.mxu2 }
 0x132   :  { %5793 = vst [vmem:[#allocation65_spill] sm:$0xff] %v5076_v39 }
 0x133   :  { %v5081_v23 = vpop.f32.mrf.mxu3  ;;  %v879_v16 = vpop.f32.mrf.mxu1 }
 0x134   :  { %5795 = vst [vmem:[#allocation67_spill] sm:$0xff] %v5081_v23  ;;  %v5084_v3 = vadd.f32 %v879_v16, %v5079_v29  ;;  %v4144_v23 = vpop.eup %4143 }
 0x135   :  { %v1210_v59 = vmul.f32 %v4144_v23, %v1206_v60  ;;  %vm1215_vm0 = vweird.f32 %v4144_v23 }
 0x136   :  { %5796 = vst [vmem:[#allocation68_spill] sm:$0xff] %v5084_v3  ;;  %vm1216_vm2 = vmor %vm1214_vm1, %vm1215_vm0 }
 0x137   :  { %v1211_v11 = vsub.f32 1.0, %v1210_v59  ;;  %v1218_v59 = vand.u32 2147483647, %v1206_v60 }
 0x139   :  { %v907_v61 = vpop.f32.mrf.mxu2  ;;  %v1212_v2 = vmul.f32 %v4144_v23, %v1211_v11  ;;  %vm1219_vm3 = vcmp.eq.f32.partialorder %v1218_v59, 8.507059e+37 }
 0x13a   :  { %v5090_v49 = vadd.f32 %v907_v61, %v5087_v8  ;;  %v555_v61 = vadd.f32 %v4911_v34, %v4949_v50 }
 0x13b   :  { %v945_v55 = vpop.f32.mrf.mxu3  ;;  %v5095_v27 = vpop.f32.mrf.mxu1  ;;  %v1213_v62 = vadd.f32 %v4144_v23, %v1212_v2 }
 0x13c   :  { %5798 = vst [vmem:[#allocation70_spill] sm:$0xff] %v5090_v49  ;;  %v5093_v39 = vadd.f32 %v945_v55, %v5053_v24 }
 0x13d   :  { %5800 = vst [vmem:[#allocation72_spill] sm:$0xff] %v5095_v27 }
 0x13e   :  { %5799 = vst [vmem:[#allocation71_spill] sm:$0xff] %v5093_v39 }
 0x141   :  { %v5097_v43 = vpop.f32.mrf.mxu2 }
 0x142   :  { %5801 = vst [vmem:[#allocation73_spill] sm:$0xff] %v5097_v43 }
 0x143   :  { %v947_v16 = vpop.f32.mrf.mxu3  ;;  %v884_v3 = vpop.f32.mrf.mxu1 }
 0x144   :  { %v5100_v37 = vadd.f32 %v884_v3, %v5079_v29  ;;  %v1220_v16 = vand.u32 2147483648, %v1206_v60  ;;  %v1217_v3 = vsel %vm1216_vm2, %v4144_v23, %v1213_v62  ;;  %v497_v62 = vadd.f32 %v4972_v10, %v4998_v54 }
 0x146   :  { %5802 = vst [vmem:[#allocation74_spill] sm:$0xff] %v5100_v37  ;;  %v1221_v11 = vor.u32 1.1754944e-38, %v1220_v16 }
 0x149   :  { %v912_v49 = vpop.f32.mrf.mxu2 }
 0x14a   :  { %v5105_v55 = vadd.f32 %v912_v49, %v5087_v8  ;;  %v1222_v49 = vsel %vm1219_vm3, %v1221_v11, %v1217_v3  ;;  %v526_v3 = vadd.f32 %v4982_v18, %v5013_v33 }
 0x14b   :  { %v1189_v39 = vpop.f32.mrf.mxu3  ;;  %v5107_v24 = vpop.f32.mrf.mxu1 }
 0x14c   :  { %5803 = vst [vmem:[#allocation75_spill] sm:$0xff] %v5105_v55  ;;  %v1196_v27 = vadd.f32 %v1189_v39, %v555_v61 }
 0x14d   :  { %5804 = vst [vmem:[#allocation76_spill] sm:$0xff] %v5107_v24 }
 0x14e   :  { %4145 = vtanh.f32 %v1196_v27 }
 0x151   :  { %v5109_v37 = vpop.f32.mrf.mxu2 }
 0x152   :  { %5805 = vst [vmem:[#allocation77_spill] sm:$0xff] %v5109_v37 }
 0x153   :  { %v1191_v34 = vpop.f32.mrf.mxu3  ;;  %v889_v55 = vpop.f32.mrf.mxu1 }
 0x154   :  { %v4146_v43 = vpop.eup %4145  ;;  %v5112_v39 = vadd.f32 %v889_v55, %v5079_v29 }
 0x155   :  { %v1256_v63 = vmul.f32 %v4146_v43, %v1222_v49 }
 0x156   :  { %5806 = vst [vmem:[#allocation78_spill] sm:$0xff] %v5112_v39 }
 0x159   :  { %v917_v2 = vpop.f32.mrf.mxu2 }
 0x15a   :  { %v5115_v61 = vadd.f32 %v917_v2, %v5087_v8 }
 0x15b   :  { %v891_v27 = vpop.f32.mrf.mxu1 }
 0x15c   :  { %5807 = vst [vmem:[#allocation79_spill] sm:$0xff] %v5115_v61 }
 0x161   :  { %v919_v60 = vpop.f32.mrf.mxu2 }
 0x163   :  { %v1163_v23 = vpop.f32.mrf.mxu1 }
 0x164   :  { %v1194_v16 = vadd.f32 %v1163_v23, %v497_v62 }
 0x166   :  { %v3753_v59 = vmul.f32 -1.442695, %v1194_v16 }
 0x168   :  { %4147 = vpow2.f32 %v3753_v59 }
 0x169   :  { %v1176_v43 = vpop.f32.mrf.mxu2 }
 0x16a   :  { %v1195_v11 = vadd.f32 %v1176_v43, %v526_v3 }
 0x16b   :  { %v1165_v55 = vpop.f32.mrf.mxu1 }
 0x16c   :  { %v3754_v34 = vmul.f32 -1.442695, %v1195_v11 }
 0x16e   :  { %v4148_v49 = vpop.eup %4147  ;;  %4149 = vpow2.f32 %v3754_v34 }
 0x16f   :  { %v1207_v2 = vadd.f32 1.0, %v4148_v49 }
 0x171   :  { %4151 = vrcp.f32 %v1207_v2  ;;  %v1178_v27 = vpop.f32.mrf.mxu2  ;;  %v1235_v23 = vand.u32 2147483648, %v1207_v2  ;;  %v1233_v18 = vand.u32 2147483647, %v1207_v2  ;;  %vm1229_vm5 = vweird.f32 %v1207_v2 }
 0x173   :  { %v1236_v43 = vor.u32 1.1754944e-38, %v1235_v23  ;;  %vm1234_vm7 = vcmp.eq.f32.partialorder %v1233_v18, 8.507059e+37 }
 0x174   :  { %v4150_v60 = vpop.eup %4149 }
 0x175   :  { %v1208_v61 = vadd.f32 1.0, %v4150_v60 }
 0x177   :  { %v4152_v39 = vpop.eup %4151  ;;  %4153 = vrcp.f32 %v1208_v61  ;;  %vm1244_vm9 = vweird.f32 %v1208_v61 }
 0x178   :  { %v1225_v10 = vmul.f32 %v4152_v39, %v1207_v2  ;;  %vm1230_vm4 = vweird.f32 %v4152_v39 }
 0x179   :  { %vm1231_vm6 = vmor %vm1229_vm5, %vm1230_vm4 }
 0x17a   :  { %v1226_v62 = vsub.f32 1.0, %v1225_v10  ;;  %v1250_v10 = vand.u32 2147483648, %v1208_v61 }
 0x17c   :  { %v1227_v16 = vmul.f32 %v4152_v39, %v1226_v62  ;;  %v1248_v62 = vand.u32 2147483647, %v1208_v61 }
 0x17d   :  { %v4154_v59 = vpop.eup %4153 }
 0x17e   :  { %v1228_v37 = vadd.f32 %v4152_v39, %v1227_v16  ;;  %v1240_v3 = vmul.f32 %v4154_v59, %v1208_v61  ;;  %vm1245_vm8 = vweird.f32 %v4154_v59  ;;  %v1251_v16 = vor.u32 1.1754944e-38, %v1250_v10 }
 0x17f   :  { %vm1246_vm10 = vmor %vm1244_vm9, %vm1245_vm8  ;;  %vm1249_vm11 = vcmp.eq.f32.partialorder %v1248_v62, 8.507059e+37 }
 0x180   :  { %v1232_v11 = vsel %vm1231_vm6, %v4152_v39, %v1228_v37  ;;  %v1241_v55 = vsub.f32 1.0, %v1240_v3 }
 0x181   :  { %v1237_v34 = vsel %vm1234_vm7, %v1236_v43, %v1232_v11 }
 0x182   :  { %v1255_v49 = vmul.f32 0.0, %v1237_v34  ;;  %v1242_v27 = vmul.f32 %v4154_v59, %v1241_v55  ;;  %v528_v34 = vadd.f32 %v4995_v52, %v5013_v33  ;;  %v557_v52 = vadd.f32 %v4930_v40, %v4949_v50 }
 0x184   :  { %v5121_v60 = vadd.f32 %v1256_v63, %v1255_v49  ;;  %v1243_v24 = vadd.f32 %v4154_v59, %v1242_v27  ;;  %v470_v63 = vadd.f32 %v4913_v35, %v4904_v28 }
 0x186   :  { %4155 = vtanh.f32 %v5121_v60  ;;  %v1247_v2 = vsel %vm1246_vm10, %v4154_v59, %v1243_v24  ;;  %v499_v24 = vadd.f32 %v4987_v45, %v4998_v54 }
 0x187   :  { %v1252_v37 = vsel %vm1249_vm11, %v1251_v16, %v1247_v2 }
 0x18c   :  { %v4156_v23 = vpop.eup %4155 }
 0x18d   :  { %v1259_v39 = vmul.f32 %v4156_v23, %v1252_v37 }
 0x18f   :  { %v1260_v18 = vpack.c.bf16 %v1259_v39, %v1259_v39 }
 0x191   :  { %1274 = vmatmul.bf16.vlgmr.msra.gmra.mxu0 %v1260_v18  ;;  %1287 = vmatmul.bf16.vlgmr.msra.gmra.mxu1 %v1260_v18 }
 0x192   :  { %1300 = vmatmul.bf16.vlgmr.msra.gmra.mxu2 %v1260_v18  ;;  %1313 = vmatmul.bf16.vlgmr.msrb.gmra.mxu3 %v1260_v18 }
 0x193   :  { %1516 = vmatpush.bf16.msra.mxu0 %v4736_v32  ;;  %1529 = vmatpush.bf16.msra.mxu1 %v4795_v57 }
 0x194   :  { %1542 = vmatpush.bf16.msra.mxu2 %v4798_v1  ;;  %1555 = vmatpush.bf16.msrb.mxu3 %v4791_v51 }
 0x197   :  { %1517 = vmatpush.bf16.msra.mxu0 %v4739_v44  ;;  %1530 = vmatpush.bf16.msra.mxu1 %v4804_v5 }
 0x198   :  { %1543 = vmatpush.bf16.msra.mxu2 %v4808_v14  ;;  %1556 = vmatpush.bf16.msrb.mxu3 %v4800_v13 }
 0x19b   :  { %1518 = vmatpush.bf16.msra.mxu0 %v4742_v58  ;;  %1531 = vmatpush.bf16.msra.mxu1 %v4827_v26 }
 0x19c   :  { %1544 = vmatpush.bf16.msra.mxu2 %v4830_v30  ;;  %1557 = vmatpush.bf16.msrb.mxu3 %v4811_v15 }
 0x19f   :  { %1519 = vmatpush.bf16.msra.mxu0 %v4751_v9  ;;  %1532 = vmatpush.bf16.msra.mxu1 %v4835_v36 }
 0x1a0   :  { %1545 = vmatpush.bf16.msra.mxu2 %v4852_v46  ;;  %1558 = vmatpush.bf16.msrb.mxu3 %v4817_v12 }
 0x1a3   :  { %1520 = vmatpush.bf16.msra.mxu0 %v4758_v25  ;;  %1533 = vmatpush.bf16.msra.mxu1 %v4855_v48 }
 0x1a4   :  { %1546 = vmatpush.bf16.msra.mxu2 %v4862_v20  ;;  %1559 = vmatpush.bf16.msrb.mxu3 %v4823_v21 }
 0x1a7   :  { %1521 = vmatpush.bf16.msra.mxu0 %v4761_v41  ;;  %1534 = vmatpush.bf16.msra.mxu1 %v4864_v56 }
 0x1a8   :  { %1547 = vmatpush.bf16.msra.mxu2 %v4872_v0  ;;  %1560 = vmatpush.bf16.msrb.mxu3 %v4832_v31 }
 0x1ab   :  { %1522 = vmatpush.bf16.msra.mxu0 %v4764_v53  ;;  %1535 = vmatpush.bf16.msra.mxu1 %v4875_v4 }
 0x1ac   :  { %1548 = vmatpush.bf16.msra.mxu2 %v4881_v6  ;;  %1561 = vmatpush.bf16.msrb.mxu3 %v4840_v38 }
 0x1af   :  { %1523 = vmatpush.bf16.msra.mxu0 %v4769_v7  ;;  %1536 = vmatpush.bf16.msra.mxu1 %v4883_v17 }
 0x1b0   :  { %1549 = vmatpush.bf16.msra.mxu2 %v4888_v22  ;;  %1562 = vmatpush.bf16.msrb.mxu3 %v4845_v42 }
 0x20e   :  { %v1275_v61 = vpop.f32.mrf.mxu0  ;;  %v1288_v59 = vpop.f32.mrf.mxu1 }
 0x20f   :  { %v1318_v3 = vadd.f32 %v1275_v61, %v470_v63  ;;  %v1319_v43 = vadd.f32 %v1288_v59, %v499_v24 }
 0x211   :  { %v3755_v11 = vmul.f32 -1.442695, %v1318_v3  ;;  %v3756_v55 = vmul.f32 -1.442695, %v1319_v43 }
 0x213   :  { %4157 = vpow2.f32 %v3755_v11 }
 0x214   :  { %4159 = vpow2.f32 %v3756_v55 }
 0x215   :  { %v1301_v49 = vpop.f32.mrf.mxu2  ;;  %v1314_v27 = vpop.f32.mrf.mxu3 }
 0x216   :  { %v1320_v10 = vadd.f32 %v1301_v49, %v528_v34  ;;  %v1277_v62 = vpop.f32.mrf.mxu0  ;;  %v1290_v2 = vpop.f32.mrf.mxu1  ;;  %v1321_v59 = vadd.f32 %v1314_v27, %v557_v52 }
 0x218   :  { %v3757_v35 = vmul.f32 -1.442695, %v1320_v10 }
 0x219   :  { %v4158_v16 = vpop.eup %4157 }
 0x21a   :  { %v4160_v23 = vpop.eup %4159  ;;  %v1331_v45 = vadd.f32 1.0, %v4158_v16  ;;  %4161 = vpow2.f32 %v3757_v35 }
 0x21b   :  { %v1332_v37 = vadd.f32 1.0, %v4160_v23 }
 0x21c   :  { %4163 = vrcp.f32 %v1331_v45  ;;  %v1345_v49 = vand.u32 2147483648, %v1331_v45  ;;  %v1343_v2 = vand.u32 2147483647, %v1331_v45  ;;  %vm1339_vm14 = vweird.f32 %v1331_v45 }
 0x21d   :  { %4165 = vrcp.f32 %v1332_v37  ;;  %v1303_v39 = vpop.f32.mrf.mxu2  ;;  %v1316_v18 = vpop.f32.mrf.mxu3  ;;  %v1360_v10 = vand.u32 2147483648, %v1332_v37  ;;  %v1358_v16 = vand.u32 2147483647, %v1332_v37  ;;  %vm1354_vm15 = vweird.f32 %v1332_v37 }
 0x21e   :  { %v1346_v39 = vor.u32 1.1754944e-38, %v1345_v49  ;;  %vm1344_vm2 = vcmp.eq.f32.partialorder %v1343_v2, 8.507059e+37 }
 0x21f   :  { %vm1359_vm3 = vcmp.eq.f32.partialorder %v1358_v16, 8.507059e+37 }
 0x220   :  { %v4162_v63 = vpop.eup %4161 }
 0x221   :  { %v1333_v24 = vadd.f32 1.0, %v4162_v63  ;;  %v1361_v63 = vor.u32 1.1754944e-38, %v1360_v10 }
 0x222   :  { %v4164_v61 = vpop.eup %4163 }
 0x223   :  { %v4166_v3 = vpop.eup %4165  ;;  %v1335_v43 = vmul.f32 %v4164_v61, %v1331_v45  ;;  %4167 = vrcp.f32 %v1333_v24  ;;  %vm1340_vm12 = vweird.f32 %v4164_v61  ;;  %v1375_v49 = vand.u32 2147483648, %v1333_v24 }
 0x224   :  { %v1350_v11 = vmul.f32 %v4166_v3, %v1332_v37  ;;  %4169 = vtanh.f32 %v1321_v59  ;;  %vm1355_vm13 = vweird.f32 %v4166_v3  ;;  %vm1341_vm0 = vmor %vm1339_vm14, %vm1340_vm12  ;;  %vm1369_vm5 = vweird.f32 %v1333_v24 }
 0x225   :  { %v1336_v55 = vsub.f32 1.0, %v1335_v43  ;;  %vm1356_vm1 = vmor %vm1354_vm15, %vm1355_vm13  ;;  %v1376_v2 = vor.u32 1.1754944e-38, %v1375_v49 }
 0x226   :  { %v1351_v34 = vsub.f32 1.0, %v1350_v11 }
 0x227   :  { %v1337_v62 = vmul.f32 %v4164_v61, %v1336_v55 }
 0x228   :  { %v1352_v35 = vmul.f32 %v4166_v3, %v1351_v34 }
 0x229   :  { %v4168_v23 = vpop.eup %4167  ;;  %v1338_v40 = vadd.f32 %v4164_v61, %v1337_v62 }
 0x22a   :  { %v1365_v27 = vmul.f32 %v4168_v23, %v1333_v24  ;;  %v1353_v18 = vadd.f32 %v4166_v3, %v1352_v35  ;;  %v4170_v59 = vpop.eup %4169  ;;  %vm1370_vm4 = vweird.f32 %v4168_v23 }
 0x22b   :  { %v1342_v52 = vsel %vm1341_vm0, %v4164_v61, %v1338_v40  ;;  %v1373_v61 = vand.u32 2147483647, %v1333_v24  ;;  %vm1371_vm6 = vmor %vm1369_vm5, %vm1370_vm4 }
 0x22c   :  { %v1366_v43 = vsub.f32 1.0, %v1365_v27  ;;  %v1347_v11 = vsel %vm1344_vm2, %v1346_v39, %v1342_v52  ;;  %v1357_v55 = vsel %vm1356_vm1, %v4166_v3, %v1353_v18 }
 0x22d   :  { %v1362_v34 = vsel %vm1359_vm3, %v1361_v63, %v1357_v55  ;;  %v1381_v8 = vmul.f32 %v4170_v59, %v1347_v11  ;;  %vm1374_vm7 = vcmp.eq.f32.partialorder %v1373_v61, 8.507059e+37  ;;  %v5808_v63 = vld [vmem:[#allocation43_spill] sm:$0xff] }
 0x22e   :  { %v1380_v29 = vmul.f32 %v1362_v34, %v5121_v60  ;;  %v1367_v62 = vmul.f32 %v4168_v23, %v1366_v43 }
 0x230   :  { %v5165_v45 = vadd.f32 %v1381_v8, %v1380_v29  ;;  %v1368_v37 = vadd.f32 %v4168_v23, %v1367_v62 }
 0x232   :  { %4171 = vtanh.f32 %v5165_v45  ;;  %v1372_v10 = vsel %vm1371_vm6, %v4168_v23, %v1368_v37 }
 0x233   :  { %v1377_v35 = vsel %vm1374_vm7, %v1376_v2, %v1372_v10  ;;  %v5809_v2 = vld [vmem:[#allocation33_spill] sm:$0xff] }
 0x238   :  { %v4172_v3 = vpop.eup %4171 }
 0x239   :  { %v1384_v16 = vmul.f32 %v4172_v3, %v1377_v35 }
 0x23b   :  { %v1385_v40 = vpack.c.bf16 %v1384_v16, %v1384_v16 }
 0x23d   :  { %1399 = vmatmul.bf16.vlgmr.msrb.gmra.mxu0 %v1385_v40  ;;  %1412 = vmatmul.bf16.vlgmr.msrb.gmra.mxu1 %v1385_v40 }
 0x23e   :  { %1425 = vmatmul.bf16.vlgmr.msrb.gmra.mxu2 %v1385_v40  ;;  %1438 = vmatmul.bf16.vlgmr.msra.gmra.mxu3 %v1385_v40 }
 0x23f   :  { %1641 = vmatpush.bf16.msrb.mxu0 %v4736_v32  ;;  %1654 = vmatpush.bf16.msrb.mxu1 %v4795_v57 }
 0x240   :  { %1667 = vmatpush.bf16.msrb.mxu2 %v4798_v1  ;;  %1680 = vmatpush.bf16.msra.mxu3 %v4791_v51 }
 0x243   :  { %1642 = vmatpush.bf16.msrb.mxu0 %v4739_v44  ;;  %1655 = vmatpush.bf16.msrb.mxu1 %v4804_v5 }
 0x244   :  { %1668 = vmatpush.bf16.msrb.mxu2 %v4808_v14  ;;  %1681 = vmatpush.bf16.msra.mxu3 %v4800_v13 }
 0x247   :  { %1643 = vmatpush.bf16.msrb.mxu0 %v4742_v58  ;;  %1656 = vmatpush.bf16.msrb.mxu1 %v4827_v26 }
 0x248   :  { %1669 = vmatpush.bf16.msrb.mxu2 %v4830_v30  ;;  %1682 = vmatpush.bf16.msra.mxu3 %v4811_v15 }
 0x24b   :  { %1644 = vmatpush.bf16.msrb.mxu0 %v4751_v9  ;;  %1657 = vmatpush.bf16.msrb.mxu1 %v4835_v36 }
 0x24c   :  { %1670 = vmatpush.bf16.msrb.mxu2 %v4852_v46  ;;  %1683 = vmatpush.bf16.msra.mxu3 %v4817_v12 }
 0x24f   :  { %1645 = vmatpush.bf16.msrb.mxu0 %v4758_v25  ;;  %1658 = vmatpush.bf16.msrb.mxu1 %v4855_v48 }
 0x250   :  { %1671 = vmatpush.bf16.msrb.mxu2 %v4862_v20  ;;  %1684 = vmatpush.bf16.msra.mxu3 %v4823_v21 }
 0x253   :  { %1646 = vmatpush.bf16.msrb.mxu0 %v4761_v41  ;;  %1659 = vmatpush.bf16.msrb.mxu1 %v4864_v56 }
 0x254   :  { %1672 = vmatpush.bf16.msrb.mxu2 %v4872_v0  ;;  %1685 = vmatpush.bf16.msra.mxu3 %v4832_v31 }
 0x257   :  { %1647 = vmatpush.bf16.msrb.mxu0 %v4764_v53  ;;  %1660 = vmatpush.bf16.msrb.mxu1 %v4875_v4 }
 0x258   :  { %1673 = vmatpush.bf16.msrb.mxu2 %v4881_v6  ;;  %1686 = vmatpush.bf16.msra.mxu3 %v4840_v38 }
 0x25b   :  { %1648 = vmatpush.bf16.msrb.mxu0 %v4769_v7  ;;  %1661 = vmatpush.bf16.msrb.mxu1 %v4883_v17 }
 0x25c   :  { %1674 = vmatpush.bf16.msrb.mxu2 %v4888_v22  ;;  %1687 = vmatpush.bf16.msra.mxu3 %v4845_v42 }
 0x2ba   :  { %v1400_v29 = vpop.f32.mrf.mxu0  ;;  %v1413_v8 = vpop.f32.mrf.mxu1 }
 0x2bb   :  { %v1443_v60 = vadd.f32 %v1400_v29, %v4937_v47  ;;  %v1444_v24 = vadd.f32 %v1413_v8, %v5005_v19 }
 0x2bd   :  { %v3758_v23 = vmul.f32 -1.442695, %v1443_v60  ;;  %v3759_v27 = vmul.f32 -1.442695, %v1444_v24 }
 0x2bf   :  { %4173 = vpow2.f32 %v3758_v23 }
 0x2c0   :  { %4175 = vpow2.f32 %v3759_v27 }
 0x2c1   :  { %v1426_v39 = vpop.f32.mrf.mxu2  ;;  %v1439_v18 = vpop.f32.mrf.mxu3 }
 0x2c2   :  { %v1445_v52 = vadd.f32 %v1426_v39, %v5808_v63  ;;  %v1402_v59 = vpop.f32.mrf.mxu0  ;;  %v1415_v43 = vpop.f32.mrf.mxu1  ;;  %v1446_v3 = vadd.f32 %v1439_v18, %v5809_v2 }
 0x2c4   :  { %v3760_v11 = vmul.f32 -1.442695, %v1445_v52 }
 0x2c5   :  { %v4174_v55 = vpop.eup %4173 }
 0x2c6   :  { %v4176_v34 = vpop.eup %4175  ;;  %v1456_v62 = vadd.f32 1.0, %v4174_v55  ;;  %4177 = vpow2.f32 %v3760_v11 }
 0x2c7   :  { %v1457_v37 = vadd.f32 1.0, %v4176_v34 }
 0x2c8   :  { %4179 = vrcp.f32 %v1456_v62  ;;  %v1470_v60 = vand.u32 2147483648, %v1456_v62  ;;  %v1468_v27 = vand.u32 2147483647, %v1456_v62  ;;  %vm1464_vm10 = vweird.f32 %v1456_v62 }
 0x2c9   :  { %4181 = vrcp.f32 %v1457_v37  ;;  %v1428_v47 = vpop.f32.mrf.mxu2  ;;  %v1441_v19 = vpop.f32.mrf.mxu3  ;;  %v1485_v24 = vand.u32 2147483648, %v1457_v37  ;;  %v1483_v63 = vand.u32 2147483647, %v1457_v37  ;;  %vm1479_vm11 = vweird.f32 %v1457_v37 }
 0x2ca   :  { %v1471_v43 = vor.u32 1.1754944e-38, %v1470_v60  ;;  %vm1469_vm14 = vcmp.eq.f32.partialorder %v1468_v27, 8.507059e+37 }
 0x2cb   :  { %v1486_v55 = vor.u32 1.1754944e-38, %v1485_v24  ;;  %vm1484_vm15 = vcmp.eq.f32.partialorder %v1483_v63, 8.507059e+37  ;;  %v5811_v63 = vld [vmem:[#allocation45_spill] sm:$0xff] }
 0x2cc   :  { %v4178_v49 = vpop.eup %4177 }
 0x2cd   :  { %v1458_v61 = vadd.f32 1.0, %v4178_v49 }
 0x2ce   :  { %v4180_v10 = vpop.eup %4179 }
 0x2cf   :  { %v4182_v35 = vpop.eup %4181  ;;  %v1460_v16 = vmul.f32 %v4180_v10, %v1456_v62  ;;  %4183 = vrcp.f32 %v1458_v61  ;;  %vm1465_vm8 = vweird.f32 %v4180_v10  ;;  %vm1494_vm1 = vweird.f32 %v1458_v61 }
 0x2d0   :  { %v1475_v40 = vmul.f32 %v4182_v35, %v1457_v37  ;;  %4185 = vtanh.f32 %v1446_v3  ;;  %vm1480_vm9 = vweird.f32 %v4182_v35  ;;  %vm1466_vm12 = vmor %vm1464_vm10, %vm1465_vm8 }
 0x2d1   :  { %v1461_v29 = vsub.f32 1.0, %v1460_v16  ;;  %vm1481_vm13 = vmor %vm1479_vm11, %vm1480_vm9 }
 0x2d2   :  { %v1476_v8 = vsub.f32 1.0, %v1475_v40 }
 0x2d3   :  { %v1462_v23 = vmul.f32 %v4180_v10, %v1461_v29 }
 0x2d4   :  { %v1477_v39 = vmul.f32 %v4182_v35, %v1476_v8  ;;  %v1500_v8 = vand.u32 2147483648, %v1458_v61 }
 0x2d5   :  { %v4184_v52 = vpop.eup %4183  ;;  %v1463_v59 = vadd.f32 %v4180_v10, %v1462_v23 }
 0x2d6   :  { %v1490_v18 = vmul.f32 %v4184_v52, %v1458_v61  ;;  %v1478_v11 = vadd.f32 %v4182_v35, %v1477_v39  ;;  %v4186_v47 = vpop.eup %4185  ;;  %vm1495_vm0 = vweird.f32 %v4184_v52  ;;  %v1501_v24 = vor.u32 1.1754944e-38, %v1500_v8 }
 0x2d7   :  { %v1467_v34 = vsel %vm1466_vm12, %v4180_v10, %v1463_v59  ;;  %v1498_v10 = vand.u32 2147483647, %v1458_v61  ;;  %vm1496_vm2 = vmor %vm1494_vm1, %vm1495_vm0 }
 0x2d8   :  { %v1491_v19 = vsub.f32 1.0, %v1490_v18  ;;  %v1472_v49 = vsel %vm1469_vm14, %v1471_v43, %v1467_v34  ;;  %v1482_v2 = vsel %vm1481_vm13, %v4182_v35, %v1478_v11 }
 0x2d9   :  { %v1487_v3 = vsel %vm1484_vm15, %v1486_v55, %v1482_v2  ;;  %v1506_v16 = vmul.f32 %v4186_v47, %v1472_v49  ;;  %vm1499_vm3 = vcmp.eq.f32.partialorder %v1498_v10, 8.507059e+37  ;;  %v5812_v47 = vld [vmem:[#allocation46_spill] sm:$0xff] }
 0x2da   :  { %v1505_v40 = vmul.f32 %v1487_v3, %v5165_v45  ;;  %v1492_v29 = vmul.f32 %v4184_v52, %v1491_v19  ;;  %v5810_v45 = vld [vmem:[#allocation34_spill] sm:$0xff]  ;;  %v533_v19 = vadd.f32 %v5812_v47, %v5013_v33 }
 0x2db   :  { %v475_v61 = vadd.f32 %v5810_v45, %v4904_v28 }
 0x2dc   :  { %v5205_v62 = vadd.f32 %v1506_v16, %v1505_v40  ;;  %v1493_v37 = vadd.f32 %v4184_v52, %v1492_v29 }
 0x2de   :  { %4187 = vtanh.f32 %v5205_v62  ;;  %v1497_v60 = vsel %vm1496_vm2, %v4184_v52, %v1493_v37  ;;  %v504_v52 = vadd.f32 %v5811_v63, %v4998_v54 }
 0x2df   :  { %v1502_v23 = vsel %vm1499_vm3, %v1501_v24, %v1497_v60 }
 0x2e4   :  { %v4188_v35 = vpop.eup %4187 }
 0x2e5   :  { %v1509_v27 = vmul.f32 %v4188_v35, %v1502_v23 }
 0x2e7   :  { %v1510_v39 = vpack.c.bf16 %v1509_v27, %v1509_v27  ;;  %v5813_v27 = vld [vmem:[#allocation37_spill] sm:$0xff] }
 0x2e9   :  { %1524 = vmatmul.bf16.vlgmr.msra.gmra.mxu0 %v1510_v39  ;;  %1537 = vmatmul.bf16.vlgmr.msra.gmra.mxu1 %v1510_v39 }
 0x2ea   :  { %1550 = vmatmul.bf16.vlgmr.msra.gmra.mxu2 %v1510_v39  ;;  %1563 = vmatmul.bf16.vlgmr.msrb.gmra.mxu3 %v1510_v39  ;;  %v562_v39 = vadd.f32 %v5813_v27, %v4949_v50 }
 0x2eb   :  { %1766 = vmatpush.bf16.msra.mxu0 %v4736_v32  ;;  %1779 = vmatpush.bf16.msra.mxu1 %v4795_v57 }
 0x2ec   :  { %1792 = vmatpush.bf16.msra.mxu2 %v4798_v1  ;;  %1805 = vmatpush.bf16.msrb.mxu3 %v4791_v51 }
 0x2ef   :  { %1767 = vmatpush.bf16.msra.mxu0 %v4739_v44  ;;  %1780 = vmatpush.bf16.msra.mxu1 %v4804_v5 }
 0x2f0   :  { %1793 = vmatpush.bf16.msra.mxu2 %v4808_v14  ;;  %1806 = vmatpush.bf16.msrb.mxu3 %v4800_v13 }
 0x2f3   :  { %1768 = vmatpush.bf16.msra.mxu0 %v4742_v58  ;;  %1781 = vmatpush.bf16.msra.mxu1 %v4827_v26 }
 0x2f4   :  { %1794 = vmatpush.bf16.msra.mxu2 %v4830_v30  ;;  %1807 = vmatpush.bf16.msrb.mxu3 %v4811_v15 }
 0x2f7   :  { %1769 = vmatpush.bf16.msra.mxu0 %v4751_v9  ;;  %1782 = vmatpush.bf16.msra.mxu1 %v4835_v36 }
 0x2f8   :  { %1795 = vmatpush.bf16.msra.mxu2 %v4852_v46  ;;  %1808 = vmatpush.bf16.msrb.mxu3 %v4817_v12 }
 0x2fb   :  { %1770 = vmatpush.bf16.msra.mxu0 %v4758_v25  ;;  %1783 = vmatpush.bf16.msra.mxu1 %v4855_v48 }
 0x2fc   :  { %1796 = vmatpush.bf16.msra.mxu2 %v4862_v20  ;;  %1809 = vmatpush.bf16.msrb.mxu3 %v4823_v21 }
 0x2ff   :  { %1771 = vmatpush.bf16.msra.mxu0 %v4761_v41  ;;  %1784 = vmatpush.bf16.msra.mxu1 %v4864_v56 }
 0x300   :  { %1797 = vmatpush.bf16.msra.mxu2 %v4872_v0  ;;  %1810 = vmatpush.bf16.msrb.mxu3 %v4832_v31 }
 0x303   :  { %1772 = vmatpush.bf16.msra.mxu0 %v4764_v53  ;;  %1785 = vmatpush.bf16.msra.mxu1 %v4875_v4 }
 0x304   :  { %1798 = vmatpush.bf16.msra.mxu2 %v4881_v6  ;;  %1811 = vmatpush.bf16.msrb.mxu3 %v4840_v38 }
 0x307   :  { %1773 = vmatpush.bf16.msra.mxu0 %v4769_v7  ;;  %1786 = vmatpush.bf16.msra.mxu1 %v4883_v17 }
 0x308   :  { %1799 = vmatpush.bf16.msra.mxu2 %v4888_v22  ;;  %1812 = vmatpush.bf16.msrb.mxu3 %v4845_v42 }
 0x366   :  { %v1525_v59 = vpop.f32.mrf.mxu0  ;;  %v1538_v18 = vpop.f32.mrf.mxu1 }
 0x367   :  { %v1568_v43 = vadd.f32 %v1525_v59, %v475_v61  ;;  %v1569_v11 = vadd.f32 %v1538_v18, %v504_v52 }
 0x369   :  { %v3761_v55 = vmul.f32 -1.442695, %v1568_v43  ;;  %v3762_v34 = vmul.f32 -1.442695, %v1569_v11 }
 0x36b   :  { %4189 = vpow2.f32 %v3761_v55 }
 0x36c   :  { %4191 = vpow2.f32 %v3762_v34 }
 0x36d   :  { %v1551_v49 = vpop.f32.mrf.mxu2  ;;  %v1564_v2 = vpop.f32.mrf.mxu3 }
 0x36e   :  { %v1570_v3 = vadd.f32 %v1551_v49, %v533_v19  ;;  %v1527_v16 = vpop.f32.mrf.mxu0  ;;  %v1540_v40 = vpop.f32.mrf.mxu1  ;;  %v1571_v63 = vadd.f32 %v1564_v2, %v562_v39 }
 0x370   :  { %v3763_v29 = vmul.f32 -1.442695, %v1570_v3 }
 0x371   :  { %v4190_v37 = vpop.eup %4189 }
 0x372   :  { %v4192_v8 = vpop.eup %4191  ;;  %v1581_v10 = vadd.f32 1.0, %v4190_v37  ;;  %4193 = vpow2.f32 %v3763_v29 }
 0x373   :  { %v1582_v60 = vadd.f32 1.0, %v4192_v8 }
 0x374   :  { %4195 = vrcp.f32 %v1581_v10  ;;  %v1595_v55 = vand.u32 2147483648, %v1581_v10  ;;  %v1593_v19 = vand.u32 2147483647, %v1581_v10  ;;  %vm1589_vm6 = vweird.f32 %v1581_v10 }
 0x375   :  { %4197 = vrcp.f32 %v1582_v60  ;;  %v1553_v24 = vpop.f32.mrf.mxu2  ;;  %v1566_v35 = vpop.f32.mrf.mxu3  ;;  %v1610_v34 = vand.u32 2147483648, %v1582_v60  ;;  %v1608_v3 = vand.u32 2147483647, %v1582_v60  ;;  %vm1604_vm7 = vweird.f32 %v1582_v60 }
 0x376   :  { %v1596_v29 = vor.u32 1.1754944e-38, %v1595_v55  ;;  %vm1594_vm10 = vcmp.eq.f32.partialorder %v1593_v19, 8.507059e+37 }
 0x377   :  { %v1611_v8 = vor.u32 1.1754944e-38, %v1610_v34  ;;  %vm1609_vm11 = vcmp.eq.f32.partialorder %v1608_v3, 8.507059e+37  ;;  %v5814_v3 = vld [vmem:[#allocation27_spill] sm:$0xff] }
 0x378   :  { %v4194_v23 = vpop.eup %4193 }
 0x379   :  { %v1583_v45 = vadd.f32 1.0, %v4194_v23 }
 0x37a   :  { %v4196_v61 = vpop.eup %4195 }
 0x37b   :  { %v4198_v52 = vpop.eup %4197  ;;  %v1585_v59 = vmul.f32 %v4196_v61, %v1581_v10  ;;  %4199 = vrcp.f32 %v1583_v45  ;;  %vm1590_vm4 = vweird.f32 %v4196_v61  ;;  %vm1619_vm13 = vweird.f32 %v1583_v45 }
 0x37c   :  { %v1600_v18 = vmul.f32 %v4198_v52, %v1582_v60  ;;  %4201 = vtanh.f32 %v1571_v63  ;;  %vm1605_vm5 = vweird.f32 %v4198_v52  ;;  %vm1591_vm8 = vmor %vm1589_vm6, %vm1590_vm4 }
 0x37d   :  { %v1586_v43 = vsub.f32 1.0, %v1585_v59  ;;  %vm1606_vm9 = vmor %vm1604_vm7, %vm1605_vm5 }
 0x37e   :  { %v1601_v11 = vsub.f32 1.0, %v1600_v18 }
 0x37f   :  { %v1587_v47 = vmul.f32 %v4196_v61, %v1586_v43 }
 0x380   :  { %v1602_v49 = vmul.f32 %v4198_v52, %v1601_v11  ;;  %v1625_v11 = vand.u32 2147483648, %v1583_v45 }
 0x381   :  { %v4200_v16 = vpop.eup %4199  ;;  %v1588_v40 = vadd.f32 %v4196_v61, %v1587_v47 }
 0x382   :  { %v1615_v2 = vmul.f32 %v4200_v16, %v1583_v45  ;;  %v1603_v37 = vadd.f32 %v4198_v52, %v1602_v49  ;;  %v4202_v35 = vpop.eup %4201  ;;  %vm1620_vm12 = vweird.f32 %v4200_v16  ;;  %v1626_v34 = vor.u32 1.1754944e-38, %v1625_v11 }
 0x383   :  { %v1592_v24 = vsel %vm1591_vm8, %v4196_v61, %v1588_v40  ;;  %v1623_v61 = vand.u32 2147483647, %v1583_v45  ;;  %vm1621_vm14 = vmor %vm1619_vm13, %vm1620_vm12  ;;  %v5815_v40 = vld [vmem:[#allocation48_spill] sm:$0xff] }
 0x384   :  { %v1616_v23 = vsub.f32 1.0, %v1615_v2  ;;  %v1597_v27 = vsel %vm1594_vm10, %v1596_v29, %v1592_v24  ;;  %v1607_v39 = vsel %vm1606_vm9, %v4198_v52, %v1603_v37 }
 0x385   :  { %v1612_v63 = vsel %vm1609_vm11, %v1611_v8, %v1607_v39  ;;  %v1631_v59 = vmul.f32 %v4202_v35, %v1597_v27  ;;  %vm1624_vm15 = vcmp.eq.f32.partialorder %v1623_v61, 8.507059e+37  ;;  %v5816_v35 = vld [vmem:[#allocation49_spill] sm:$0xff] }
 0x386   :  { %v1630_v18 = vmul.f32 %v1612_v63, %v5205_v62  ;;  %v1617_v43 = vmul.f32 %v4200_v16, %v1616_v23 }
 0x388   :  { %v5249_v10 = vadd.f32 %v1631_v59, %v1630_v18  ;;  %v1618_v60 = vadd.f32 %v4200_v16, %v1617_v43 }
 0x38a   :  { %4203 = vtanh.f32 %v5249_v10  ;;  %v1622_v55 = vsel %vm1621_vm14, %v4200_v16, %v1618_v60 }
 0x38b   :  { %v1627_v47 = vsel %vm1624_vm15, %v1626_v34, %v1622_v55 }
 0x390   :  { %v4204_v52 = vpop.eup %4203 }
 0x391   :  { %v1634_v19 = vmul.f32 %v4204_v52, %v1627_v47  ;;  %v5817_v47 = vld [vmem:[#allocation39_spill] sm:$0xff] }
 0x393   :  { %v1635_v49 = vpack.c.bf16 %v1634_v19, %v1634_v19 }
 0x395   :  { %1649 = vmatmul.bf16.vlgmr.msrb.gmra.mxu0 %v1635_v49  ;;  %1662 = vmatmul.bf16.vlgmr.msrb.gmra.mxu1 %v1635_v49 }
 0x396   :  { %1675 = vmatmul.bf16.vlgmr.msrb.gmra.mxu2 %v1635_v49  ;;  %1688 = vmatmul.bf16.vlgmr.msra.gmra.mxu3 %v1635_v49 }
 0x397   :  { %1891 = vmatpush.bf16.msrb.mxu0 %v4736_v32  ;;  %1904 = vmatpush.bf16.msrb.mxu1 %v4795_v57 }
 0x398   :  { %1917 = vmatpush.bf16.msrb.mxu2 %v4798_v1  ;;  %1930 = vmatpush.bf16.msra.mxu3 %v4791_v51 }
 0x39b   :  { %1892 = vmatpush.bf16.msrb.mxu0 %v4739_v44  ;;  %1905 = vmatpush.bf16.msrb.mxu1 %v4804_v5 }
 0x39c   :  { %1918 = vmatpush.bf16.msrb.mxu2 %v4808_v14  ;;  %1931 = vmatpush.bf16.msra.mxu3 %v4800_v13 }
 0x39f   :  { %1893 = vmatpush.bf16.msrb.mxu0 %v4742_v58  ;;  %1906 = vmatpush.bf16.msrb.mxu1 %v4827_v26 }
 0x3a0   :  { %1919 = vmatpush.bf16.msrb.mxu2 %v4830_v30  ;;  %1932 = vmatpush.bf16.msra.mxu3 %v4811_v15 }
 0x3a3   :  { %1894 = vmatpush.bf16.msrb.mxu0 %v4751_v9  ;;  %1907 = vmatpush.bf16.msrb.mxu1 %v4835_v36 }
 0x3a4   :  { %1920 = vmatpush.bf16.msrb.mxu2 %v4852_v46  ;;  %1933 = vmatpush.bf16.msra.mxu3 %v4817_v12 }
 0x3a7   :  { %1895 = vmatpush.bf16.msrb.mxu0 %v4758_v25  ;;  %1908 = vmatpush.bf16.msrb.mxu1 %v4855_v48 }
 0x3a8   :  { %1921 = vmatpush.bf16.msrb.mxu2 %v4862_v20  ;;  %1934 = vmatpush.bf16.msra.mxu3 %v4823_v21 }
 0x3ab   :  { %1896 = vmatpush.bf16.msrb.mxu0 %v4761_v41  ;;  %1909 = vmatpush.bf16.msrb.mxu1 %v4864_v56 }
 0x3ac   :  { %1922 = vmatpush.bf16.msrb.mxu2 %v4872_v0  ;;  %1935 = vmatpush.bf16.msra.mxu3 %v4832_v31 }
 0x3af   :  { %1897 = vmatpush.bf16.msrb.mxu0 %v4764_v53  ;;  %1910 = vmatpush.bf16.msrb.mxu1 %v4875_v4 }
 0x3b0   :  { %1923 = vmatpush.bf16.msrb.mxu2 %v4881_v6  ;;  %1936 = vmatpush.bf16.msra.mxu3 %v4840_v38 }
 0x3b3   :  { %1898 = vmatpush.bf16.msrb.mxu0 %v4769_v7  ;;  %1911 = vmatpush.bf16.msrb.mxu1 %v4883_v17 }
 0x3b4   :  { %1924 = vmatpush.bf16.msrb.mxu2 %v4888_v22  ;;  %1937 = vmatpush.bf16.msra.mxu3 %v4845_v42 }
 0x412   :  { %v1650_v62 = vpop.f32.mrf.mxu0  ;;  %v1663_v45 = vpop.f32.mrf.mxu1 }
 0x413   :  { %v1693_v16 = vadd.f32 %v1650_v62, %v5814_v3  ;;  %v1694_v2 = vadd.f32 %v1663_v45, %v5815_v40 }
 0x415   :  { %v3764_v29 = vmul.f32 -1.442695, %v1693_v16  ;;  %v3765_v37 = vmul.f32 -1.442695, %v1694_v2 }
 0x417   :  { %4205 = vpow2.f32 %v3764_v29 }
 0x418   :  { %4207 = vpow2.f32 %v3765_v37 }
 0x419   :  { %v1676_v8 = vpop.f32.mrf.mxu2  ;;  %v1689_v24 = vpop.f32.mrf.mxu3 }
 0x41a   :  { %v1695_v23 = vadd.f32 %v1676_v8, %v5816_v35  ;;  %v1652_v27 = vpop.f32.mrf.mxu0  ;;  %v1665_v39 = vpop.f32.mrf.mxu1  ;;  %v1696_v19 = vadd.f32 %v1689_v24, %v5817_v47 }
 0x41c   :  { %v3766_v63 = vmul.f32 -1.442695, %v1695_v23 }
 0x41d   :  { %v4206_v59 = vpop.eup %4205 }
 0x41e   :  { %v4208_v18 = vpop.eup %4207  ;;  %v1706_v43 = vadd.f32 1.0, %v4206_v59  ;;  %4209 = vpow2.f32 %v3766_v63 }
 0x41f   :  { %v1707_v60 = vadd.f32 1.0, %v4208_v18 }
 0x420   :  { %4211 = vrcp.f32 %v1706_v43  ;;  %v1720_v40 = vand.u32 2147483648, %v1706_v43  ;;  %v1718_v37 = vand.u32 2147483647, %v1706_v43  ;;  %vm1714_vm2 = vweird.f32 %v1706_v43 }
 0x421   :  { %4213 = vrcp.f32 %v1707_v60  ;;  %v1678_v11 = vpop.f32.mrf.mxu2  ;;  %v1691_v61 = vpop.f32.mrf.mxu3  ;;  %v1735_v2 = vand.u32 2147483648, %v1707_v60  ;;  %v1733_v35 = vand.u32 2147483647, %v1707_v60  ;;  %vm1729_vm3 = vweird.f32 %v1707_v60 }
 0x422   :  { %v1721_v39 = vor.u32 1.1754944e-38, %v1720_v40  ;;  %vm1719_vm6 = vcmp.eq.f32.partialorder %v1718_v37, 8.507059e+37 }
 0x423   :  { %v1736_v59 = vor.u32 1.1754944e-38, %v1735_v2  ;;  %vm1734_vm7 = vcmp.eq.f32.partialorder %v1733_v35, 8.507059e+37 }
 0x424   :  { %v4210_v55 = vpop.eup %4209 }
 0x425   :  { %v1708_v34 = vadd.f32 1.0, %v4210_v55 }
 0x426   :  { %v4212_v52 = vpop.eup %4211 }
 0x427   :  { %v4214_v49 = vpop.eup %4213  ;;  %v1710_v62 = vmul.f32 %v4212_v52, %v1706_v43  ;;  %4215 = vrcp.f32 %v1708_v34  ;;  %vm1715_vm0 = vweird.f32 %v4212_v52  ;;  %vm1744_vm9 = vweird.f32 %v1708_v34 }
 0x428   :  { %v1725_v45 = vmul.f32 %v4214_v49, %v1707_v60  ;;  %4217 = vtanh.f32 %v1696_v19  ;;  %vm1730_vm1 = vweird.f32 %v4214_v49  ;;  %vm1716_vm4 = vmor %vm1714_vm2, %vm1715_vm0 }
 0x429   :  { %v1711_v3 = vsub.f32 1.0, %v1710_v62  ;;  %vm1731_vm5 = vmor %vm1729_vm3, %vm1730_vm1 }
 0x42a   :  { %v1726_v16 = vsub.f32 1.0, %v1725_v45 }
 0x42b   :  { %v1712_v29 = vmul.f32 %v4212_v52, %v1711_v3 }
 0x42c   :  { %v1727_v8 = vmul.f32 %v4214_v49, %v1726_v16  ;;  %v1750_v16 = vand.u32 2147483648, %v1708_v34 }
 0x42d   :  { %v4216_v23 = vpop.eup %4215  ;;  %v1713_v27 = vadd.f32 %v4212_v52, %v1712_v29 }
 0x42e   :  { %v1740_v24 = vmul.f32 %v4216_v23, %v1708_v34  ;;  %v1728_v63 = vadd.f32 %v4214_v49, %v1727_v8  ;;  %v4218_v11 = vpop.eup %4217  ;;  %vm1745_vm8 = vweird.f32 %v4216_v23  ;;  %v1751_v2 = vor.u32 1.1754944e-38, %v1750_v16 }
 0x42f   :  { %v1717_v18 = vsel %vm1716_vm4, %v4212_v52, %v1713_v27  ;;  %v1748_v52 = vand.u32 2147483647, %v1708_v34  ;;  %vm1746_vm10 = vmor %vm1744_vm9, %vm1745_vm8 }
 0x430   :  { %v1741_v61 = vsub.f32 1.0, %v1740_v24  ;;  %v1722_v55 = vsel %vm1719_vm6, %v1721_v39, %v1717_v18  ;;  %v1732_v47 = vsel %vm1731_vm5, %v4214_v49, %v1728_v63 }
 0x431   :  { %v1737_v19 = vsel %vm1734_vm7, %v1736_v59, %v1732_v47  ;;  %v1756_v62 = vmul.f32 %v4218_v11, %v1722_v55  ;;  %vm1749_vm11 = vcmp.eq.f32.partialorder %v1748_v52, 8.507059e+37 }
 0x432   :  { %v1755_v45 = vmul.f32 %v1737_v19, %v5249_v10  ;;  %v1742_v3 = vmul.f32 %v4216_v23, %v1741_v61 }
 0x434   :  { %v5289_v43 = vadd.f32 %v1756_v62, %v1755_v45  ;;  %v1743_v60 = vadd.f32 %v4216_v23, %v1742_v3 }
 0x436   :  { %4219 = vtanh.f32 %v5289_v43  ;;  %v1747_v40 = vsel %vm1746_vm10, %v4216_v23, %v1743_v60 }
 0x437   :  { %v1752_v29 = vsel %vm1749_vm11, %v1751_v2, %v1747_v40 }
 0x43c   :  { %v4220_v49 = vpop.eup %4219 }
 0x43d   :  { %v1759_v37 = vmul.f32 %v4220_v49, %v1752_v29 }
 0x43f   :  { %v1760_v8 = vpack.c.bf16 %v1759_v37, %v1759_v37 }
 0x441   :  { %1774 = vmatmul.bf16.vlgmr.msra.gmra.mxu0 %v1760_v8  ;;  %1787 = vmatmul.bf16.vlgmr.msra.gmra.mxu1 %v1760_v8 }
 0x442   :  { %1800 = vmatmul.bf16.vlgmr.msra.gmra.mxu2 %v1760_v8  ;;  %1813 = vmatmul.bf16.vlgmr.msrb.gmra.mxu3 %v1760_v8 }
 0x443   :  { %2016 = vmatpush.bf16.msra.mxu0 %v4736_v32  ;;  %2029 = vmatpush.bf16.msra.mxu1 %v4795_v57  ;;  %v5818_v32 = vld [vmem:[#allocation29_spill] sm:$0xff] }
 0x444   :  { %2042 = vmatpush.bf16.msra.mxu2 %v4798_v1  ;;  %2055 = vmatpush.bf16.msrb.mxu3 %v4791_v51 }
 0x447   :  { %2017 = vmatpush.bf16.msra.mxu0 %v4739_v44  ;;  %2030 = vmatpush.bf16.msra.mxu1 %v4804_v5  ;;  %v480_v44 = vadd.f32 %v5818_v32, %v4904_v28 }
 0x448   :  { %2043 = vmatpush.bf16.msra.mxu2 %v4808_v14  ;;  %2056 = vmatpush.bf16.msrb.mxu3 %v4800_v13 }
 0x44b   :  { %2018 = vmatpush.bf16.msra.mxu0 %v4742_v58  ;;  %2031 = vmatpush.bf16.msra.mxu1 %v4827_v26  ;;  %v5819_v58 = vld [vmem:[#allocation51_spill] sm:$0xff] }
 0x44c   :  { %2044 = vmatpush.bf16.msra.mxu2 %v4830_v30  ;;  %2057 = vmatpush.bf16.msrb.mxu3 %v4811_v15 }
 0x44f   :  { %2019 = vmatpush.bf16.msra.mxu0 %v4751_v9  ;;  %2032 = vmatpush.bf16.msra.mxu1 %v4835_v36  ;;  %v509_v9 = vadd.f32 %v5819_v58, %v4998_v54 }
 0x450   :  { %2045 = vmatpush.bf16.msra.mxu2 %v4852_v46  ;;  %2058 = vmatpush.bf16.msrb.mxu3 %v4817_v12 }
 0x453   :  { %2020 = vmatpush.bf16.msra.mxu0 %v4758_v25  ;;  %2033 = vmatpush.bf16.msra.mxu1 %v4855_v48 }
 0x454   :  { %2046 = vmatpush.bf16.msra.mxu2 %v4862_v20  ;;  %2059 = vmatpush.bf16.msrb.mxu3 %v4823_v21  ;;  %v5821_v20 = vld [vmem:[#allocation41_spill] sm:$0xff] }
 0x457   :  { %2021 = vmatpush.bf16.msra.mxu0 %v4761_v41  ;;  %2034 = vmatpush.bf16.msra.mxu1 %v4864_v56  ;;  %v567_v56 = vadd.f32 %v5821_v20, %v4949_v50 }
 0x458   :  { %2047 = vmatpush.bf16.msra.mxu2 %v4872_v0  ;;  %2060 = vmatpush.bf16.msrb.mxu3 %v4832_v31 }
 0x45b   :  { %2022 = vmatpush.bf16.msra.mxu0 %v4764_v53  ;;  %2035 = vmatpush.bf16.msra.mxu1 %v4875_v4 }
 0x45c   :  { %2048 = vmatpush.bf16.msra.mxu2 %v4881_v6  ;;  %2061 = vmatpush.bf16.msrb.mxu3 %v4840_v38 }
 0x45f   :  { %2023 = vmatpush.bf16.msra.mxu0 %v4769_v7  ;;  %2036 = vmatpush.bf16.msra.mxu1 %v4883_v17  ;;  %v5820_v7 = vld [vmem:[#allocation52_spill] sm:$0xff] }
 0x460   :  { %2049 = vmatpush.bf16.msra.mxu2 %v4888_v22  ;;  %2062 = vmatpush.bf16.msrb.mxu3 %v4845_v42  ;;  %v538_v13 = vadd.f32 %v5820_v7, %v5013_v33  ;;  %v5823_v7 = vld [vmem:[#allocation54_spill] sm:$0xff] }
 0x4be   :  { %v1775_v25 = vpop.f32.mrf.mxu0  ;;  %v1788_v41 = vpop.f32.mrf.mxu1 }
 0x4bf   :  { %v1818_v53 = vadd.f32 %v1775_v25, %v480_v44  ;;  %v1819_v51 = vadd.f32 %v1788_v41, %v509_v9 }
 0x4c1   :  { %v3767_v57 = vmul.f32 -1.442695, %v1818_v53  ;;  %v3768_v1 = vmul.f32 -1.442695, %v1819_v51 }
 0x4c3   :  { %4221 = vpow2.f32 %v3767_v57  ;;  %v5822_v57 = vld [vmem:[#allocation32_spill] sm:$0xff] }
 0x4c4   :  { %4223 = vpow2.f32 %v3768_v1 }
 0x4c5   :  { %v1801_v5 = vpop.f32.mrf.mxu2  ;;  %v1814_v14 = vpop.f32.mrf.mxu3 }
 0x4c6   :  { %v1820_v15 = vadd.f32 %v1801_v5, %v538_v13  ;;  %v1777_v12 = vpop.f32.mrf.mxu0  ;;  %v1790_v21 = vpop.f32.mrf.mxu1  ;;  %v1821_v6 = vadd.f32 %v1814_v14, %v567_v56 }
 0x4c7   :  { %v5824_v21 = vld [vmem:[#allocation56_spill] sm:$0xff] }
 0x4c8   :  { %v3769_v26 = vmul.f32 -1.442695, %v1820_v15 }
 0x4c9   :  { %v4222_v30 = vpop.eup %4221 }
 0x4ca   :  { %v4224_v31 = vpop.eup %4223  ;;  %v1831_v36 = vadd.f32 1.0, %v4222_v30  ;;  %4225 = vpow2.f32 %v3769_v26 }
 0x4cb   :  { %v1832_v38 = vadd.f32 1.0, %v4224_v31 }
 0x4cc   :  { %4227 = vrcp.f32 %v1831_v36  ;;  %v1845_v23 = vand.u32 2147483648, %v1831_v36  ;;  %v1843_v39 = vand.u32 2147483647, %v1831_v36  ;;  %vm1839_vm14 = vweird.f32 %v1831_v36 }
 0x4cd   :  { %4229 = vrcp.f32 %v1832_v38  ;;  %v1803_v42 = vpop.f32.mrf.mxu2  ;;  %v1816_v46 = vpop.f32.mrf.mxu3  ;;  %v1860_v27 = vand.u32 2147483648, %v1832_v38  ;;  %v1858_v59 = vand.u32 2147483647, %v1832_v38  ;;  %vm1854_vm15 = vweird.f32 %v1832_v38 }
 0x4ce   :  { %v1846_v55 = vor.u32 1.1754944e-38, %v1845_v23  ;;  %vm1844_vm2 = vcmp.eq.f32.partialorder %v1843_v39, 8.507059e+37 }
 0x4cf   :  { %v1861_v19 = vor.u32 1.1754944e-38, %v1860_v27  ;;  %vm1859_vm3 = vcmp.eq.f32.partialorder %v1858_v59, 8.507059e+37 }
 0x4d0   :  { %v4226_v48 = vpop.eup %4225 }
 0x4d1   :  { %v1833_v0 = vadd.f32 1.0, %v4226_v48 }
 0x4d2   :  { %v4228_v4 = vpop.eup %4227 }
 0x4d3   :  { %v4230_v17 = vpop.eup %4229  ;;  %v1835_v22 = vmul.f32 %v4228_v4, %v1831_v36  ;;  %4231 = vrcp.f32 %v1833_v0  ;;  %vm1840_vm12 = vweird.f32 %v4228_v4  ;;  %v1875_v8 = vand.u32 2147483648, %v1833_v0 }
 0x4d4   :  { %v1850_v10 = vmul.f32 %v4230_v17, %v1832_v38  ;;  %4233 = vtanh.f32 %v1821_v6  ;;  %vm1855_vm13 = vweird.f32 %v4230_v17  ;;  %vm1841_vm0 = vmor %vm1839_vm14, %vm1840_vm12  ;;  %vm1869_vm5 = vweird.f32 %v1833_v0 }
 0x4d5   :  { %v1836_v34 = vsub.f32 1.0, %v1835_v22  ;;  %vm1856_vm1 = vmor %vm1854_vm15, %vm1855_vm13  ;;  %v1873_v32 = vand.u32 2147483647, %v1833_v0  ;;  %v1876_v58 = vor.u32 1.1754944e-38, %v1875_v8 }
 0x4d6   :  { %v1851_v35 = vsub.f32 1.0, %v1850_v10 }
 0x4d7   :  { %v1837_v24 = vmul.f32 %v4228_v4, %v1836_v34  ;;  %vm1874_vm7 = vcmp.eq.f32.partialorder %v1873_v32, 8.507059e+37 }
 0x4d8   :  { %v1852_v63 = vmul.f32 %v4230_v17, %v1851_v35 }
 0x4d9   :  { %v4232_v18 = vpop.eup %4231  ;;  %v1838_v11 = vadd.f32 %v4228_v4, %v1837_v24 }
 0x4da   :  { %v1865_v61 = vmul.f32 %v4232_v18, %v1833_v0  ;;  %v1853_v47 = vadd.f32 %v4230_v17, %v1852_v63  ;;  %v4234_v45 = vpop.eup %4233  ;;  %vm1870_vm4 = vweird.f32 %v4232_v18 }
 0x4db   :  { %v1842_v62 = vsel %vm1841_vm0, %v4228_v4, %v1838_v11  ;;  %vm1871_vm6 = vmor %vm1869_vm5, %vm1870_vm4 }
 0x4dc   :  { %v1866_v3 = vsub.f32 1.0, %v1865_v61  ;;  %v1847_v60 = vsel %vm1844_vm2, %v1846_v55, %v1842_v62  ;;  %v1857_v16 = vsel %vm1856_vm1, %v4230_v17, %v1853_v47  ;;  %v5825_v17 = vld [vmem:[#allocation44_spill] sm:$0xff] }
 0x4dd   :  { %v1862_v52 = vsel %vm1859_vm3, %v1861_v19, %v1857_v16  ;;  %v1881_v40 = vmul.f32 %v4234_v45, %v1847_v60 }
 0x4de   :  { %v1880_v2 = vmul.f32 %v1862_v52, %v5289_v43  ;;  %v1867_v49 = vmul.f32 %v4232_v18, %v1866_v3 }
 0x4e0   :  { %v5333_v29 = vadd.f32 %v1881_v40, %v1880_v2  ;;  %v1868_v37 = vadd.f32 %v4232_v18, %v1867_v49 }
 0x4e2   :  { %4235 = vtanh.f32 %v5333_v29  ;;  %v1872_v44 = vsel %vm1871_vm6, %v4232_v18, %v1868_v37 }
 0x4e3   :  { %v1877_v25 = vsel %vm1874_vm7, %v1876_v58, %v1872_v44 }
 0x4e8   :  { %v4236_v9 = vpop.eup %4235 }
 0x4e9   :  { %v1884_v41 = vmul.f32 %v4236_v9, %v1877_v25 }
 0x4eb   :  { %v1885_v53 = vpack.c.bf16 %v1884_v41, %v1884_v41 }
 0x4ed   :  { %1899 = vmatmul.bf16.vlgmr.msrb.gmra.mxu0 %v1885_v53  ;;  %1912 = vmatmul.bf16.vlgmr.msrb.gmra.mxu1 %v1885_v53 }
 0x4ee   :  { %1925 = vmatmul.bf16.vlgmr.msrb.gmra.mxu2 %v1885_v53  ;;  %1938 = vmatmul.bf16.vlgmr.msra.gmra.mxu3 %v1885_v53 }
 0x56a   :  { %v1900_v43 = vpop.f32.mrf.mxu0  ;;  %v1913_v51 = vpop.f32.mrf.mxu1 }
 0x56b   :  { %v1943_v1 = vadd.f32 %v1900_v43, %v5822_v57  ;;  %v1944_v13 = vadd.f32 %v1913_v51, %v5823_v7  ;;  %v4029_v7 = vld [vmem:[#allocation16 + $0xe4] sm:$0xf] }
 0x56d   :  { %v3770_v5 = vmul.f32 -1.442695, %v1943_v1  ;;  %v3771_v14 = vmul.f32 -1.442695, %v1944_v13  ;;  %v4031_v1 = vld [vmem:[#allocation16 + $0xec] sm:$0xf0] }
 0x56f   :  { %4237 = vpow2.f32 %v3770_v5  ;;  %v3892_v5 = vld [vmem:[#allocation16 + $0xf0] sm:$0xf0] }
 0x570   :  { %4239 = vpow2.f32 %v3771_v14  ;;  %v3898_v14 = vld [vmem:[#allocation16 + $0xe8] sm:$0xf] }
 0x571   :  { %v1926_v15 = vpop.f32.mrf.mxu2  ;;  %v1939_v12 = vpop.f32.mrf.mxu3 }
 0x572   :  { %v1945_v26 = vadd.f32 %v1926_v15, %v5824_v21  ;;  %v1902_v30 = vpop.f32.mrf.mxu0  ;;  %v1915_v31 = vpop.f32.mrf.mxu1  ;;  %v1946_v22 = vadd.f32 %v1939_v12, %v5825_v17  ;;  %v4032_v15 = vld [vmem:[#allocation16 + $0xf4] sm:$0xf0]  ;;  %v5346_v12 = vor.u32 %v4029_v7, %v3892_v5  ;;  %v3884_v17 = vld [vmem:[#allocation16 + $0xd8] sm:$0xf0] }
 0x573   :  { %v5348_v21 = vor.u32 %v4032_v15, %v3898_v14  ;;  %v3900_v30 = vld [vmem:[#allocation16 + $0xf8] sm:$0xf0]  ;;  %v4014_v14 = vld [vmem:[#allocation16 + $0x6c] sm:$0xf] }
 0x574   :  { %v3772_v36 = vmul.f32 -1.442695, %v1945_v26  ;;  %v4030_v26 = vld [vmem:[#allocation16 + $0xec] sm:$0xf]  ;;  %2313 = vmatpush.bf16.msrb.mxu1 %v5346_v12  ;;  %v3836_v15 = vld [vmem:[#allocation16 + $0x78] sm:$0xf0] }
 0x575   :  { %v4238_v38 = vpop.eup %4237  ;;  %v5351_v31 = vor.u32 %v4030_v26, %v3900_v30  ;;  %2326 = vmatpush.bf16.msrb.mxu2 %v5348_v21  ;;  %v3810_v30 = vld [vmem:[#allocation16 + $0x40] sm:$0xf] }
 0x576   :  { %v4240_v42 = vpop.eup %4239  ;;  %v1956_v46 = vadd.f32 1.0, %v4238_v38  ;;  %4241 = vpow2.f32 %v3772_v36  ;;  %v3874_v36 = vld [vmem:[#allocation16 + $0xc0] sm:$0xf]  ;;  %v4027_v38 = vld [vmem:[#allocation16 + $0xcc] sm:$0xf0] }
 0x577   :  { %v1957_v48 = vadd.f32 1.0, %v4240_v42  ;;  %v4025_v42 = vld [vmem:[#allocation16 + $0xc4] sm:$0xf]  ;;  %2339 = vmatpush.bf16.msra.mxu3 %v5351_v31 }
 0x578   :  { %4243 = vrcp.f32 %v1956_v46  ;;  %v1970_v24 = vand.u32 2147483648, %v1956_v46  ;;  %v1968_v59 = vand.u32 2147483647, %v1956_v46  ;;  %vm1964_vm10 = vweird.f32 %v1956_v46 }
 0x579   :  { %4245 = vrcp.f32 %v1957_v48  ;;  %v1928_v20 = vpop.f32.mrf.mxu2  ;;  %v1941_v56 = vpop.f32.mrf.mxu3  ;;  %v1985_v39 = vand.u32 2147483648, %v1957_v48  ;;  %v1983_v11 = vand.u32 2147483647, %v1957_v48  ;;  %vm1979_vm11 = vweird.f32 %v1957_v48 }
 0x57a   :  { %v1971_v19 = vor.u32 1.1754944e-38, %v1970_v24  ;;  %vm1969_vm14 = vcmp.eq.f32.partialorder %v1968_v59, 8.507059e+37  ;;  %v3882_v20 = vld [vmem:[#allocation16 + $0xc8] sm:$0xf]  ;;  %v4028_v56 = vld [vmem:[#allocation16 + $0xd4] sm:$0xf0] }
 0x57b   :  { %v1986_v45 = vor.u32 1.1754944e-38, %v1985_v39  ;;  %vm1984_vm15 = vcmp.eq.f32.partialorder %v1983_v11, 8.507059e+37  ;;  %v3866_v24 = vld [vmem:[#allocation16 + $0xa8] sm:$0xf]  ;;  %v4024_v39 = vld [vmem:[#allocation16 + $0xb4] sm:$0xf0] }
 0x57c   :  { %v4242_v0 = vpop.eup %4241  ;;  %v5372_v59 = vor.u32 %v4024_v39, %v3866_v24  ;;  %v3868_v11 = vld [vmem:[#allocation16 + $0xb8] sm:$0xf0]  ;;  %v3794_v24 = vld [vmem:[#allocation16 + $0x20] sm:$0xf]  ;;  %v4007_v39 = vld [vmem:[#allocation16 + $0x2c] sm:$0xf0] }
 0x57d   :  { %v1958_v4 = vadd.f32 1.0, %v4242_v0 }
 0x57e   :  { %v4244_v6 = vpop.eup %4243 }
 0x57f   :  { %v4246_v10 = vpop.eup %4245  ;;  %v1960_v34 = vmul.f32 %v4244_v6, %v1956_v46  ;;  %4247 = vrcp.f32 %v1958_v4  ;;  %vm1965_vm8 = vweird.f32 %v4244_v6  ;;  %v2000_v58 = vand.u32 2147483648, %v1958_v4 }
 0x580   :  { %v1975_v35 = vmul.f32 %v4246_v10, %v1957_v48  ;;  %4249 = vtanh.f32 %v1946_v22  ;;  %vm1980_vm9 = vweird.f32 %v4246_v10  ;;  %vm1966_vm12 = vmor %vm1964_vm10, %vm1965_vm8  ;;  %vm1994_vm1 = vweird.f32 %v1958_v4  ;;  %v3876_v48 = vld [vmem:[#allocation16 + $0xd0] sm:$0xf0] }
 0x581   :  { %v1961_v23 = vsub.f32 1.0, %v1960_v34  ;;  %vm1981_vm13 = vmor %vm1979_vm11, %vm1980_vm9  ;;  %v1998_v9 = vand.u32 2147483647, %v1958_v4  ;;  %v2001_v41 = vor.u32 1.1754944e-38, %v2000_v58  ;;  %v5356_v46 = vor.u32 %v4027_v38, %v3874_v36  ;;  %v4023_v34 = vld [vmem:[#allocation16 + $0xac] sm:$0xf0] }
 0x582   :  { %v1976_v27 = vsub.f32 1.0, %v1975_v35  ;;  %v5358_v0 = vor.u32 %v4025_v42, %v3876_v48  ;;  %v4021_v35 = vld [vmem:[#allocation16 + $0xa4] sm:$0xf]  ;;  %v5826_v58 = vld [vmem:[#allocation36_spill] sm:$0xff] }
 0x583   :  { %v1962_v63 = vmul.f32 %v4244_v6, %v1961_v23  ;;  %vm1999_vm3 = vcmp.eq.f32.partialorder %v1998_v9, 8.507059e+37  ;;  %v485_v9 = vadd.f32 %v5826_v58, %v4904_v28  ;;  %v4011_v36 = vld [vmem:[#allocation16 + $0x4c] sm:$0xf0]  ;;  %v4009_v38 = vld [vmem:[#allocation16 + $0x44] sm:$0xf] }
 0x584   :  { %v1977_v18 = vmul.f32 %v4246_v10, %v1976_v27  ;;  %2314 = vmatpush.bf16.msrb.mxu1 %v5358_v0  ;;  %v3860_v27 = vld [vmem:[#allocation16 + $0xb0] sm:$0xf0] }
 0x585   :  { %v4248_v61 = vpop.eup %4247  ;;  %v1963_v55 = vadd.f32 %v4244_v6, %v1962_v63  ;;  %v5370_v63 = vor.u32 %v4021_v35, %v3860_v27  ;;  %v3820_v27 = vld [vmem:[#allocation16 + $0x58] sm:$0xf0] }
 0x586   :  { %v1990_v47 = vmul.f32 %v4248_v61, %v1958_v4  ;;  %v1978_v62 = vadd.f32 %v4246_v10, %v1977_v18  ;;  %v4250_v60 = vpop.eup %4249  ;;  %vm1995_vm0 = vweird.f32 %v4248_v61  ;;  %v5360_v4 = vor.u32 %v4028_v56, %v3882_v20  ;;  %v4022_v18 = vld [vmem:[#allocation16 + $0xac] sm:$0xf]  ;;  %v3812_v56 = vld [vmem:[#allocation16 + $0x50] sm:$0xf0] }
 0x587   :  { %v1967_v3 = vsel %vm1966_vm12, %v4244_v6, %v1963_v55  ;;  %vm1996_vm2 = vmor %vm1994_vm1, %vm1995_vm0  ;;  %v4026_v6 = vld [vmem:[#allocation16 + $0xcc] sm:$0xf]  ;;  %v3842_v55 = vld [vmem:[#allocation16 + $0x80] sm:$0xf]  ;;  %v5408_v20 = vor.u32 %v4011_v36, %v3810_v30 }
 0x588   :  { %v1991_v16 = vsub.f32 1.0, %v1990_v47  ;;  %v1972_v52 = vsel %vm1969_vm14, %v1971_v19, %v1967_v3  ;;  %v1982_v40 = vsel %vm1981_vm13, %v4246_v10, %v1978_v62  ;;  %v5363_v22 = vor.u32 %v4026_v6, %v3884_v17  ;;  %2327 = vmatpush.bf16.msrb.mxu2 %v5360_v4  ;;  %v3858_v10 = vld [vmem:[#allocation16 + $0xa0] sm:$0xf]  ;;  %2315 = vmatpush.bf16.msrb.mxu1 %v5370_v63  ;;  %v4019_v47 = vld [vmem:[#allocation16 + $0x8c] sm:$0xf0] }
 0x589   :  { %v1987_v2 = vsel %vm1984_vm15, %v1986_v45, %v1982_v40  ;;  %v2006_v49 = vmul.f32 %v4250_v60, %v1972_v52  ;;  %v5368_v23 = vor.u32 %v4023_v34, %v3858_v10  ;;  %v4017_v19 = vld [vmem:[#allocation16 + $0x84] sm:$0xf]  ;;  %v5380_v62 = vor.u32 %v4019_v47, %v3842_v55  ;;  %v3844_v45 = vld [vmem:[#allocation16 + $0x90] sm:$0xf0]  ;;  %v3850_v3 = vld [vmem:[#allocation16 + $0x88] sm:$0xf] }
 0x58a   :  { %v2005_v37 = vmul.f32 %v1987_v2, %v5333_v29  ;;  %v1992_v8 = vmul.f32 %v4248_v61, %v1991_v16  ;;  %v3890_v29 = vld [vmem:[#allocation16 + $0xe0] sm:$0xf]  ;;  %2340 = vmatpush.bf16.msra.mxu3 %v5363_v22  ;;  %v4020_v60 = vld [vmem:[#allocation16 + $0x94] sm:$0xf0]  ;;  %v5382_v16 = vor.u32 %v4017_v19, %v3844_v45  ;;  %v4018_v40 = vld [vmem:[#allocation16 + $0x8c] sm:$0xf]  ;;  %v5410_v6 = vor.u32 %v4009_v38, %v3812_v56 }
 0x58b   :  { %v5344_v13 = vor.u32 %v4031_v1, %v3890_v29  ;;  %v5384_v52 = vor.u32 %v4020_v60, %v3850_v3  ;;  %v3852_v2 = vld [vmem:[#allocation16 + $0x98] sm:$0xf0]  ;;  %v3818_v17 = vld [vmem:[#allocation16 + $0x48] sm:$0xf]  ;;  %v4012_v10 = vld [vmem:[#allocation16 + $0x54] sm:$0xf0]  ;;  %v5420_v47 = vor.u32 %v4007_v39, %v3794_v24 }
 0x58c   :  { %v5341_v32 = vadd.f32 %v2006_v49, %v2005_v37  ;;  %v1993_v44 = vadd.f32 %v4248_v61, %v1992_v8  ;;  %2328 = vmatpush.bf16.msrb.mxu2 %v5372_v59  ;;  %v5387_v49 = vor.u32 %v4018_v40, %v3852_v2  ;;  %2316 = vmatpush.bf16.msrb.mxu1 %v5382_v16  ;;  %v3826_v37 = vld [vmem:[#allocation16 + $0x60] sm:$0xf]  ;;  %v4015_v8 = vld [vmem:[#allocation16 + $0x6c] sm:$0xf0]  ;;  %v4010_v34 = vld [vmem:[#allocation16 + $0x4c] sm:$0xf] }
 0x58d   :  { %2300 = vmatpush.bf16.msrb.mxu0 %v5344_v13  ;;  %v5413_v35 = vor.u32 %v4012_v10, %v3818_v17  ;;  %v5418_v55 = vor.u32 %v4010_v34, %v3820_v27  ;;  %v4005_v19 = vld [vmem:[#allocation16 + $0x24] sm:$0xf]  ;;  %v3796_v45 = vld [vmem:[#allocation16 + $0x30] sm:$0xf0]  ;;  %v3802_v3 = vld [vmem:[#allocation16 + $0x28] sm:$0xf] }
 0x58e   :  { %4251 = vtanh.f32 %v5341_v32  ;;  %v1997_v25 = vsel %vm1996_vm2, %v4248_v61, %v1993_v44  ;;  %v5375_v61 = vor.u32 %v4022_v18, %v3868_v11  ;;  %v4013_v44 = vld [vmem:[#allocation16 + $0x64] sm:$0xf]  ;;  %v5828_v18 = vld [vmem:[#allocation59_spill] sm:$0xff]  ;;  %v5423_v2 = vor.u32 %v4005_v19, %v3796_v45  ;;  %v3788_v36 = vld [vmem:[#allocation16 + $0x18] sm:$0xf0] }
 0x58f   :  { %v2002_v43 = vsel %vm1999_vm3, %v2001_v41, %v1997_v25  ;;  %v5827_v25 = vld [vmem:[#allocation58_spill] sm:$0xff]  ;;  %v543_v11 = vadd.f32 %v5828_v18, %v5013_v33  ;;  %v4002_v30 = vld [vmem:[#allocation16 + $0xc] sm:$0xf] }
 0x590   :  { %2341 = vmatpush.bf16.msra.mxu3 %v5375_v61  ;;  %2329 = vmatpush.bf16.msrb.mxu2 %v5384_v52  ;;  %v514_v41 = vadd.f32 %v5827_v25, %v4998_v54  ;;  %v5403_v54 = vor.u32 %v4014_v14, %v3836_v15  ;;  %v3786_v14 = vld [vmem:[#allocation16 + $0x8] sm:$0xf]  ;;  %v4004_v15 = vld [vmem:[#allocation16 + $0x14] sm:$0xf0]  ;;  %v5440_v17 = vor.u32 %v4002_v30, %v3788_v36 }
 0x591   :  { %2301 = vmatpush.bf16.msrb.mxu0 %v5356_v46  ;;  %v5829_v39 = vld [vmem:[#allocation47_spill] sm:$0xff] }
 0x592   :  { %v572_v18 = vadd.f32 %v5829_v39, %v4949_v50 }
 0x594   :  { %v4252_v53 = vpop.eup %4251  ;;  %2342 = vmatpush.bf16.msra.mxu3 %v5387_v49 }
 0x595   :  { %v2009_v51 = vmul.f32 %v4252_v53, %v2002_v43  ;;  %2302 = vmatpush.bf16.msrb.mxu0 %v5368_v23  ;;  %v5396_v53 = vor.u32 %v4015_v8, %v3826_v37  ;;  %v3828_v43 = vld [vmem:[#allocation16 + $0x70] sm:$0xf0]  ;;  %v4008_v37 = vld [vmem:[#allocation16 + $0x34] sm:$0xf0]  ;;  %v4006_v8 = vld [vmem:[#allocation16 + $0x2c] sm:$0xf] }
 0x596   :  { %v5398_v7 = vor.u32 %v4013_v44, %v3828_v43  ;;  %v3804_v44 = vld [vmem:[#allocation16 + $0x38] sm:$0xf0]  ;;  %v5426_v25 = vor.u32 %v4008_v37, %v3802_v3  ;;  %v3778_v43 = vld [vmem:[#allocation16] sm:$0xf] }
 0x597   :  { %v2010_v57 = vpack.c.bf16 %v2009_v51, %v2009_v51  ;;  %v3834_v51 = vld [vmem:[#allocation16 + $0x68] sm:$0xf] }
 0x598   :  { %2317 = vmatpush.bf16.msrb.mxu1 %v5398_v7  ;;  %2343 = vmatpush.bf16.msra.mxu3 %v5403_v54 }
 0x599   :  { %2024 = vmatmul.bf16.vlgmr.msra.gmra.mxu0 %v2010_v57  ;;  %2037 = vmatmul.bf16.vlgmr.msra.gmra.mxu1 %v2010_v57 }
 0x59a   :  { %2050 = vmatmul.bf16.vlgmr.msra.gmra.mxu2 %v2010_v57  ;;  %2063 = vmatmul.bf16.vlgmr.msrb.gmra.mxu3 %v2010_v57  ;;  %v4016_v57 = vld [vmem:[#allocation16 + $0x74] sm:$0xf0] }
 0x59b   :  { %2303 = vmatpush.bf16.msrb.mxu0 %v5380_v62  ;;  %v5400_v5 = vor.u32 %v4016_v57, %v3834_v51  ;;  %v4003_v51 = vld [vmem:[#allocation16 + $0xc] sm:$0xf0]  ;;  %v4001_v57 = vld [vmem:[#allocation16 + $0x4] sm:$0xf] }
 0x59c   :  { %2318 = vmatpush.bf16.msrb.mxu1 %v5410_v6  ;;  %2344 = vmatpush.bf16.msra.mxu3 %v5418_v55 }
 0x59d   :  { %2330 = vmatpush.bf16.msrb.mxu2 %v5400_v5 }
 0x59f   :  { %2304 = vmatpush.bf16.msrb.mxu0 %v5396_v53 }
 0x5a0   :  { %2319 = vmatpush.bf16.msrb.mxu1 %v5423_v2 }
 0x5a1   :  { %2331 = vmatpush.bf16.msrb.mxu2 %v5413_v35 }
 0x5a3   :  { %2305 = vmatpush.bf16.msrb.mxu0 %v5408_v20 }
 0x5a5   :  { %2332 = vmatpush.bf16.msrb.mxu2 %v5426_v25 }
 0x5a7   :  { %2306 = vmatpush.bf16.msrb.mxu0 %v5420_v47 }
 0x616   :  { %v2025_v29 = vpop.f32.mrf.mxu0  ;;  %v2038_v1 = vpop.f32.mrf.mxu1 }
 0x617   :  { %v2068_v26 = vadd.f32 %v2025_v29, %v485_v9  ;;  %v2069_v28 = vadd.f32 %v2038_v1, %v514_v41  ;;  %v5428_v41 = vor.u32 %v4006_v8, %v3804_v44  ;;  %v5431_v29 = vor.u32 %v4003_v51, %v3778_v43  ;;  %v3780_v1 = vld [vmem:[#allocation16 + $0x10] sm:$0xf0] }
 0x619   :  { %v3773_v42 = vmul.f32 -1.442695, %v2068_v26  ;;  %v3774_v48 = vmul.f32 -1.442695, %v2069_v28  ;;  %v5434_v28 = vor.u32 %v4001_v57, %v3780_v1  ;;  %2345 = vmatpush.bf16.msra.mxu3 %v5428_v41  ;;  %2307 = vmatpush.bf16.msrb.mxu0 %v5431_v29 }
 0x61b   :  { %4253 = vpow2.f32 %v3773_v42  ;;  %v5437_v42 = vor.u32 %v4004_v15, %v3786_v14  ;;  %2320 = vmatpush.bf16.msrb.mxu1 %v5434_v28 }
 0x61c   :  { %4255 = vpow2.f32 %v3774_v48 }
 0x61d   :  { %v2051_v60 = vpop.f32.mrf.mxu2  ;;  %v2064_v40 = vpop.f32.mrf.mxu3  ;;  %2426 = vmatpush.bf16.msra.mxu0 %v5344_v13  ;;  %2333 = vmatpush.bf16.msrb.mxu2 %v5437_v42 }
 0x61e   :  { %v2070_v33 = vadd.f32 %v2051_v60, %v543_v11  ;;  %v2027_v58 = vpop.f32.mrf.mxu0  ;;  %v2040_v9 = vpop.f32.mrf.mxu1  ;;  %2346 = vmatpush.bf16.msra.mxu3 %v5440_v17  ;;  %v2071_v45 = vadd.f32 %v2064_v40, %v572_v18 }
 0x61f   :  { %2439 = vmatpush.bf16.msra.mxu1 %v5346_v12 }
 0x620   :  { %v3775_v26 = vmul.f32 -1.442695, %v2070_v33 }
 0x621   :  { %v4254_v38 = vpop.eup %4253  ;;  %2452 = vmatpush.bf16.msra.mxu2 %v5348_v21  ;;  %2427 = vmatpush.bf16.msra.mxu0 %v5356_v46 }
 0x622   :  { %v4256_v48 = vpop.eup %4255  ;;  %v2081_v56 = vadd.f32 1.0, %v4254_v38  ;;  %4257 = vpow2.f32 %v3775_v26  ;;  %2465 = vmatpush.bf16.msrb.mxu3 %v5351_v31 }
 0x623   :  { %v2082_v10 = vadd.f32 1.0, %v4256_v48  ;;  %2440 = vmatpush.bf16.msra.mxu1 %v5358_v0 }
 0x624   :  { %4259 = vrcp.f32 %v2081_v56  ;;  %v2095_v44 = vand.u32 2147483648, %v2081_v56  ;;  %v2093_v58 = vand.u32 2147483647, %v2081_v56  ;;  %vm2089_vm6 = vweird.f32 %v2081_v56 }
 0x625   :  { %4261 = vrcp.f32 %v2082_v10  ;;  %v2053_v34 = vpop.f32.mrf.mxu2  ;;  %v2066_v27 = vpop.f32.mrf.mxu3  ;;  %2453 = vmatpush.bf16.msra.mxu2 %v5360_v4  ;;  %2428 = vmatpush.bf16.msra.mxu0 %v5368_v23  ;;  %v2110_v40 = vand.u32 2147483648, %v2082_v10  ;;  %v2108_v43 = vand.u32 2147483647, %v2082_v10  ;;  %vm2104_vm7 = vweird.f32 %v2082_v10 }
 0x626   :  { %2466 = vmatpush.bf16.msrb.mxu3 %v5363_v22  ;;  %v2096_v14 = vor.u32 1.1754944e-38, %v2095_v44  ;;  %vm2094_vm10 = vcmp.eq.f32.partialorder %v2093_v58, 8.507059e+37  ;;  %v5831_v44 = vld [vmem:[#allocation26_spill] sm:$0xff]  ;;  %v5833_v58 = vld [vmem:[#allocation61_spill] sm:$0xff] }
 0x627   :  { %2441 = vmatpush.bf16.msra.mxu1 %v5370_v63  ;;  %v2111_v26 = vor.u32 1.1754944e-38, %v2110_v40  ;;  %vm2109_vm11 = vcmp.eq.f32.partialorder %v2108_v43, 8.507059e+37 }
 0x628   :  { %v4258_v24 = vpop.eup %4257 }
 0x629   :  { %v5453_v11 = vadd.f32 1.0, %v4258_v24  ;;  %2454 = vmatpush.bf16.msra.mxu2 %v5372_v59  ;;  %2429 = vmatpush.bf16.msra.mxu0 %v5380_v62 }
 0x62a   :  { %v4260_v19 = vpop.eup %4259  ;;  %2467 = vmatpush.bf16.msrb.mxu3 %v5375_v61 }
 0x62b   :  { %v4262_v3 = vpop.eup %4261  ;;  %v2085_v60 = vmul.f32 %v4260_v19, %v2081_v56  ;;  %4263 = vrcp.f32 %v5453_v11  ;;  %vm2090_vm4 = vweird.f32 %v4260_v19  ;;  %2442 = vmatpush.bf16.msra.mxu1 %v5382_v16  ;;  %vm2119_vm13 = vweird.f32 %v5453_v11 }
 0x62c   :  { %v2100_v37 = vmul.f32 %v4262_v3, %v2082_v10  ;;  %4265 = vtanh.f32 %v2071_v45  ;;  %vm2105_vm5 = vweird.f32 %v4262_v3  ;;  %vm2091_vm8 = vmor %vm2089_vm6, %vm2090_vm4 }
 0x62d   :  { %v2086_v50 = vsub.f32 1.0, %v2085_v60  ;;  %2455 = vmatpush.bf16.msra.mxu2 %v5384_v52  ;;  %vm2106_vm9 = vmor %vm2104_vm7, %vm2105_vm5  ;;  %2430 = vmatpush.bf16.msra.mxu0 %v5396_v53 }
 0x62e   :  { %v2101_v8 = vsub.f32 1.0, %v2100_v37  ;;  %2468 = vmatpush.bf16.msrb.mxu3 %v5387_v49 }
 0x62f   :  { %v2087_v33 = vmul.f32 %v4260_v19, %v2086_v50  ;;  %2443 = vmatpush.bf16.msra.mxu1 %v5398_v7 }
 0x630   :  { %v2102_v9 = vmul.f32 %v4262_v3, %v2101_v8  ;;  %v5830_v8 = vld [vmem:[#allocation30_spill] sm:$0xff] }
 0x631   :  { %v4264_v51 = vpop.eup %4263  ;;  %v2088_v57 = vadd.f32 %v4260_v19, %v2087_v33  ;;  %2456 = vmatpush.bf16.msra.mxu2 %v5400_v5  ;;  %2431 = vmatpush.bf16.msra.mxu0 %v5408_v20  ;;  %v847_v40 = vadd.f32 %v5831_v44, %v5830_v8  ;;  %v5832_v33 = vld [vmem:[#allocation66_spill] sm:$0xff] }
 0x632   :  { %v2115_v1 = vmul.f32 %v4264_v51, %v5453_v11  ;;  %v2103_v15 = vadd.f32 %v4262_v3, %v2102_v9  ;;  %v4266_v36 = vpop.eup %4265  ;;  %2469 = vmatpush.bf16.msrb.mxu3 %v5403_v54  ;;  %vm2120_vm12 = vweird.f32 %v4264_v51  ;;  %v875_v9 = vadd.f32 %v5833_v58, %v5832_v33 }
 0x633   :  { %v2092_v30 = vsel %vm2091_vm8, %v4260_v19, %v2088_v57  ;;  %2444 = vmatpush.bf16.msra.mxu1 %v5410_v6  ;;  %v2125_v19 = vand.u32 2147483648, %v5453_v11  ;;  %vm2121_vm14 = vmor %vm2119_vm13, %vm2120_vm12 }
 0x634   :  { %v2116_v38 = vsub.f32 1.0, %v2115_v1  ;;  %v2097_v48 = vsel %vm2094_vm10, %v2096_v14, %v2092_v30  ;;  %v2107_v56 = vsel %vm2106_vm9, %v4262_v3, %v2103_v15  ;;  %v5835_v30 = vld [vmem:[#allocation62_spill] sm:$0xff] }
 0x635   :  { %v2112_v10 = vsel %vm2109_vm11, %v2111_v26, %v2107_v56  ;;  %v2131_v34 = vmul.f32 %v4266_v36, %v2097_v48  ;;  %2457 = vmatpush.bf16.msra.mxu2 %v5413_v35  ;;  %2432 = vmatpush.bf16.msra.mxu0 %v5420_v47  ;;  %v2126_v3 = vor.u32 1.1754944e-38, %v2125_v19  ;;  %v5834_v26 = vld [vmem:[#allocation69_spill] sm:$0xff] }
 0x636   :  { %v2117_v27 = vmul.f32 %v4264_v51, %v2116_v38  ;;  %v2130_v24 = vmul.f32 %v2112_v10, %v5341_v32  ;;  %v2123_v32 = vand.u32 2147483647, %v5453_v11  ;;  %2470 = vmatpush.bf16.msrb.mxu3 %v5418_v55  ;;  %v903_v36 = vadd.f32 %v5835_v30, %v5834_v26 }
 0x637   :  { %2445 = vmatpush.bf16.msra.mxu1 %v5423_v2 }
 0x638   :  { %v5473_v39 = vadd.f32 %v2131_v34, %v2130_v24  ;;  %v2118_v18 = vadd.f32 %v4264_v51, %v2117_v27  ;;  %vm2124_vm15 = vcmp.eq.f32.partialorder %v2123_v32, 8.507059e+37 }
 0x639   :  { %2458 = vmatpush.bf16.msra.mxu2 %v5426_v25  ;;  %2433 = vmatpush.bf16.msra.mxu0 %v5431_v29 }
 0x63a   :  { %4267 = vtanh.f32 %v5473_v39  ;;  %v2122_v45 = vsel %vm2121_vm14, %v4264_v51, %v2118_v18  ;;  %2471 = vmatpush.bf16.msrb.mxu3 %v5428_v41 }
 0x63b   :  { %v2127_v37 = vsel %vm2124_vm15, %v2126_v3, %v2122_v45  ;;  %2446 = vmatpush.bf16.msra.mxu1 %v5434_v28 }
 0x63d   :  { %2459 = vmatpush.bf16.msra.mxu2 %v5437_v42 }
 0x63e   :  { %2472 = vmatpush.bf16.msrb.mxu3 %v5440_v17 }
 0x640   :  { %v4268_v60 = vpop.eup %4267 }
 0x641   :  { %v2134_v50 = vmul.f32 %v4268_v60, %v2127_v37  ;;  %v5836_v37 = vld [vmem:[#allocation55_spill] sm:$0xff] }
 0x643   :  { %v2135_v11 = vpack.c.bf16 %v2134_v50, %v2134_v50  ;;  %v5837_v50 = vld [vmem:[#allocation50_spill] sm:$0xff] }
 0x645   :  { %2308 = vmatmul.bf16.vlgmr.msrb.gmra.mxu0 %v2135_v11  ;;  %2321 = vmatmul.bf16.vlgmr.msrb.gmra.mxu1 %v2135_v11 }
 0x646   :  { %2334 = vmatmul.bf16.vlgmr.msrb.gmra.mxu2 %v2135_v11  ;;  %2347 = vmatmul.bf16.vlgmr.msra.gmra.mxu3 %v2135_v11  ;;  %v931_v11 = vadd.f32 %v5837_v50, %v5836_v37 }
 0x647   :  { %2553 = vmatpush.bf16.msrb.mxu0 %v5344_v13  ;;  %2566 = vmatpush.bf16.msrb.mxu1 %v5346_v12 }
 0x648   :  { %2579 = vmatpush.bf16.msrb.mxu2 %v5348_v21  ;;  %2592 = vmatpush.bf16.msra.mxu3 %v5351_v31 }
 0x64b   :  { %2554 = vmatpush.bf16.msrb.mxu0 %v5356_v46  ;;  %2567 = vmatpush.bf16.msrb.mxu1 %v5358_v0 }
 0x64c   :  { %2580 = vmatpush.bf16.msrb.mxu2 %v5360_v4  ;;  %2593 = vmatpush.bf16.msra.mxu3 %v5363_v22 }
 0x64f   :  { %2555 = vmatpush.bf16.msrb.mxu0 %v5368_v23  ;;  %2568 = vmatpush.bf16.msrb.mxu1 %v5370_v63 }
 0x650   :  { %2581 = vmatpush.bf16.msrb.mxu2 %v5372_v59  ;;  %2594 = vmatpush.bf16.msra.mxu3 %v5375_v61 }
 0x653   :  { %2556 = vmatpush.bf16.msrb.mxu0 %v5380_v62  ;;  %2569 = vmatpush.bf16.msrb.mxu1 %v5382_v16 }
 0x654   :  { %2582 = vmatpush.bf16.msrb.mxu2 %v5384_v52  ;;  %2595 = vmatpush.bf16.msra.mxu3 %v5387_v49 }
 0x657   :  { %2557 = vmatpush.bf16.msrb.mxu0 %v5396_v53  ;;  %2570 = vmatpush.bf16.msrb.mxu1 %v5398_v7 }
 0x658   :  { %2583 = vmatpush.bf16.msrb.mxu2 %v5400_v5  ;;  %2596 = vmatpush.bf16.msra.mxu3 %v5403_v54 }
 0x65b   :  { %2558 = vmatpush.bf16.msrb.mxu0 %v5408_v20  ;;  %2571 = vmatpush.bf16.msrb.mxu1 %v5410_v6 }
 0x65c   :  { %2584 = vmatpush.bf16.msrb.mxu2 %v5413_v35  ;;  %2597 = vmatpush.bf16.msra.mxu3 %v5418_v55 }
 0x65f   :  { %2559 = vmatpush.bf16.msrb.mxu0 %v5420_v47  ;;  %2572 = vmatpush.bf16.msrb.mxu1 %v5423_v2 }
 0x660   :  { %2585 = vmatpush.bf16.msrb.mxu2 %v5426_v25  ;;  %2598 = vmatpush.bf16.msra.mxu3 %v5428_v41 }
 0x663   :  { %2560 = vmatpush.bf16.msrb.mxu0 %v5431_v29  ;;  %2573 = vmatpush.bf16.msrb.mxu1 %v5434_v28 }
 0x664   :  { %2586 = vmatpush.bf16.msrb.mxu2 %v5437_v42  ;;  %2599 = vmatpush.bf16.msra.mxu3 %v5440_v17 }
 0x6c2   :  { %v2309_v43 = vpop.f32.mrf.mxu0  ;;  %v2322_v51 = vpop.f32.mrf.mxu1 }
 0x6c3   :  { %v2352_v57 = vadd.f32 %v2309_v43, %v847_v40  ;;  %v2353_v1 = vadd.f32 %v2322_v51, %v875_v9 }
 0x6c5   :  { %v3904_v14 = vmul.f32 -1.442695, %v2352_v57  ;;  %v3905_v15 = vmul.f32 -1.442695, %v2353_v1 }
 0x6c7   :  { %4269 = vpow2.f32 %v3904_v14 }
 0x6c8   :  { %4271 = vpow2.f32 %v3905_v15 }
 0x6c9   :  { %v2335_v38 = vpop.f32.mrf.mxu2  ;;  %v2348_v48 = vpop.f32.mrf.mxu3 }
 0x6ca   :  { %v2354_v56 = vadd.f32 %v2335_v38, %v903_v36  ;;  %v2311_v10 = vpop.f32.mrf.mxu0  ;;  %v2324_v34 = vpop.f32.mrf.mxu1  ;;  %v2355_v58 = vadd.f32 %v2348_v48, %v931_v11 }
 0x6cc   :  { %v3906_v27 = vmul.f32 -1.442695, %v2354_v56 }
 0x6cd   :  { %v4270_v24 = vpop.eup %4269 }
 0x6ce   :  { %v4272_v18 = vpop.eup %4271  ;;  %v2365_v19 = vadd.f32 1.0, %v4270_v24  ;;  %4273 = vpow2.f32 %v3906_v27 }
 0x6cf   :  { %v2366_v32 = vadd.f32 1.0, %v4272_v18 }
 0x6d0   :  { %4275 = vrcp.f32 %v2365_v19  ;;  %v2379_v14 = vand.u32 2147483648, %v2365_v19  ;;  %v2377_v36 = vand.u32 2147483647, %v2365_v19  ;;  %vm2373_vm2 = vweird.f32 %v2365_v19 }
 0x6d1   :  { %4277 = vrcp.f32 %v2366_v32  ;;  %v2337_v45 = vpop.f32.mrf.mxu2  ;;  %v2350_v3 = vpop.f32.mrf.mxu3  ;;  %v2394_v15 = vand.u32 2147483648, %v2366_v32  ;;  %v2392_v56 = vand.u32 2147483647, %v2366_v32  ;;  %vm2388_vm3 = vweird.f32 %v2366_v32 }
 0x6d2   :  { %v2380_v27 = vor.u32 1.1754944e-38, %v2379_v14  ;;  %vm2378_vm6 = vcmp.eq.f32.partialorder %v2377_v36, 8.507059e+37 }
 0x6d3   :  { %v2395_v18 = vor.u32 1.1754944e-38, %v2394_v15  ;;  %vm2393_vm7 = vcmp.eq.f32.partialorder %v2392_v56, 8.507059e+37  ;;  %v5839_v56 = vld [vmem:[#allocation64_spill] sm:$0xff] }
 0x6d4   :  { %v4274_v60 = vpop.eup %4273 }
 0x6d5   :  { %v2367_v44 = vadd.f32 1.0, %v4274_v60 }
 0x6d6   :  { %v4276_v40 = vpop.eup %4275 }
 0x6d7   :  { %v4278_v9 = vpop.eup %4277  ;;  %v2369_v43 = vmul.f32 %v4276_v40, %v2365_v19  ;;  %4279 = vrcp.f32 %v2367_v44  ;;  %vm2374_vm0 = vweird.f32 %v4276_v40  ;;  %vm2403_vm9 = vweird.f32 %v2367_v44 }
 0x6d8   :  { %v2384_v51 = vmul.f32 %v4278_v9, %v2366_v32  ;;  %4281 = vtanh.f32 %v2355_v58  ;;  %vm2389_vm1 = vweird.f32 %v4278_v9  ;;  %vm2375_vm4 = vmor %vm2373_vm2, %vm2374_vm0 }
 0x6d9   :  { %v2370_v57 = vsub.f32 1.0, %v2369_v43  ;;  %vm2390_vm5 = vmor %vm2388_vm3, %vm2389_vm1 }
 0x6da   :  { %v2385_v1 = vsub.f32 1.0, %v2384_v51 }
 0x6db   :  { %v2371_v30 = vmul.f32 %v4276_v40, %v2370_v57 }
 0x6dc   :  { %v2386_v38 = vmul.f32 %v4278_v9, %v2385_v1  ;;  %v2409_v1 = vand.u32 2147483648, %v2367_v44 }
 0x6dd   :  { %v4280_v10 = vpop.eup %4279  ;;  %v2372_v34 = vadd.f32 %v4276_v40, %v2371_v30 }
 0x6de   :  { %v2399_v48 = vmul.f32 %v4280_v10, %v2367_v44  ;;  %v2387_v24 = vadd.f32 %v4278_v9, %v2386_v38  ;;  %v4282_v3 = vpop.eup %4281  ;;  %vm2404_vm8 = vweird.f32 %v4280_v10  ;;  %v2410_v15 = vor.u32 1.1754944e-38, %v2409_v1 }
 0x6df   :  { %v2376_v45 = vsel %vm2375_vm4, %v4276_v40, %v2372_v34  ;;  %v2407_v40 = vand.u32 2147483647, %v2367_v44  ;;  %vm2405_vm10 = vmor %vm2403_vm9, %vm2404_vm8 }
 0x6e0   :  { %v2400_v60 = vsub.f32 1.0, %v2399_v48  ;;  %v2381_v50 = vsel %vm2378_vm6, %v2380_v27, %v2376_v45  ;;  %v2391_v11 = vsel %vm2390_vm5, %v4278_v9, %v2387_v24 }
 0x6e1   :  { %v2396_v58 = vsel %vm2393_vm7, %v2395_v18, %v2391_v11  ;;  %v2415_v43 = vmul.f32 %v4282_v3, %v2381_v50  ;;  %vm2408_vm11 = vcmp.eq.f32.partialorder %v2407_v40, 8.507059e+37  ;;  %v5840_v3 = vld [vmem:[#allocation65_spill] sm:$0xff] }
 0x6e2   :  { %v2401_v51 = vmul.f32 %v4280_v10, %v2400_v60  ;;  %v2414_v57 = vmul.f32 %v2396_v58, %v5473_v39  ;;  %v5838_v39 = vld [vmem:[#allocation28_spill] sm:$0xff]  ;;  %v905_v60 = vadd.f32 %v5840_v3, %v5834_v26 }
 0x6e3   :  { %v849_v44 = vadd.f32 %v5838_v39, %v5830_v8 }
 0x6e4   :  { %v5532_v19 = vadd.f32 %v2415_v43, %v2414_v57  ;;  %v2402_v32 = vadd.f32 %v4280_v10, %v2401_v51 }
 0x6e6   :  { %4283 = vtanh.f32 %v5532_v19  ;;  %v2406_v14 = vsel %vm2405_vm10, %v4280_v10, %v2402_v32  ;;  %v877_v10 = vadd.f32 %v5839_v56, %v5832_v33 }
 0x6e7   :  { %v2411_v30 = vsel %vm2408_vm11, %v2410_v15, %v2406_v14 }
 0x6ec   :  { %v4284_v9 = vpop.eup %4283 }
 0x6ed   :  { %v2418_v36 = vmul.f32 %v4284_v9, %v2411_v30 }
 0x6ef   :  { %v2419_v38 = vpack.c.bf16 %v2418_v36, %v2418_v36  ;;  %v5841_v36 = vld [vmem:[#allocation53_spill] sm:$0xff] }
 0x6f1   :  { %2420 = vst [vmem:[#allocation4] sm:$0xf] %v2419_v38  ;;  %2434 = vmatmul.bf16.vlgmr.msra.gmra.mxu0 %v2419_v38  ;;  %2447 = vmatmul.bf16.vlgmr.msra.gmra.mxu1 %v2419_v38 }
 0x6f2   :  { %2460 = vmatmul.bf16.vlgmr.msra.gmra.mxu2 %v2419_v38  ;;  %2473 = vmatmul.bf16.vlgmr.msrb.gmra.mxu3 %v2419_v38  ;;  %v933_v38 = vadd.f32 %v5841_v36, %v5836_v37 }
 0x6f3   :  { %2680 = vmatpush.bf16.msra.mxu0 %v5344_v13  ;;  %2693 = vmatpush.bf16.msra.mxu1 %v5346_v12 }
 0x6f4   :  { %2706 = vmatpush.bf16.msra.mxu2 %v5348_v21  ;;  %2719 = vmatpush.bf16.msrb.mxu3 %v5351_v31 }
 0x6f7   :  { %2681 = vmatpush.bf16.msra.mxu0 %v5356_v46  ;;  %2694 = vmatpush.bf16.msra.mxu1 %v5358_v0 }
 0x6f8   :  { %2707 = vmatpush.bf16.msra.mxu2 %v5360_v4  ;;  %2720 = vmatpush.bf16.msrb.mxu3 %v5363_v22 }
 0x6fb   :  { %2682 = vmatpush.bf16.msra.mxu0 %v5368_v23  ;;  %2695 = vmatpush.bf16.msra.mxu1 %v5370_v63 }
 0x6fc   :  { %2708 = vmatpush.bf16.msra.mxu2 %v5372_v59  ;;  %2721 = vmatpush.bf16.msrb.mxu3 %v5375_v61 }
 0x6ff   :  { %2683 = vmatpush.bf16.msra.mxu0 %v5380_v62  ;;  %2696 = vmatpush.bf16.msra.mxu1 %v5382_v16 }
 0x700   :  { %2709 = vmatpush.bf16.msra.mxu2 %v5384_v52  ;;  %2722 = vmatpush.bf16.msrb.mxu3 %v5387_v49 }
 0x703   :  { %2684 = vmatpush.bf16.msra.mxu0 %v5396_v53  ;;  %2697 = vmatpush.bf16.msra.mxu1 %v5398_v7 }
 0x704   :  { %2710 = vmatpush.bf16.msra.mxu2 %v5400_v5  ;;  %2723 = vmatpush.bf16.msrb.mxu3 %v5403_v54 }
 0x707   :  { %2685 = vmatpush.bf16.msra.mxu0 %v5408_v20  ;;  %2698 = vmatpush.bf16.msra.mxu1 %v5410_v6 }
 0x708   :  { %2711 = vmatpush.bf16.msra.mxu2 %v5413_v35  ;;  %2724 = vmatpush.bf16.msrb.mxu3 %v5418_v55 }
 0x70b   :  { %2686 = vmatpush.bf16.msra.mxu0 %v5420_v47  ;;  %2699 = vmatpush.bf16.msra.mxu1 %v5423_v2 }
 0x70c   :  { %2712 = vmatpush.bf16.msra.mxu2 %v5426_v25  ;;  %2725 = vmatpush.bf16.msrb.mxu3 %v5428_v41 }
 0x70f   :  { %2687 = vmatpush.bf16.msra.mxu0 %v5431_v29  ;;  %2700 = vmatpush.bf16.msra.mxu1 %v5434_v28 }
 0x710   :  { %2713 = vmatpush.bf16.msra.mxu2 %v5437_v42  ;;  %2726 = vmatpush.bf16.msrb.mxu3 %v5440_v17 }
 0x76e   :  { %v2435_v34 = vpop.f32.mrf.mxu0  ;;  %v2448_v48 = vpop.f32.mrf.mxu1 }
 0x76f   :  { %v2478_v27 = vadd.f32 %v2435_v34, %v849_v44  ;;  %v2479_v24 = vadd.f32 %v2448_v48, %v877_v10 }
 0x771   :  { %v3907_v18 = vmul.f32 -1.442695, %v2478_v27  ;;  %v3908_v45 = vmul.f32 -1.442695, %v2479_v24 }
 0x773   :  { %4285 = vpow2.f32 %v3907_v18 }
 0x774   :  { %4287 = vpow2.f32 %v3908_v45 }
 0x775   :  { %v2461_v50 = vpop.f32.mrf.mxu2  ;;  %v2474_v11 = vpop.f32.mrf.mxu3 }
 0x776   :  { %v2480_v58 = vadd.f32 %v2461_v50, %v905_v60  ;;  %v2437_v43 = vpop.f32.mrf.mxu0  ;;  %v2450_v51 = vpop.f32.mrf.mxu1  ;;  %v2481_v56 = vadd.f32 %v2474_v11, %v933_v38 }
 0x778   :  { %v3909_v57 = vmul.f32 -1.442695, %v2480_v58 }
 0x779   :  { %v4286_v32 = vpop.eup %4285 }
 0x77a   :  { %v4288_v1 = vpop.eup %4287  ;;  %v2491_v40 = vadd.f32 1.0, %v4286_v32  ;;  %4289 = vpow2.f32 %v3909_v57 }
 0x77b   :  { %v2492_v14 = vadd.f32 1.0, %v4288_v1 }
 0x77c   :  { %4291 = vrcp.f32 %v2491_v40  ;;  %v2505_v18 = vand.u32 2147483648, %v2491_v40  ;;  %v2503_v60 = vand.u32 2147483647, %v2491_v40  ;;  %vm2499_vm14 = vweird.f32 %v2491_v40 }
 0x77d   :  { %4293 = vrcp.f32 %v2492_v14  ;;  %v2463_v15 = vpop.f32.mrf.mxu2  ;;  %v2476_v9 = vpop.f32.mrf.mxu3  ;;  %v2520_v45 = vand.u32 2147483648, %v2492_v14  ;;  %v2518_v58 = vand.u32 2147483647, %v2492_v14  ;;  %vm2514_vm15 = vweird.f32 %v2492_v14 }
 0x77e   :  { %v2506_v57 = vor.u32 1.1754944e-38, %v2505_v18  ;;  %vm2504_vm2 = vcmp.eq.f32.partialorder %v2503_v60, 8.507059e+37 }
 0x77f   :  { %v2521_v1 = vor.u32 1.1754944e-38, %v2520_v45  ;;  %vm2519_vm3 = vcmp.eq.f32.partialorder %v2518_v58, 8.507059e+37  ;;  %v5842_v58 = vld [vmem:[#allocation31_spill] sm:$0xff] }
 0x780   :  { %v4290_v30 = vpop.eup %4289 }
 0x781   :  { %v2493_v39 = vadd.f32 1.0, %v4290_v30 }
 0x782   :  { %v4292_v44 = vpop.eup %4291 }
 0x783   :  { %v4294_v10 = vpop.eup %4293  ;;  %v2495_v34 = vmul.f32 %v4292_v44, %v2491_v40  ;;  %4295 = vrcp.f32 %v2493_v39  ;;  %vm2500_vm12 = vweird.f32 %v4292_v44  ;;  %vm2529_vm5 = vweird.f32 %v2493_v39 }
 0x784   :  { %v2510_v48 = vmul.f32 %v4294_v10, %v2492_v14  ;;  %4297 = vtanh.f32 %v2481_v56  ;;  %vm2515_vm13 = vweird.f32 %v4294_v10  ;;  %vm2501_vm0 = vmor %vm2499_vm14, %vm2500_vm12 }
 0x785   :  { %v2496_v27 = vsub.f32 1.0, %v2495_v34  ;;  %vm2516_vm1 = vmor %vm2514_vm15, %vm2515_vm13 }
 0x786   :  { %v2511_v24 = vsub.f32 1.0, %v2510_v48 }
 0x787   :  { %v2497_v3 = vmul.f32 %v4292_v44, %v2496_v27 }
 0x788   :  { %v2512_v50 = vmul.f32 %v4294_v10, %v2511_v24  ;;  %v2535_v24 = vand.u32 2147483648, %v2493_v39 }
 0x789   :  { %v4296_v43 = vpop.eup %4295  ;;  %v2498_v51 = vadd.f32 %v4292_v44, %v2497_v3 }
 0x78a   :  { %v2525_v11 = vmul.f32 %v4296_v43, %v2493_v39  ;;  %v2513_v32 = vadd.f32 %v4294_v10, %v2512_v50  ;;  %v4298_v9 = vpop.eup %4297  ;;  %vm2530_vm4 = vweird.f32 %v4296_v43  ;;  %v2536_v45 = vor.u32 1.1754944e-38, %v2535_v24 }
 0x78b   :  { %v2502_v15 = vsel %vm2501_vm0, %v4292_v44, %v2498_v51  ;;  %v2533_v44 = vand.u32 2147483647, %v2493_v39  ;;  %vm2531_vm6 = vmor %vm2529_vm5, %vm2530_vm4  ;;  %v5843_v51 = vld [vmem:[#allocation68_spill] sm:$0xff] }
 0x78c   :  { %v2526_v30 = vsub.f32 1.0, %v2525_v11  ;;  %v2507_v36 = vsel %vm2504_vm2, %v2506_v57, %v2502_v15  ;;  %v2517_v38 = vsel %vm2516_vm1, %v4294_v10, %v2513_v32 }
 0x78d   :  { %v2522_v56 = vsel %vm2519_vm3, %v2521_v1, %v2517_v38  ;;  %v2541_v34 = vmul.f32 %v4298_v9, %v2507_v36  ;;  %vm2534_vm7 = vcmp.eq.f32.partialorder %v2533_v44, 8.507059e+37  ;;  %v5844_v9 = vld [vmem:[#allocation70_spill] sm:$0xff] }
 0x78e   :  { %v2527_v48 = vmul.f32 %v4296_v43, %v2526_v30  ;;  %v2540_v27 = vmul.f32 %v2522_v56, %v5532_v19 }
 0x790   :  { %v5576_v40 = vadd.f32 %v2541_v34, %v2540_v27  ;;  %v2528_v14 = vadd.f32 %v4296_v43, %v2527_v48 }
 0x792   :  { %4299 = vtanh.f32 %v5576_v40  ;;  %v2532_v18 = vsel %vm2531_vm6, %v4296_v43, %v2528_v14 }
 0x793   :  { %v2537_v3 = vsel %vm2534_vm7, %v2536_v45, %v2532_v18 }
 0x798   :  { %v4300_v10 = vpop.eup %4299 }
 0x799   :  { %v2544_v60 = vmul.f32 %v4300_v10, %v2537_v3  ;;  %v5845_v3 = vld [vmem:[#allocation57_spill] sm:$0xff] }
 0x79b   :  { %v2545_v50 = vpack.c.bf16 %v2544_v60, %v2544_v60 }
 0x79d   :  { %2547 = vst [vmem:[#allocation4 + $0x4] sm:$0xf] %v2545_v50  ;;  %2561 = vmatmul.bf16.vlgmr.msrb.gmra.mxu0 %v2545_v50  ;;  %2574 = vmatmul.bf16.vlgmr.msrb.gmra.mxu1 %v2545_v50 }
 0x79e   :  { %2587 = vmatmul.bf16.vlgmr.msrb.gmra.mxu2 %v2545_v50  ;;  %2600 = vmatmul.bf16.vlgmr.msra.gmra.mxu3 %v2545_v50 }
 0x79f   :  { %2807 = vmatpush.bf16.msrb.mxu0 %v5344_v13  ;;  %2820 = vmatpush.bf16.msrb.mxu1 %v5346_v12 }
 0x7a0   :  { %2833 = vmatpush.bf16.msrb.mxu2 %v5348_v21  ;;  %2846 = vmatpush.bf16.msra.mxu3 %v5351_v31 }
 0x7a3   :  { %2808 = vmatpush.bf16.msrb.mxu0 %v5356_v46  ;;  %2821 = vmatpush.bf16.msrb.mxu1 %v5358_v0 }
 0x7a4   :  { %2834 = vmatpush.bf16.msrb.mxu2 %v5360_v4  ;;  %2847 = vmatpush.bf16.msra.mxu3 %v5363_v22 }
 0x7a7   :  { %2809 = vmatpush.bf16.msrb.mxu0 %v5368_v23  ;;  %2822 = vmatpush.bf16.msrb.mxu1 %v5370_v63 }
 0x7a8   :  { %2835 = vmatpush.bf16.msrb.mxu2 %v5372_v59  ;;  %2848 = vmatpush.bf16.msra.mxu3 %v5375_v61 }
 0x7ab   :  { %2810 = vmatpush.bf16.msrb.mxu0 %v5380_v62  ;;  %2823 = vmatpush.bf16.msrb.mxu1 %v5382_v16 }
 0x7ac   :  { %2836 = vmatpush.bf16.msrb.mxu2 %v5384_v52  ;;  %2849 = vmatpush.bf16.msra.mxu3 %v5387_v49 }
 0x7af   :  { %2811 = vmatpush.bf16.msrb.mxu0 %v5396_v53  ;;  %2824 = vmatpush.bf16.msrb.mxu1 %v5398_v7 }
 0x7b0   :  { %2837 = vmatpush.bf16.msrb.mxu2 %v5400_v5  ;;  %2850 = vmatpush.bf16.msra.mxu3 %v5403_v54 }
 0x7b3   :  { %2812 = vmatpush.bf16.msrb.mxu0 %v5408_v20  ;;  %2825 = vmatpush.bf16.msrb.mxu1 %v5410_v6 }
 0x7b4   :  { %2838 = vmatpush.bf16.msrb.mxu2 %v5413_v35  ;;  %2851 = vmatpush.bf16.msra.mxu3 %v5418_v55 }
 0x7b7   :  { %2813 = vmatpush.bf16.msrb.mxu0 %v5420_v47  ;;  %2826 = vmatpush.bf16.msrb.mxu1 %v5423_v2 }
 0x7b8   :  { %2839 = vmatpush.bf16.msrb.mxu2 %v5426_v25  ;;  %2852 = vmatpush.bf16.msra.mxu3 %v5428_v41 }
 0x7bb   :  { %2814 = vmatpush.bf16.msrb.mxu0 %v5431_v29  ;;  %2827 = vmatpush.bf16.msrb.mxu1 %v5434_v28 }
 0x7bc   :  { %2840 = vmatpush.bf16.msrb.mxu2 %v5437_v42  ;;  %2853 = vmatpush.bf16.msra.mxu3 %v5440_v17 }
 0x81a   :  { %v2562_v19 = vpop.f32.mrf.mxu0  ;;  %v2575_v39 = vpop.f32.mrf.mxu1 }
 0x81b   :  { %v2605_v43 = vadd.f32 %v2562_v19, %v5842_v58  ;;  %v2606_v11 = vadd.f32 %v2575_v39, %v5843_v51 }
 0x81d   :  { %v3910_v57 = vmul.f32 -1.442695, %v2605_v43  ;;  %v3911_v32 = vmul.f32 -1.442695, %v2606_v11 }
 0x81f   :  { %4301 = vpow2.f32 %v3910_v57 }
 0x820   :  { %4303 = vpow2.f32 %v3911_v32 }
 0x821   :  { %v2588_v1 = vpop.f32.mrf.mxu2  ;;  %v2601_v15 = vpop.f32.mrf.mxu3 }
 0x822   :  { %v2607_v30 = vadd.f32 %v2588_v1, %v5844_v9  ;;  %v2564_v36 = vpop.f32.mrf.mxu0  ;;  %v2577_v38 = vpop.f32.mrf.mxu1  ;;  %v2608_v60 = vadd.f32 %v2601_v15, %v5845_v3 }
 0x824   :  { %v3912_v56 = vmul.f32 -1.442695, %v2607_v30 }
 0x825   :  { %v4302_v34 = vpop.eup %4301 }
 0x826   :  { %v4304_v48 = vpop.eup %4303  ;;  %v2618_v27 = vadd.f32 1.0, %v4302_v34  ;;  %4305 = vpow2.f32 %v3912_v56 }
 0x827   :  { %v2619_v14 = vadd.f32 1.0, %v4304_v48 }
 0x828   :  { %4307 = vrcp.f32 %v2618_v27  ;;  %v2632_v51 = vand.u32 2147483648, %v2618_v27  ;;  %v2630_v32 = vand.u32 2147483647, %v2618_v27  ;;  %vm2626_vm10 = vweird.f32 %v2618_v27 }
 0x829   :  { %4309 = vrcp.f32 %v2619_v14  ;;  %v2590_v24 = vpop.f32.mrf.mxu2  ;;  %v2603_v44 = vpop.f32.mrf.mxu3  ;;  %v2647_v11 = vand.u32 2147483648, %v2619_v14  ;;  %v2645_v9 = vand.u32 2147483647, %v2619_v14  ;;  %vm2641_vm11 = vweird.f32 %v2619_v14 }
 0x82a   :  { %v2633_v38 = vor.u32 1.1754944e-38, %v2632_v51  ;;  %vm2631_vm14 = vcmp.eq.f32.partialorder %v2630_v32, 8.507059e+37 }
 0x82b   :  { %v2648_v34 = vor.u32 1.1754944e-38, %v2647_v11  ;;  %vm2646_vm15 = vcmp.eq.f32.partialorder %v2645_v9, 8.507059e+37  ;;  %v5847_v9 = vld [vmem:[#allocation72_spill] sm:$0xff] }
 0x82c   :  { %v4306_v18 = vpop.eup %4305 }
 0x82d   :  { %v2620_v45 = vadd.f32 1.0, %v4306_v18 }
 0x82e   :  { %v4308_v10 = vpop.eup %4307 }
 0x82f   :  { %v4310_v50 = vpop.eup %4309  ;;  %v2622_v19 = vmul.f32 %v4308_v10, %v2618_v27  ;;  %4311 = vrcp.f32 %v2620_v45  ;;  %vm2627_vm8 = vweird.f32 %v4308_v10  ;;  %vm2656_vm1 = vweird.f32 %v2620_v45 }
 0x830   :  { %v2637_v39 = vmul.f32 %v4310_v50, %v2619_v14  ;;  %4313 = vtanh.f32 %v2608_v60  ;;  %vm2642_vm9 = vweird.f32 %v4310_v50  ;;  %vm2628_vm12 = vmor %vm2626_vm10, %vm2627_vm8 }
 0x831   :  { %v2623_v58 = vsub.f32 1.0, %v2622_v19  ;;  %vm2643_vm13 = vmor %vm2641_vm11, %vm2642_vm9 }
 0x832   :  { %v2638_v43 = vsub.f32 1.0, %v2637_v39 }
 0x833   :  { %v2624_v57 = vmul.f32 %v4308_v10, %v2623_v58 }
 0x834   :  { %v2639_v1 = vmul.f32 %v4310_v50, %v2638_v43  ;;  %v2662_v43 = vand.u32 2147483648, %v2620_v45 }
 0x835   :  { %v4312_v30 = vpop.eup %4311  ;;  %v2625_v36 = vadd.f32 %v4308_v10, %v2624_v57 }
 0x836   :  { %v2652_v15 = vmul.f32 %v4312_v30, %v2620_v45  ;;  %v2640_v56 = vadd.f32 %v4310_v50, %v2639_v1  ;;  %v4314_v24 = vpop.eup %4313  ;;  %vm2657_vm0 = vweird.f32 %v4312_v30  ;;  %v2663_v11 = vor.u32 1.1754944e-38, %v2662_v43 }
 0x837   :  { %v2629_v48 = vsel %vm2628_vm12, %v4308_v10, %v2625_v36  ;;  %v2660_v10 = vand.u32 2147483647, %v2620_v45  ;;  %vm2658_vm2 = vmor %vm2656_vm1, %vm2657_vm0 }
 0x838   :  { %v2653_v44 = vsub.f32 1.0, %v2652_v15  ;;  %v2634_v18 = vsel %vm2631_vm14, %v2633_v38, %v2629_v48  ;;  %v2644_v3 = vsel %vm2643_vm13, %v4310_v50, %v2640_v56 }
 0x839   :  { %v2649_v60 = vsel %vm2646_vm15, %v2648_v34, %v2644_v3  ;;  %v2668_v19 = vmul.f32 %v4314_v24, %v2634_v18  ;;  %vm2661_vm3 = vcmp.eq.f32.partialorder %v2660_v10, 8.507059e+37  ;;  %v5848_v24 = vld [vmem:[#allocation73_spill] sm:$0xff] }
 0x83a   :  { %v2654_v39 = vmul.f32 %v4312_v30, %v2653_v44  ;;  %v2667_v58 = vmul.f32 %v2649_v60, %v5576_v40  ;;  %v5846_v40 = vld [vmem:[#allocation35_spill] sm:$0xff]  ;;  %v910_v44 = vadd.f32 %v5848_v24, %v5834_v26 }
 0x83b   :  { %v854_v45 = vadd.f32 %v5846_v40, %v5830_v8 }
 0x83c   :  { %v5616_v27 = vadd.f32 %v2668_v19, %v2667_v58  ;;  %v2655_v14 = vadd.f32 %v4312_v30, %v2654_v39 }
 0x83e   :  { %4315 = vtanh.f32 %v5616_v27  ;;  %v2659_v51 = vsel %vm2658_vm2, %v4312_v30, %v2655_v14  ;;  %v882_v30 = vadd.f32 %v5847_v9, %v5832_v33 }
 0x83f   :  { %v2664_v57 = vsel %vm2661_vm3, %v2663_v11, %v2659_v51 }
 0x844   :  { %v4316_v50 = vpop.eup %4315 }
 0x845   :  { %v2671_v32 = vmul.f32 %v4316_v50, %v2664_v57 }
 0x847   :  { %v2672_v1 = vpack.c.bf16 %v2671_v32, %v2671_v32  ;;  %v5849_v32 = vld [vmem:[#allocation60_spill] sm:$0xff] }
 0x849   :  { %2674 = vst [vmem:[#allocation4 + $0x8] sm:$0xf] %v2672_v1  ;;  %2688 = vmatmul.bf16.vlgmr.msra.gmra.mxu0 %v2672_v1  ;;  %2701 = vmatmul.bf16.vlgmr.msra.gmra.mxu1 %v2672_v1 }
 0x84a   :  { %2714 = vmatmul.bf16.vlgmr.msra.gmra.mxu2 %v2672_v1  ;;  %2727 = vmatmul.bf16.vlgmr.msrb.gmra.mxu3 %v2672_v1  ;;  %v938_v1 = vadd.f32 %v5849_v32, %v5836_v37 }
 0x84b   :  { %2934 = vmatpush.bf16.msra.mxu0 %v5344_v13  ;;  %2947 = vmatpush.bf16.msra.mxu1 %v5346_v12 }
 0x84c   :  { %2960 = vmatpush.bf16.msra.mxu2 %v5348_v21  ;;  %2973 = vmatpush.bf16.msrb.mxu3 %v5351_v31 }
 0x84f   :  { %2935 = vmatpush.bf16.msra.mxu0 %v5356_v46  ;;  %2948 = vmatpush.bf16.msra.mxu1 %v5358_v0 }
 0x850   :  { %2961 = vmatpush.bf16.msra.mxu2 %v5360_v4  ;;  %2974 = vmatpush.bf16.msrb.mxu3 %v5363_v22 }
 0x853   :  { %2936 = vmatpush.bf16.msra.mxu0 %v5368_v23  ;;  %2949 = vmatpush.bf16.msra.mxu1 %v5370_v63 }
 0x854   :  { %2962 = vmatpush.bf16.msra.mxu2 %v5372_v59  ;;  %2975 = vmatpush.bf16.msrb.mxu3 %v5375_v61 }
 0x857   :  { %2937 = vmatpush.bf16.msra.mxu0 %v5380_v62  ;;  %2950 = vmatpush.bf16.msra.mxu1 %v5382_v16 }
 0x858   :  { %2963 = vmatpush.bf16.msra.mxu2 %v5384_v52  ;;  %2976 = vmatpush.bf16.msrb.mxu3 %v5387_v49 }
 0x85b   :  { %2938 = vmatpush.bf16.msra.mxu0 %v5396_v53  ;;  %2951 = vmatpush.bf16.msra.mxu1 %v5398_v7 }
 0x85c   :  { %2964 = vmatpush.bf16.msra.mxu2 %v5400_v5  ;;  %2977 = vmatpush.bf16.msrb.mxu3 %v5403_v54 }
 0x85f   :  { %2939 = vmatpush.bf16.msra.mxu0 %v5408_v20  ;;  %2952 = vmatpush.bf16.msra.mxu1 %v5410_v6 }
 0x860   :  { %2965 = vmatpush.bf16.msra.mxu2 %v5413_v35  ;;  %2978 = vmatpush.bf16.msrb.mxu3 %v5418_v55 }
 0x863   :  { %2940 = vmatpush.bf16.msra.mxu0 %v5420_v47  ;;  %2953 = vmatpush.bf16.msra.mxu1 %v5423_v2 }
 0x864   :  { %2966 = vmatpush.bf16.msra.mxu2 %v5426_v25  ;;  %2979 = vmatpush.bf16.msrb.mxu3 %v5428_v41 }
 0x867   :  { %2941 = vmatpush.bf16.msra.mxu0 %v5431_v29  ;;  %2954 = vmatpush.bf16.msra.mxu1 %v5434_v28 }
 0x868   :  { %2967 = vmatpush.bf16.msra.mxu2 %v5437_v42  ;;  %2980 = vmatpush.bf16.msrb.mxu3 %v5440_v17 }
 0x8c6   :  { %v2689_v36 = vpop.f32.mrf.mxu0  ;;  %v2702_v15 = vpop.f32.mrf.mxu1 }
 0x8c7   :  { %v2732_v38 = vadd.f32 %v2689_v36, %v854_v45  ;;  %v2733_v56 = vadd.f32 %v2702_v15, %v882_v30 }
 0x8c9   :  { %v3913_v34 = vmul.f32 -1.442695, %v2732_v38  ;;  %v3914_v48 = vmul.f32 -1.442695, %v2733_v56 }
 0x8cb   :  { %4317 = vpow2.f32 %v3913_v34 }
 0x8cc   :  { %4319 = vpow2.f32 %v3914_v48 }
 0x8cd   :  { %v2715_v18 = vpop.f32.mrf.mxu2  ;;  %v2728_v3 = vpop.f32.mrf.mxu3 }
 0x8ce   :  { %v2734_v60 = vadd.f32 %v2715_v18, %v910_v44  ;;  %v2691_v19 = vpop.f32.mrf.mxu0  ;;  %v2704_v39 = vpop.f32.mrf.mxu1  ;;  %v2735_v9 = vadd.f32 %v2728_v3, %v938_v1 }
 0x8d0   :  { %v3915_v58 = vmul.f32 -1.442695, %v2734_v60 }
 0x8d1   :  { %v4318_v14 = vpop.eup %4317 }
 0x8d2   :  { %v4320_v43 = vpop.eup %4319  ;;  %v2745_v10 = vadd.f32 1.0, %v4318_v14  ;;  %4321 = vpow2.f32 %v3915_v58 }
 0x8d3   :  { %v2746_v51 = vadd.f32 1.0, %v4320_v43 }
 0x8d4   :  { %4323 = vrcp.f32 %v2745_v10  ;;  %v2759_v34 = vand.u32 2147483648, %v2745_v10  ;;  %v2757_v44 = vand.u32 2147483647, %v2745_v10  ;;  %vm2753_vm6 = vweird.f32 %v2745_v10 }
 0x8d5   :  { %4325 = vrcp.f32 %v2746_v51  ;;  %v2717_v11 = vpop.f32.mrf.mxu2  ;;  %v2730_v50 = vpop.f32.mrf.mxu3  ;;  %v2774_v48 = vand.u32 2147483648, %v2746_v51  ;;  %v2772_v60 = vand.u32 2147483647, %v2746_v51  ;;  %vm2768_vm7 = vweird.f32 %v2746_v51 }
 0x8d6   :  { %v2760_v58 = vor.u32 1.1754944e-38, %v2759_v34  ;;  %vm2758_vm10 = vcmp.eq.f32.partialorder %v2757_v44, 8.507059e+37 }
 0x8d7   :  { %v2775_v43 = vor.u32 1.1754944e-38, %v2774_v48  ;;  %vm2773_vm11 = vcmp.eq.f32.partialorder %v2772_v60, 8.507059e+37 }
 0x8d8   :  { %v4322_v57 = vpop.eup %4321 }
 0x8d9   :  { %v2747_v40 = vadd.f32 1.0, %v4322_v57 }
 0x8da   :  { %v4324_v45 = vpop.eup %4323 }
 0x8db   :  { %v4326_v30 = vpop.eup %4325  ;;  %v2749_v36 = vmul.f32 %v4324_v45, %v2745_v10  ;;  %4327 = vrcp.f32 %v2747_v40  ;;  %vm2754_vm4 = vweird.f32 %v4324_v45  ;;  %vm2783_vm13 = vweird.f32 %v2747_v40 }
 0x8dc   :  { %v2764_v15 = vmul.f32 %v4326_v30, %v2746_v51  ;;  %4329 = vtanh.f32 %v2735_v9  ;;  %vm2769_vm5 = vweird.f32 %v4326_v30  ;;  %vm2755_vm8 = vmor %vm2753_vm6, %vm2754_vm4 }
 0x8dd   :  { %v2750_v38 = vsub.f32 1.0, %v2749_v36  ;;  %vm2770_vm9 = vmor %vm2768_vm7, %vm2769_vm5 }
 0x8de   :  { %v2765_v56 = vsub.f32 1.0, %v2764_v15 }
 0x8df   :  { %v2751_v24 = vmul.f32 %v4324_v45, %v2750_v38 }
 0x8e0   :  { %v2766_v18 = vmul.f32 %v4326_v30, %v2765_v56  ;;  %v2789_v56 = vand.u32 2147483648, %v2747_v40 }
 0x8e1   :  { %v4328_v19 = vpop.eup %4327  ;;  %v2752_v39 = vadd.f32 %v4324_v45, %v2751_v24 }
 0x8e2   :  { %v2779_v3 = vmul.f32 %v4328_v19, %v2747_v40  ;;  %v2767_v14 = vadd.f32 %v4326_v30, %v2766_v18  ;;  %v4330_v50 = vpop.eup %4329  ;;  %vm2784_vm12 = vweird.f32 %v4328_v19  ;;  %v2790_v48 = vor.u32 1.1754944e-38, %v2789_v56 }
 0x8e3   :  { %v2756_v11 = vsel %vm2755_vm8, %v4324_v45, %v2752_v39  ;;  %v2787_v45 = vand.u32 2147483647, %v2747_v40  ;;  %vm2785_vm14 = vmor %vm2783_vm13, %vm2784_vm12 }
 0x8e4   :  { %v2780_v57 = vsub.f32 1.0, %v2779_v3  ;;  %v2761_v32 = vsel %vm2758_vm10, %v2760_v58, %v2756_v11  ;;  %v2771_v1 = vsel %vm2770_vm9, %v4326_v30, %v2767_v14 }
 0x8e5   :  { %v2776_v9 = vsel %vm2773_vm11, %v2775_v43, %v2771_v1  ;;  %v2795_v36 = vmul.f32 %v4330_v50, %v2761_v32  ;;  %vm2788_vm15 = vcmp.eq.f32.partialorder %v2787_v45, 8.507059e+37 }
 0x8e6   :  { %v2781_v15 = vmul.f32 %v4328_v19, %v2780_v57  ;;  %v2794_v38 = vmul.f32 %v2776_v9, %v5616_v27 }
 0x8e8   :  { %v5660_v10 = vadd.f32 %v2795_v36, %v2794_v38  ;;  %v2782_v51 = vadd.f32 %v4328_v19, %v2781_v15 }
 0x8ea   :  { %4331 = vtanh.f32 %v5660_v10  ;;  %v2786_v34 = vsel %vm2785_vm14, %v4328_v19, %v2782_v51 }
 0x8eb   :  { %v2791_v24 = vsel %vm2788_vm15, %v2790_v48, %v2786_v34 }
 0x8f0   :  { %v4332_v30 = vpop.eup %4331 }
 0x8f1   :  { %v2798_v44 = vmul.f32 %v4332_v30, %v2791_v24 }
 0x8f3   :  { %v2799_v18 = vpack.c.bf16 %v2798_v44, %v2798_v44 }
 0x8f5   :  { %2801 = vst [vmem:[#allocation4 + $0xc] sm:$0xf] %v2799_v18  ;;  %2815 = vmatmul.bf16.vlgmr.msrb.gmra.mxu0 %v2799_v18  ;;  %2828 = vmatmul.bf16.vlgmr.msrb.gmra.mxu1 %v2799_v18 }
 0x8f6   :  { %2841 = vmatmul.bf16.vlgmr.msrb.gmra.mxu2 %v2799_v18  ;;  %2854 = vmatmul.bf16.vlgmr.msra.gmra.mxu3 %v2799_v18 }
 0x8f7   :  { %3061 = vmatpush.bf16.msrb.mxu0 %v5344_v13  ;;  %3074 = vmatpush.bf16.msrb.mxu1 %v5346_v12 }
 0x8f8   :  { %3087 = vmatpush.bf16.msrb.mxu2 %v5348_v21  ;;  %3100 = vmatpush.bf16.msra.mxu3 %v5351_v31  ;;  %v5850_v21 = vld [vmem:[#allocation38_spill] sm:$0xff] }
 0x8fb   :  { %3062 = vmatpush.bf16.msrb.mxu0 %v5356_v46  ;;  %3075 = vmatpush.bf16.msrb.mxu1 %v5358_v0  ;;  %v5851_v46 = vld [vmem:[#allocation74_spill] sm:$0xff] }
 0x8fc   :  { %3088 = vmatpush.bf16.msrb.mxu2 %v5360_v4  ;;  %3101 = vmatpush.bf16.msra.mxu3 %v5363_v22 }
 0x8ff   :  { %3063 = vmatpush.bf16.msrb.mxu0 %v5368_v23  ;;  %3076 = vmatpush.bf16.msrb.mxu1 %v5370_v63 }
 0x900   :  { %3089 = vmatpush.bf16.msrb.mxu2 %v5372_v59  ;;  %3102 = vmatpush.bf16.msra.mxu3 %v5375_v61  ;;  %v5852_v59 = vld [vmem:[#allocation75_spill] sm:$0xff] }
 0x903   :  { %3064 = vmatpush.bf16.msrb.mxu0 %v5380_v62  ;;  %3077 = vmatpush.bf16.msrb.mxu1 %v5382_v16 }
 0x904   :  { %3090 = vmatpush.bf16.msrb.mxu2 %v5384_v52  ;;  %3103 = vmatpush.bf16.msra.mxu3 %v5387_v49 }
 0x907   :  { %3065 = vmatpush.bf16.msrb.mxu0 %v5396_v53  ;;  %3078 = vmatpush.bf16.msrb.mxu1 %v5398_v7 }
 0x908   :  { %3091 = vmatpush.bf16.msrb.mxu2 %v5400_v5  ;;  %3104 = vmatpush.bf16.msra.mxu3 %v5403_v54 }
 0x90b   :  { %3066 = vmatpush.bf16.msrb.mxu0 %v5408_v20  ;;  %3079 = vmatpush.bf16.msrb.mxu1 %v5410_v6 }
 0x90c   :  { %3092 = vmatpush.bf16.msrb.mxu2 %v5413_v35  ;;  %3105 = vmatpush.bf16.msra.mxu3 %v5418_v55 }
 0x90f   :  { %3067 = vmatpush.bf16.msrb.mxu0 %v5420_v47  ;;  %3080 = vmatpush.bf16.msrb.mxu1 %v5423_v2  ;;  %v5853_v47 = vld [vmem:[#allocation63_spill] sm:$0xff] }
 0x910   :  { %3093 = vmatpush.bf16.msrb.mxu2 %v5426_v25  ;;  %3106 = vmatpush.bf16.msra.mxu3 %v5428_v41 }
 0x913   :  { %3068 = vmatpush.bf16.msrb.mxu0 %v5431_v29  ;;  %3081 = vmatpush.bf16.msrb.mxu1 %v5434_v28 }
 0x914   :  { %3094 = vmatpush.bf16.msrb.mxu2 %v5437_v42  ;;  %3107 = vmatpush.bf16.msra.mxu3 %v5440_v17 }
 0x972   :  { %v2816_v13 = vpop.f32.mrf.mxu0  ;;  %v2829_v12 = vpop.f32.mrf.mxu1 }
 0x973   :  { %v2859_v31 = vadd.f32 %v2816_v13, %v5850_v21  ;;  %v2860_v0 = vadd.f32 %v2829_v12, %v5851_v46  ;;  %v5855_v46 = vld [vmem:[#allocation76_spill] sm:$0xff] }
 0x975   :  { %v3916_v4 = vmul.f32 -1.442695, %v2859_v31  ;;  %v3917_v22 = vmul.f32 -1.442695, %v2860_v0  ;;  %v887_v0 = vadd.f32 %v5855_v46, %v5832_v33 }
 0x977   :  { %4333 = vpow2.f32 %v3916_v4  ;;  %v4114_v4 = vld [vmem:[#allocation17 + $0x38] sm:$0xff] }
 0x978   :  { %4335 = vpow2.f32 %v3917_v22 }
 0x979   :  { %v2842_v23 = vpop.f32.mrf.mxu2  ;;  %v2855_v63 = vpop.f32.mrf.mxu3 }
 0x97a   :  { %v2861_v61 = vadd.f32 %v2842_v23, %v5852_v59  ;;  %v2818_v62 = vpop.f32.mrf.mxu0  ;;  %v2831_v16 = vpop.f32.mrf.mxu1  ;;  %v2862_v2 = vadd.f32 %v2855_v63, %v5853_v47 }
 0x97b   :  { %v4113_v16 = vld [vmem:[#allocation17 + $0x30] sm:$0xff] }
 0x97c   :  { %v3918_v52 = vmul.f32 -1.442695, %v2861_v61 }
 0x97d   :  { %v4334_v49 = vpop.eup %4333 }
 0x97e   :  { %v4336_v53 = vpop.eup %4335  ;;  %v2872_v7 = vadd.f32 1.0, %v4334_v49  ;;  %4337 = vpow2.f32 %v3918_v52  ;;  %v4112_v52 = vld [vmem:[#allocation17 + $0x28] sm:$0xff]  ;;  %v5856_v49 = vld [vmem:[#allocation77_spill] sm:$0xff] }
 0x97f   :  { %v2873_v5 = vadd.f32 1.0, %v4336_v53  ;;  %v915_v53 = vadd.f32 %v5856_v49, %v5834_v26  ;;  %v4110_v26 = vld [vmem:[#allocation17 + $0x18] sm:$0xff] }
 0x980   :  { %4339 = vrcp.f32 %v2872_v7  ;;  %v2886_v17 = vand.u32 2147483648, %v2872_v7  ;;  %v2884_v60 = vand.u32 2147483647, %v2872_v7  ;;  %vm2880_vm2 = vweird.f32 %v2872_v7 }
 0x981   :  { %4341 = vrcp.f32 %v2873_v5  ;;  %v2844_v54 = vpop.f32.mrf.mxu2  ;;  %v2857_v20 = vpop.f32.mrf.mxu3  ;;  %v2901_v27 = vand.u32 2147483648, %v2873_v5  ;;  %v2899_v39 = vand.u32 2147483647, %v2873_v5  ;;  %vm2895_vm3 = vweird.f32 %v2873_v5 }
 0x982   :  { %v2887_v43 = vor.u32 1.1754944e-38, %v2886_v17  ;;  %vm2885_vm6 = vcmp.eq.f32.partialorder %v2884_v60, 8.507059e+37  ;;  %v4111_v20 = vld [vmem:[#allocation17 + $0x20] sm:$0xff] }
 0x983   :  { %v2902_v50 = vor.u32 1.1754944e-38, %v2901_v27  ;;  %vm2900_vm7 = vcmp.eq.f32.partialorder %v2899_v39, 8.507059e+37 }
 0x984   :  { %v4338_v6 = vpop.eup %4337 }
 0x985   :  { %v2874_v35 = vadd.f32 1.0, %v4338_v6 }
 0x986   :  { %v4340_v55 = vpop.eup %4339 }
 0x987   :  { %v4342_v25 = vpop.eup %4341  ;;  %v2876_v41 = vmul.f32 %v4340_v55, %v2872_v7  ;;  %4343 = vrcp.f32 %v2874_v35  ;;  %vm2881_vm0 = vweird.f32 %v4340_v55  ;;  %v2916_v48 = vand.u32 2147483648, %v2874_v35 }
 0x988   :  { %v2891_v29 = vmul.f32 %v4342_v25, %v2873_v5  ;;  %4345 = vtanh.f32 %v2862_v2  ;;  %vm2896_vm1 = vweird.f32 %v4342_v25  ;;  %vm2882_vm4 = vmor %vm2880_vm2, %vm2881_vm0  ;;  %vm2910_vm9 = vweird.f32 %v2874_v35 }
 0x989   :  { %v2877_v28 = vsub.f32 1.0, %v2876_v41  ;;  %vm2897_vm5 = vmor %vm2895_vm3, %vm2896_vm1  ;;  %v2914_v30 = vand.u32 2147483647, %v2874_v35  ;;  %v2917_v44 = vor.u32 1.1754944e-38, %v2916_v48 }
 0x98a   :  { %v2892_v42 = vsub.f32 1.0, %v2891_v29  ;;  %v4109_v29 = vld [vmem:[#allocation17 + $0x10] sm:$0xff] }
 0x98b   :  { %v2878_v40 = vmul.f32 %v4340_v55, %v2877_v28  ;;  %vm2915_vm11 = vcmp.eq.f32.partialorder %v2914_v30, 8.507059e+37 }
 0x98c   :  { %v2893_v19 = vmul.f32 %v4342_v25, %v2892_v42  ;;  %v5857_v42 = vld [vmem:[#allocation67_spill] sm:$0xff] }
 0x98d   :  { %v4344_v3 = vpop.eup %4343  ;;  %v2879_v58 = vadd.f32 %v4340_v55, %v2878_v40  ;;  %v943_v17 = vadd.f32 %v5857_v42, %v5836_v37 }
 0x98e   :  { %v2906_v14 = vmul.f32 %v4344_v3, %v2874_v35  ;;  %v2894_v11 = vadd.f32 %v4342_v25, %v2893_v19  ;;  %v4346_v32 = vpop.eup %4345  ;;  %vm2911_vm8 = vweird.f32 %v4344_v3 }
 0x98f   :  { %v2883_v57 = vsel %vm2882_vm4, %v4340_v55, %v2879_v58  ;;  %vm2912_vm10 = vmor %vm2910_vm9, %vm2911_vm8 }
 0x990   :  { %v2907_v1 = vsub.f32 1.0, %v2906_v14  ;;  %v2888_v9 = vsel %vm2885_vm6, %v2887_v43, %v2883_v57  ;;  %v2898_v36 = vsel %vm2897_vm5, %v4342_v25, %v2894_v11 }
 0x991   :  { %v2903_v15 = vsel %vm2900_vm7, %v2902_v50, %v2898_v36  ;;  %v2922_v38 = vmul.f32 %v4346_v32, %v2888_v9 }
 0x992   :  { %v2908_v51 = vmul.f32 %v4344_v3, %v2907_v1  ;;  %v2921_v56 = vmul.f32 %v2903_v15, %v5660_v10  ;;  %v5854_v10 = vld [vmem:[#allocation40_spill] sm:$0xff]  ;;  %v4107_v1 = vld [vmem:[#allocation17] sm:$0xff] }
 0x993   :  { %v859_v31 = vadd.f32 %v5854_v10, %v5830_v8 }
 0x994   :  { %v5700_v45 = vadd.f32 %v2922_v38, %v2921_v56  ;;  %v2909_v34 = vadd.f32 %v4344_v3, %v2908_v51 }
 0x996   :  { %4347 = vtanh.f32 %v5700_v45  ;;  %v2913_v24 = vsel %vm2912_vm10, %v4344_v3, %v2909_v34  ;;  %v4108_v3 = vld [vmem:[#allocation17 + $0x8] sm:$0xff] }
 0x997   :  { %v2918_v13 = vsel %vm2915_vm11, %v2917_v44, %v2913_v24 }
 0x99c   :  { %v4348_v18 = vpop.eup %4347 }
 0x99d   :  { %v2925_v12 = vmul.f32 %v4348_v18, %v2918_v13 }
 0x99f   :  { %v2926_v21 = vpack.c.bf16 %v2925_v12, %v2925_v12 }
 0x9a1   :  { %2928 = vst [vmem:[#allocation4 + $0x10] sm:$0xf] %v2926_v21  ;;  %2942 = vmatmul.bf16.vlgmr.msra.gmra.mxu0 %v2926_v21  ;;  %2955 = vmatmul.bf16.vlgmr.msra.gmra.mxu1 %v2926_v21 }
 0x9a2   :  { %2968 = vmatmul.bf16.vlgmr.msra.gmra.mxu2 %v2926_v21  ;;  %2981 = vmatmul.bf16.vlgmr.msrb.gmra.mxu3 %v2926_v21 }
 0x9a3   :  { %3280 = vmatpush.bf16.msra.mxu0 %v4114_v4 }
 0x9a7   :  { %3281 = vmatpush.bf16.msra.mxu0 %v4113_v16  ;;  %v4105_v16 = vld [vmem:[#allocation4 + $0x8] sm:$0xff] }
 0x9ab   :  { %3282 = vmatpush.bf16.msra.mxu0 %v4112_v52 }
 0x9af   :  { %3283 = vmatpush.bf16.msra.mxu0 %v4111_v20 }
 0x9b3   :  { %3284 = vmatpush.bf16.msra.mxu0 %v4110_v26 }
 0x9b7   :  { %3285 = vmatpush.bf16.msra.mxu0 %v4109_v29 }
 0x9bb   :  { %3286 = vmatpush.bf16.msra.mxu0 %v4108_v3 }
 0x9bf   :  { %3287 = vmatpush.bf16.msra.mxu0 %v4107_v1 }
 0xa1e   :  { %v2943_v22 = vpop.f32.mrf.mxu0  ;;  %v2956_v23 = vpop.f32.mrf.mxu1 }
 0xa1f   :  { %v2986_v63 = vadd.f32 %v2943_v22, %v859_v31  ;;  %v2987_v59 = vadd.f32 %v2956_v23, %v887_v0 }
 0xa21   :  { %v3919_v61 = vmul.f32 -1.442695, %v2986_v63  ;;  %v3920_v62 = vmul.f32 -1.442695, %v2987_v59 }
 0xa23   :  { %4349 = vpow2.f32 %v3919_v61 }
 0xa24   :  { %4351 = vpow2.f32 %v3920_v62 }
 0xa25   :  { %v2969_v8 = vpop.f32.mrf.mxu2  ;;  %v2982_v7 = vpop.f32.mrf.mxu3 }
 0xa26   :  { %v2988_v5 = vadd.f32 %v2969_v8, %v915_v53  ;;  %v2945_v33 = vpop.f32.mrf.mxu0  ;;  %v2958_v54 = vpop.f32.mrf.mxu1  ;;  %v2989_v60 = vadd.f32 %v2982_v7, %v943_v17  ;;  %v5858_v8 = vld [vmem:[#allocation42_spill] sm:$0xff] }
 0xa27   :  { %v5721_v17 = vld [vmem:[%s5744_s9] ss:$0 sm:$0xff]  ;;  %s4623_s9 = smov [#allocation19]  }
 0xa28   :  { %v3921_v6 = vmul.f32 -1.442695, %v2988_v5  ;;  %v5859_v5 = vld [vmem:[#allocation78_spill] sm:$0xff]  ;;  %s3321_s19 = sshll.u32 %s4623_s9, 4  ;;  %s3322_s19 = int_to_ptr.vmem [resolvable:$true] %s3321_s19 }
 0xa29   :  { %v4350_v35 = vpop.eup %4349 }
 0xa2a   :  { %v4352_v55 = vpop.eup %4351  ;;  %v2999_v47 = vadd.f32 1.0, %v4350_v35  ;;  %4353 = vpow2.f32 %v3921_v6 }
 0xa2b   :  { %v3000_v2 = vadd.f32 1.0, %v4352_v55  ;;  %v5860_v55 = vld [vmem:[#allocation79_spill] sm:$0xff] }
 0xa2c   :  { %4355 = vrcp.f32 %v2999_v47  ;;  %v3013_v11 = vand.u32 2147483648, %v2999_v47  ;;  %v3011_v32 = vand.u32 2147483647, %v2999_v47  ;;  %vm3007_vm14 = vweird.f32 %v2999_v47 }
 0xa2d   :  { %4357 = vrcp.f32 %v3000_v2  ;;  %v2971_v25 = vpop.f32.mrf.mxu2  ;;  %v2984_v41 = vpop.f32.mrf.mxu3  ;;  %v3028_v50 = vand.u32 2147483648, %v3000_v2  ;;  %v3026_v9 = vand.u32 2147483647, %v3000_v2  ;;  %vm3022_vm15 = vweird.f32 %v3000_v2 }
 0xa2e   :  { %v3014_v51 = vor.u32 1.1754944e-38, %v3013_v11  ;;  %vm3012_vm2 = vcmp.eq.f32.partialorder %v3011_v32, 8.507059e+37 }
 0xa2f   :  { %v3029_v34 = vor.u32 1.1754944e-38, %v3028_v50  ;;  %vm3027_vm3 = vcmp.eq.f32.partialorder %v3026_v9, 8.507059e+37 }
 0xa30   :  { %v4354_v28 = vpop.eup %4353 }
 0xa31   :  { %v3001_v27 = vadd.f32 1.0, %v4354_v28 }
 0xa32   :  { %v4356_v40 = vpop.eup %4355 }
 0xa33   :  { %v4358_v19 = vpop.eup %4357  ;;  %v3003_v39 = vmul.f32 %v4356_v40, %v2999_v47  ;;  %4359 = vrcp.f32 %v3001_v27  ;;  %vm3008_vm12 = vweird.f32 %v4356_v40  ;;  %v3043_v0 = vand.u32 2147483648, %v3001_v27 }
 0xa34   :  { %v3018_v58 = vmul.f32 %v4358_v19, %v3000_v2  ;;  %4361 = vtanh.f32 %v2989_v60  ;;  %vm3023_vm13 = vweird.f32 %v4358_v19  ;;  %vm3009_vm0 = vmor %vm3007_vm14, %vm3008_vm12  ;;  %vm3037_vm5 = vweird.f32 %v3001_v27 }
 0xa35   :  { %v3004_v14 = vsub.f32 1.0, %v3003_v39  ;;  %vm3024_vm1 = vmor %vm3022_vm15, %vm3023_vm13  ;;  %v3041_v4 = vand.u32 2147483647, %v3001_v27  ;;  %v3044_v23 = vor.u32 1.1754944e-38, %v3043_v0 }
 0xa36   :  { %v3019_v43 = vsub.f32 1.0, %v3018_v58 }
 0xa37   :  { %v3005_v57 = vmul.f32 %v4356_v40, %v3004_v14  ;;  %vm3042_vm7 = vcmp.eq.f32.partialorder %v3041_v4, 8.507059e+37  ;;  %v5861_v14 = vld [vmem:[#allocation71_spill] sm:$0xff] }
 0xa38   :  { %v3020_v37 = vmul.f32 %v4358_v19, %v3019_v43 }
 0xa39   :  { %v4360_v36 = vpop.eup %4359  ;;  %v3006_v15 = vadd.f32 %v4356_v40, %v3005_v57 }
 0xa3a   :  { %v3033_v38 = vmul.f32 %v4360_v36, %v3001_v27  ;;  %v3021_v56 = vadd.f32 %v4358_v19, %v3020_v37  ;;  %v4362_v30 = vpop.eup %4361  ;;  %vm3038_vm4 = vweird.f32 %v4360_v36 }
 0xa3b   :  { %v3010_v48 = vsel %vm3009_vm0, %v4356_v40, %v3006_v15  ;;  %vm3039_vm6 = vmor %vm3037_vm5, %vm3038_vm4 }
 0xa3c   :  { %v3034_v24 = vsub.f32 1.0, %v3033_v38  ;;  %v3015_v44 = vsel %vm3012_vm2, %v3014_v51, %v3010_v48  ;;  %v3025_v18 = vsel %vm3024_vm1, %v4358_v19, %v3021_v56 }
 0xa3d   :  { %v3030_v13 = vsel %vm3027_vm3, %v3029_v34, %v3025_v18  ;;  %v3049_v12 = vmul.f32 %v4362_v30, %v3015_v44 }
 0xa3e   :  { %v3035_v21 = vmul.f32 %v4360_v36, %v3034_v24  ;;  %v3048_v10 = vmul.f32 %v3030_v13, %v5700_v45  ;;  %v4104_v45 = vld [vmem:[#allocation4] sm:$0xff] }
 0xa40   :  { %v5712_v31 = vadd.f32 %v3049_v12, %v3048_v10  ;;  %v3036_v46 = vadd.f32 %v4360_v36, %v3035_v21 }
 0xa42   :  { %4363 = vtanh.f32 %v5712_v31  ;;  %v3040_v22 = vsel %vm3039_vm6, %v4360_v36, %v3036_v46 }
 0xa43   :  { %v3045_v59 = vsel %vm3042_vm7, %v3044_v23, %v3040_v22 }
 0xa48   :  { %v4364_v63 = vpop.eup %4363 }
 0xa49   :  { %v3052_v61 = vmul.f32 %v4364_v63, %v3045_v59 }
 0xa4b   :  { %v3053_v62 = vpack.c.bf16 %v3052_v61, %v3052_v61 }
 0xa4d   :  { %3055 = vst [vmem:[#allocation4 + $0x14] sm:$0xf] %v3053_v62  ;;  %3069 = vmatmul.bf16.vlgmr.msrb.gmra.mxu0 %v3053_v62  ;;  %3082 = vmatmul.bf16.vlgmr.msrb.gmra.mxu1 %v3053_v62 }
 0xa4e   :  { %3095 = vmatmul.bf16.vlgmr.msrb.gmra.mxu2 %v3053_v62  ;;  %3108 = vmatmul.bf16.vlgmr.msra.gmra.mxu3 %v3053_v62 }
 0xa54   :  { %v4106_v52 = vld [vmem:[#allocation4 + $0x10] sm:$0xff] }
 0xa5d   :  { %3288 = vmatmul.bf16.vlgmr.msra.gmra.mxu0 %v4104_v45 }
 0xa6d   :  { %3293 = vmatmul.bf16.gmra.mxu0 %v4105_v16 }
 0xa7d   :  { %3298 = vmatmul.bf16.gmra.mxu0 %v4106_v52 }
 0xaca   :  { %v3070_v49 = vpop.f32.mrf.mxu0  ;;  %v3083_v53 = vpop.f32.mrf.mxu1 }
 0xacb   :  { %v3113_v7 = vadd.f32 %v3070_v49, %v5858_v8  ;;  %v3114_v33 = vadd.f32 %v3083_v53, %v5859_v5 }
 0xacd   :  { %v3922_v54 = vmul.f32 -1.442695, %v3113_v7  ;;  %v3923_v20 = vmul.f32 -1.442695, %v3114_v33 }
 0xacf   :  { %4365 = vpow2.f32 %v3922_v54 }
 0xad0   :  { %4367 = vpow2.f32 %v3923_v20 }
 0xad1   :  { %v3096_v6 = vpop.f32.mrf.mxu2  ;;  %v3109_v35 = vpop.f32.mrf.mxu3 }
 0xad2   :  { %v3115_v47 = vadd.f32 %v3096_v6, %v5860_v55  ;;  %v3072_v2 = vpop.f32.mrf.mxu0  ;;  %v3085_v25 = vpop.f32.mrf.mxu1  ;;  %v3116_v43 = vadd.f32 %v3109_v35, %v5861_v14 }
 0xad4   :  { %v3924_v41 = vmul.f32 -1.442695, %v3115_v47 }
 0xad5   :  { %v4366_v26 = vpop.eup %4365 }
 0xad6   :  { %v4368_v29 = vpop.eup %4367  ;;  %v3126_v28 = vadd.f32 1.0, %v4366_v26  ;;  %4369 = vpow2.f32 %v3924_v41  ;;  %v4622_v41 = vmov 0.0  }
 0xad7   :  { %v3127_v42 = vadd.f32 1.0, %v4368_v29  ;;  %3308 = vst [vmem:[#allocation19] sm:$0xff] %v4622_v41 }
 0xad8   :  { %4371 = vrcp.f32 %v3126_v28  ;;  %v3138_v37 = vand.u32 2147483647, %v3126_v28  ;;  %v3140_v9 = vand.u32 2147483648, %v3126_v28  ;;  %vm3134_vm10 = vweird.f32 %v3126_v28 }
 0xad9   :  { %4373 = vrcp.f32 %v3127_v42  ;;  %v3098_v27 = vpop.f32.mrf.mxu2  ;;  %v3111_v40 = vpop.f32.mrf.mxu3  ;;  %v3155_v15 = vand.u32 2147483648, %v3127_v42  ;;  %v3153_v34 = vand.u32 2147483647, %v3127_v42  ;;  %vm3149_vm11 = vweird.f32 %v3127_v42 }
 0xada   :  { %v3289_v60 = vpop.f32.mrf.mxu0  ;;  %v3141_v44 = vor.u32 1.1754944e-38, %v3140_v9  ;;  %vm3139_vm14 = vcmp.eq.f32.partialorder %v3138_v37, 8.507059e+37 }
 0xadb   :  { %v3290_v19 = vadd.f32 %v5721_v17, %v3289_v60  ;;  %v3156_v13 = vor.u32 1.1754944e-38, %v3155_v15  ;;  %vm3154_vm15 = vcmp.eq.f32.partialorder %v3153_v34, 8.507059e+37 }
 0xadc   :  { %v4370_v39 = vpop.eup %4369 }
 0xadd   :  { %v3128_v3 = vadd.f32 1.0, %v4370_v39  ;;  %3310 = vst [vmem:[#allocation19 + $0x8] sm:$0xff] %v3290_v19 }
 0xade   :  { %v4372_v58 = vpop.eup %4371 }
 0xadf   :  { %v4374_v11 = vpop.eup %4373  ;;  %v3130_v50 = vmul.f32 %v4372_v58, %v3126_v28  ;;  %4375 = vrcp.f32 %v3128_v3  ;;  %vm3135_vm8 = vweird.f32 %v4372_v58  ;;  %v3170_v16 = vand.u32 2147483648, %v3128_v3 }
 0xae0   :  { %v3145_v57 = vmul.f32 %v4374_v11, %v3127_v42  ;;  %4377 = vtanh.f32 %v3116_v43  ;;  %vm3150_vm9 = vweird.f32 %v4374_v11  ;;  %vm3136_vm12 = vmor %vm3134_vm10, %vm3135_vm8  ;;  %vm3164_vm1 = vweird.f32 %v3128_v3 }
 0xae1   :  { %v3131_v32 = vsub.f32 1.0, %v3130_v50  ;;  %vm3151_vm13 = vmor %vm3149_vm11, %vm3150_vm9  ;;  %v3168_v52 = vand.u32 2147483647, %v3128_v3  ;;  %v3171_v53 = vor.u32 1.1754944e-38, %v3170_v16 }
 0xae2   :  { %v3146_v1 = vsub.f32 1.0, %v3145_v57  ;;  %v3291_v36 = vpop.f32.mrf.mxu0 }
 0xae3   :  { %v3132_v38 = vmul.f32 %v4372_v58, %v3131_v32  ;;  %v3292_v51 = vadd.f32 %v5721_v17, %v3291_v36  ;;  %vm3169_vm3 = vcmp.eq.f32.partialorder %v3168_v52, 8.507059e+37 }
 0xae4   :  { %v3147_v56 = vmul.f32 %v4374_v11, %v3146_v1 }
 0xae5   :  { %v4376_v48 = vpop.eup %4375  ;;  %v3133_v30 = vadd.f32 %v4372_v58, %v3132_v38  ;;  %3311 = vst [vmem:[#allocation19 + $0x10] sm:$0xff] %v3292_v51 }
 0xae6   :  { %v3160_v24 = vmul.f32 %v4376_v48, %v3128_v3  ;;  %v3148_v18 = vadd.f32 %v4374_v11, %v3147_v56  ;;  %v4378_v21 = vpop.eup %4377  ;;  %vm3165_vm0 = vweird.f32 %v4376_v48 }
 0xae7   :  { %v3137_v12 = vsel %vm3136_vm12, %v4372_v58, %v3133_v30  ;;  %vm3166_vm2 = vmor %vm3164_vm1, %vm3165_vm0 }
 0xae8   :  { %v3161_v10 = vsub.f32 1.0, %v3160_v24  ;;  %v3142_v46 = vsel %vm3139_vm14, %v3141_v44, %v3137_v12  ;;  %v3152_v0 = vsel %vm3151_vm13, %v4374_v11, %v3148_v18 }
 0xae9   :  { %v3157_v4 = vsel %vm3154_vm15, %v3156_v13, %v3152_v0  ;;  %v3176_v22 = vmul.f32 %v4378_v21, %v3142_v46 }
 0xaea   :  { %v3162_v23 = vmul.f32 %v4376_v48, %v3161_v10  ;;  %v3175_v63 = vmul.f32 %v3157_v4, %v5712_v31  ;;  %v3294_v59 = vpop.f32.mrf.mxu0 }
 0xaeb   :  { %v3295_v61 = vadd.f32 %v5721_v17, %v3294_v59 }
 0xaec   :  { %v3177_v62 = vadd.f32 %v3176_v22, %v3175_v63  ;;  %v3163_v45 = vadd.f32 %v4376_v48, %v3162_v23 }
 0xaed   :  { %3312 = vst [vmem:[#allocation19 + $0x18] sm:$0xff] %v3295_v61 }
 0xaee   :  { %4379 = vtanh.f32 %v3177_v62  ;;  %v3167_v49 = vsel %vm3166_vm2, %v4376_v48, %v3163_v45 }
 0xaef   :  { %v3172_v31 = vsel %vm3169_vm3, %v3171_v53, %v3167_v49 }
 0xaf2   :  { %v3296_v8 = vpop.f32.mrf.mxu0 }
 0xaf3   :  { %v3297_v7 = vadd.f32 %v5721_v17, %v3296_v8 }
 0xaf4   :  { %v4380_v5 = vpop.eup %4379 }
 0xaf5   :  { %v3179_v33 = vmul.f32 %v4380_v5, %v3172_v31  ;;  %3313 = vst [vmem:[#allocation19 + $0x20] sm:$0xff] %v3297_v7 }
 0xaf7   :  { %v3180_v54 = vpack.c.bf16 %v3179_v33, %v3179_v33 }
 0xaf9   :  { %3182 = vst [vmem:[#allocation4 + $0x18] sm:$0xf] %v3180_v54 }
 0xafa   :  { %v3299_v20 = vpop.f32.mrf.mxu0 }
 0xafb   :  { %v3300_v6 = vadd.f32 %v5721_v17, %v3299_v20 }
 0xafd   :  { %3314 = vst [vmem:[#allocation19 + $0x28] sm:$0xff] %v3300_v6 }
 0xb00   :  { %v3189_v35 = vld [vmem:[#allocation4 + $0x18] sm:$0xf] }
 0xb01   :  { %v3223_v55 = vunpack.c.l.b16 %v3189_v35 }
 0xb02   :  { %v3301_v47 = vpop.f32.mrf.mxu0 }
 0xb03   :  { %v3302_v2 = vadd.f32 %v5721_v17, %v3301_v47  ;;  %v3227_v25 = vpack.c.b16 %v3223_v55, %v3223_v55 }
 0xb05   :  { %3315 = vst [vmem:[#allocation19 + $0x30] sm:$0xff] %v3302_v2  ;;  %3303 = vmatmul.bf16.gmra.mxu0 %v3227_v25 }
 0xb82   :  { %v3304_v26 = vpop.f32.mrf.mxu0 }
 0xb83   :  { %v3305_v29 = vadd.f32 %v5721_v17, %v3304_v26 }
 0xb85   :  { %3316 = vst [vmem:[#allocation19 + $0x38] sm:$0xff] %v3305_v29 }
 0xb86   :  { %3329 = dma.vmem_to_hbm [thread:$0]  %s3322_s19, 1024, %s3324_s5, [#allocation7], %s4624_s13, %s4624_s13, %s4625_s14  }
 0xb8a   :  { %v3306_v28 = vpop.f32.mrf.mxu0 }
 0xb8b   :  { %4607 = dma.done.wait [#allocation7], 1024  }
 0xb8c   :  { %4608 = vsyncadd [#allocation7], 4294966272 }
 0xb8d   :  { %3334 = vsyncpa [#allocation6], 1 }
 0xb8e   :  { %3335 = vsyncpa [#allocation9], 1 }
 0xb8f   :  { %3336 = vsyncpa [#allocation12], 1 }
 0xb90   :  { %3337 = vsyncpa [#allocation15], 1 }
 0xb91   :  { %3338 = vsyncpa [#allocation18], 1 }
 0xb92   :  { %3339 = vsyncpa [#allocation7], 1 }

</bundles_post_ra>
